<compile_context>
chip_gen: v7x
topology: tpu7x:2x2x1
jax: 0.10.0
libtpu: 0.0.40
codegen_flags: <defaults>
</compile_context>

<pallas_src>
import functools
import math

import jax
import jax.numpy as jnp
from jax.experimental import pallas as pl
from jax.experimental.pallas import tpu as pltpu

LN_EPS = 1e-12                      # BertLayerNorm default eps
_VMEM_LIMIT = 64 * 1024 * 1024      # explicit scoped-VMEM budget (fits v7x)


# ----------------------------------------------------------------------------
# In-kernel math helpers
# ----------------------------------------------------------------------------
def _gelu(x):
    # tanh-approx GELU: tanh runs on the EUP (otherwise-idle slot) instead of
    # a ~10-op polynomial erf on the VALU.
    c = math.sqrt(2.0 / math.pi)
    return 0.5 * x * (1.0 + jnp.tanh(c * (x + 0.044715 * x * x * x)))


# ----------------------------------------------------------------------------
# Tile selection helpers
# ----------------------------------------------------------------------------
def _row_tile(m, max_tile=256):
    # Single full block for small M (grid-step overhead bound); otherwise the
    # largest divisor <= max_tile (>=2 blocks falls out automatically).
    if m <= max_tile:
        return m
    for t in (max_tile, 128, 64, 32, 16, 8):
        if m % t == 0:
            return t
    return m


def _col_tile(n, max_tile=1024):
    if n <= max_tile:
        return n
    for t in (max_tile, 512, 256, 128):
        if n % t == 0:
            return t
    return n


def _k_tile(k, max_tile=512):
    if k <= max_tile:
        return k
    for t in (max_tile, 256, 128):
        if k % t == 0:
            return t
    return k


def _q_tile(s, max_tile=128):
    if s <= max_tile:
        return s
    for t in (max_tile, 64, 32, 16, 8):
        if s % t == 0:
            return t
    return s


# ----------------------------------------------------------------------------
# Fused linear kernel:  y = maybe_LN( act(x @ W + b) [+ residual] )
# K is a reduction grid axis with an f32 VMEM accumulator; bf16 MXU operands.
# ----------------------------------------------------------------------------
def _fused_linear_kernel(*refs, activation, add_residual, apply_ln):
    i = 0
    x_ref = refs[i]; i += 1
    w_ref = refs[i]; i += 1
    b_ref = refs[i]; i += 1
    r_ref = None
    if add_residual:
        r_ref = refs[i]; i += 1
    g_ref = beta_ref = None
    if apply_ln:
        g_ref = refs[i]; beta_ref = refs[i + 1]; i += 2
    o_ref = refs[i]; i += 1
    acc_ref = refs[i]

    k_idx = pl.program_id(2)

    @pl.when(k_idx == 0)
    def _():
        acc_ref[...] = jnp.zeros_like(acc_ref)

    acc_ref[...] += jnp.dot(x_ref[...].astype(jnp.bfloat16),
                            w_ref[...].astype(jnp.bfloat16),
                            preferred_element_type=jnp.float32)

    @pl.when(k_idx == pl.num_programs(2) - 1)
    def _():
        y = acc_ref[...] + b_ref[...].astype(jnp.float32)
        if activation == "gelu":
            y = _gelu(y)
        elif activation == "tanh":
            y = jnp.tanh(y)
        if add_residual:
            y = y + r_ref[...].astype(jnp.float32)
        if apply_ln:
            mean = jnp.mean(y, axis=-1, keepdims=True)
            var = jnp.mean(jnp.square(y - mean), axis=-1, keepdims=True)
            y = (y - mean) * jax.lax.rsqrt(var + LN_EPS)
            y = (y * g_ref[...].astype(jnp.float32)
                 + beta_ref[...].astype(jnp.float32))
        o_ref[...] = y.astype(o_ref.dtype)


def fused_linear(x, w, b, *, residual=None, ln=None, activation="none",
                 out_dtype=jnp.bfloat16, max_tm=256, max_tn=1024, max_tk=512):
    """x: (M, K) bf16/f32, w: (K, N) bf16, b: (N,) f32 -> (M, N) out_dtype.

    Optionally fuses: activation, residual add, LayerNorm(gamma, beta).
    When LayerNorm is fused the full N lives in one block (row reduction).
    """
    M, K = x.shape
    N = w.shape[1]

    # Fallback padding for non-128-multiple wide outputs (e.g. vocab). Ideally
    # weights are pre-padded at init so this never runs inside the forward.
    n_pad = 0
    if N > 128 and N % 128 != 0 and ln is None and residual is None:
        n_pad = 128 - N % 128
        w = jnp.pad(w, ((0, 0), (0, n_pad)))
        b = jnp.pad(b, ((0, n_pad),))
    Np = N + n_pad

    tm = _row_tile(M, max_tm)
    tn = Np if ln is not None else _col_tile(Np, max_tn)
    tk = _k_tile(K, max_tk)
    grid = (M // tm, Np // tn, K // tk)

    in_specs = [
        pl.BlockSpec((tm, tk), lambda i, j, k: (i, k)),
        pl.BlockSpec((tk, tn), lambda i, j, k: (k, j)),
        pl.BlockSpec((1, tn), lambda i, j, k: (0, j)),
    ]
    args = [x, w, b.reshape(1, Np)]
    if residual is not None:
        in_specs.append(pl.BlockSpec((tm, tn), lambda i, j, k: (i, j)))
        args.append(residual)
    if ln is not None:
        gamma, beta = ln
        in_specs.append(pl.BlockSpec((1, tn), lambda i, j, k: (0, j)))
        in_specs.append(pl.BlockSpec((1, tn), lambda i, j, k: (0, j)))
        args.append(gamma.reshape(1, Np))
        args.append(beta.reshape(1, Np))

    out = pl.pallas_call(
        functools.partial(_fused_linear_kernel,
                          activation=activation,
                          add_residual=residual is not None,
                          apply_ln=ln is not None),
        out_shape=jax.ShapeDtypeStruct((M, Np), out_dtype),
        grid_spec=pltpu.PrefetchScalarGridSpec(
            num_scalar_prefetch=0,
            grid=grid,
            in_specs=in_specs,
            out_specs=pl.BlockSpec((tm, tn), lambda i, j, k: (i, j)),
            scratch_shapes=[pltpu.VMEM((tm, tn), jnp.float32)],
        ),
        compiler_params=pltpu.CompilerParams(
            dimension_semantics=("parallel", "parallel", "arbitrary"),
            vmem_limit_bytes=_VMEM_LIMIT),
    )(*args)
    if n_pad:
        out = out[:, :N]
    return out


# ----------------------------------------------------------------------------
# Attention: consumes the (B, S, 3H) QKV slab, splits heads inside the kernel
# (VMEM scratch), writes merged (B, S, H) context (lane-dense last dim = H).
# Grid = (B, q_blocks).
# ----------------------------------------------------------------------------
def _attention_kernel(q_ref, k_ref, v_ref, o_ref, qs, ks, vs, *, nh, d, scale):
    # q_ref: (1, tq, H), k_ref/v_ref: (1, S, H), o_ref: (1, tq, H)
    for h in range(nh):
        sl = slice(h * d, (h + 1) * d)
        qs[h] = q_ref[0, :, sl].astype(qs.dtype)
        ks[h] = k_ref[0, :, sl].astype(ks.dtype)
        vs[h] = v_ref[0, :, sl].astype(vs.dtype)

    s = jnp.einsum("hqd,hkd->hqk", qs[...], ks[...],
                   preferred_element_type=jnp.float32) * scale
    s = s - jnp.max(s, axis=-1, keepdims=True)
    p = jnp.exp(s)
    p = p * pl.reciprocal(jnp.sum(p, axis=-1, keepdims=True), approx=True)
    ctx = jnp.einsum("hqk,hkd->hqd", p.astype(jnp.bfloat16), vs[...],
                     preferred_element_type=jnp.float32)   # (nh, tq, d)
    for h in range(nh):
        o_ref[0, :, h * d:(h + 1) * d] = ctx[h].astype(o_ref.dtype)


def attention(qkv, B, S, H, nh):
    """qkv: (B, S, 3H) -> context (B, S, H), heads split/merged in-kernel."""
    # TODO(synk): no attention_mask / dropout (reference Stage1 forward passes
    # only hidden states to BertLayer, i.e. eval-mode, unmasked attention).
    d = H // nh
    scale = 1.0 / math.sqrt(d)
    tq = _q_tile(S)
    grid = (B, S // tq)
    return pl.pallas_call(
        functools.partial(_attention_kernel, nh=nh, d=d, scale=scale),
        out_shape=jax.ShapeDtypeStruct((B, S, H), qkv.dtype),
        grid_spec=pltpu.PrefetchScalarGridSpec(
            num_scalar_prefetch=0,
            grid=grid,
            in_specs=[
                pl.BlockSpec((1, tq, H), lambda b, qi: (b, qi, 0)),  # Q slab
                pl.BlockSpec((1, S, H), lambda b, qi: (b, 0, 1)),    # K slab
                pl.BlockSpec((1, S, H), lambda b, qi: (b, 0, 2)),    # V slab
            ],
            out_specs=pl.BlockSpec((1, tq, H), lambda b, qi: (b, qi, 0)),
            scratch_shapes=[
                pltpu.VMEM((nh, tq, d), jnp.bfloat16),
                pltpu.VMEM((nh, S, d), jnp.bfloat16),
                pltpu.VMEM((nh, S, d), jnp.bfloat16),
            ],
        ),
        compiler_params=pltpu.CompilerParams(
            dimension_semantics=("parallel", "parallel"),
            vmem_limit_bytes=_VMEM_LIMIT),
    )(qkv, qkv, qkv)


# ----------------------------------------------------------------------------
# Parameter init (matches init_bert_weights: Linear ~ N(0, 0.02), bias = 0,
# LayerNorm weight = 1, bias = 0). Weights stored bf16, QKV pre-concatenated.
# ----------------------------------------------------------------------------
def init_params(key, cfg):
    H, I, V = cfg["hidden"], cfg["intermediate"], cfg["vocab"]
    std = cfg["initializer_range"]
    keys = iter(jax.random.split(key, 8 * cfg["num_layers"] + 16))

    def w(k_in, k_out):
        return (jax.random.normal(next(keys), (k_in, k_out), jnp.float32)
                * std).astype(jnp.bfloat16)

    def b(k_out):
        return jnp.zeros((k_out,), jnp.float32)

    def ln():
        return (jnp.ones((H,), jnp.float32), jnp.zeros((H,), jnp.float32))

    layers = []
    for _ in range(cfg["num_layers"]):
        layers.append({
            "qkv_w": jnp.concatenate([w(H, H), w(H, H), w(H, H)], axis=1),
            "qkv_b": b(3 * H),
            "attn_out_w": w(H, H), "attn_out_b": b(H), "ln1": ln(),
            "inter_w": w(H, I), "inter_b": b(I),
            "out_w": w(I, H), "out_b": b(H), "ln2": ln(),
        })
    return {
        "layers": layers,
        "pool_w": w(H, H), "pool_b": b(H),
        "tr_w": w(H, H), "tr_b": b(H), "tr_ln": ln(),
        "dec_w": w(H, V), "dec_b": b(V),
        "sr_w": w(H, 2), "sr_b": b(2),
    }


# ----------------------------------------------------------------------------
# Stage1 forward: 12 x BertLayer -> BertPooler -> BertPreTrainingHeads
# ----------------------------------------------------------------------------
def stage1_forward(params, x, cfg):
    B, S, H = x.shape
    nh = cfg["num_heads"]
    M = B * S

    h = x.reshape(M, H).astype(jnp.bfloat16)      # bf16 activation stream
    for lp in params["layers"]:
        # fused QKV projection (one matmul, N = 3H)
        qkv = fused_linear(h, lp["qkv_w"], lp["qkv_b"])          # (M, 3H)
        # attention with in-kernel head split/merge; lane-dense (B,S,H) output
        ctx = attention(qkv.reshape(B, S, 3 * H), B, S, H, nh).reshape(M, H)
        # attention-output projection + residual + LayerNorm, fused
        h = fused_linear(ctx, lp["attn_out_w"], lp["attn_out_b"],
                         residual=h, ln=lp["ln1"])
        # feed-forward: intermediate (gelu) then output + residual + LN
        inter = fused_linear(h, lp["inter_w"], lp["inter_b"], activation="gelu")
        h = fused_linear(inter, lp["out_w"], lp["out_b"],
                         residual=h, ln=lp["ln2"])

    out = h.reshape(B, S, H)

    # BertPooler: first token -> dense -> tanh
    pooled = fused_linear(out[:, 0, :], params["pool_w"], params["pool_b"],
                          activation="tanh")

    # BertPreTrainingHeads: transform (dense + gelu + LayerNorm, fused) -> decoder
    t = fused_linear(h, params["tr_w"], params["tr_b"], activation="gelu",
                     ln=params["tr_ln"])
    prediction_scores = fused_linear(
        t, params["dec_w"], params["dec_b"],
        out_dtype=jnp.float32).reshape(B, S, -1)
    seq_relationship_score = fused_linear(
        pooled, params["sr_w"], params["sr_b"], out_dtype=jnp.float32)
    return prediction_scores, seq_relationship_score


# ----------------------------------------------------------------------------
if __name__ == "__main__":
    # Small BERT-like config: hidden=128, 4 heads, intermediate=512,
    # vocab=512, 12 layers, batch=2, seq=16.
    cfg = dict(hidden=128, num_heads=4, intermediate=512, vocab=512,
               num_layers=12, initializer_range=0.02)

    key = jax.random.PRNGKey(0)
    pkey, xkey = jax.random.split(key)
    params = init_params(pkey, cfg)

    B, S = 2, 16
    x = jax.random.normal(xkey, (B, S, cfg["hidden"]), jnp.float32)

    run = jax.jit(functools.partial(stage1_forward, cfg=cfg))
    prediction_scores, seq_relationship_score = run(params, x)
    jax.block_until_ready((prediction_scores, seq_relationship_score))

    assert prediction_scores.shape == (B, S, cfg["vocab"])
    assert seq_relationship_score.shape == (B, 2)
    assert bool(jnp.all(jnp.isfinite(prediction_scores)))
    assert bool(jnp.all(jnp.isfinite(seq_relationship_score)))
    print("KERNEL_OK")
</pallas_src>

<mosaic_0001>
module attributes {stable_mosaic.version = 11 : i64} {
  func.func @_attention_kernel(%arg0: i32, %arg1: i32, %arg2: memref<1x16x128xbf16, #tpu.memory_space<vmem>>, %arg3: memref<1x16x128xbf16, #tpu.memory_space<vmem>>, %arg4: memref<1x16x128xbf16, #tpu.memory_space<vmem>>, %arg5: memref<1x16x128xbf16, #tpu.memory_space<vmem>>, %arg6: memref<4x16x32xbf16, #tpu.memory_space<vmem>>, %arg7: memref<4x16x32xbf16, #tpu.memory_space<vmem>>, %arg8: memref<4x16x32xbf16, #tpu.memory_space<vmem>>) attributes {dimension_semantics = [#tpu.dimension_semantics<parallel>, #tpu.dimension_semantics<parallel>], iteration_bounds = array<i64: 2, 1>, scalar_prefetch = 0 : i64, scratch_operands = 3 : i64, tpu.core_type = #tpu.core_type<tc>, window_params = [{transform_indices = @transform_0, window_bounds = array<i64: 1, 16, 128>}, {transform_indices = @transform_1, window_bounds = array<i64: 1, 16, 128>}, {transform_indices = @transform_2, window_bounds = array<i64: 1, 16, 128>}, {transform_indices = @transform_3, window_bounds = array<i64: 1, 16, 128>}]} {
    %c0 = arith.constant 0 : index
    %c0_0 = arith.constant 0 : index
    %c0_1 = arith.constant 0 : index
    %0 = vector.load %arg2[%c0, %c0_0, %c0_1] : memref<1x16x128xbf16, #tpu.memory_space<vmem>>, vector<1x16x32xbf16>
    %1 = vector.shape_cast %0 : vector<1x16x32xbf16> to vector<16x32xbf16>
    %c0_2 = arith.constant 0 : index
    %c0_3 = arith.constant 0 : index
    %c0_4 = arith.constant 0 : index
    %2 = vector.load %arg6[%c0_2, %c0_3, %c0_4] : memref<4x16x32xbf16, #tpu.memory_space<vmem>>, vector<1x16x32xbf16>
    %3 = vector.shape_cast %2 : vector<1x16x32xbf16> to vector<16x32xbf16>
    %4 = vector.shape_cast %1 : vector<16x32xbf16> to vector<1x16x32xbf16>
    tpu.vector_store %arg6[%c0_2, %c0_3, %c0_4], %4 {strides = array<i32>} : memref<4x16x32xbf16, #tpu.memory_space<vmem>>, vector<1x16x32xbf16>,
    %c0_5 = arith.constant 0 : index
    %c0_6 = arith.constant 0 : index
    %c0_7 = arith.constant 0 : index
    %5 = vector.load %arg3[%c0_5, %c0_6, %c0_7] : memref<1x16x128xbf16, #tpu.memory_space<vmem>>, vector<1x16x32xbf16>
    %6 = vector.shape_cast %5 : vector<1x16x32xbf16> to vector<16x32xbf16>
    %c0_8 = arith.constant 0 : index
    %c0_9 = arith.constant 0 : index
    %c0_10 = arith.constant 0 : index
    %7 = vector.load %arg7[%c0_8, %c0_9, %c0_10] : memref<4x16x32xbf16, #tpu.memory_space<vmem>>, vector<1x16x32xbf16>
    %8 = vector.shape_cast %7 : vector<1x16x32xbf16> to vector<16x32xbf16>
    %9 = vector.shape_cast %6 : vector<16x32xbf16> to vector<1x16x32xbf16>
    tpu.vector_store %arg7[%c0_8, %c0_9, %c0_10], %9 {strides = array<i32>} : memref<4x16x32xbf16, #tpu.memory_space<vmem>>, vector<1x16x32xbf16>,
    %c0_11 = arith.constant 0 : index
    %c0_12 = arith.constant 0 : index
    %c0_13 = arith.constant 0 : index
    %10 = vector.load %arg4[%c0_11, %c0_12, %c0_13] : memref<1x16x128xbf16, #tpu.memory_space<vmem>>, vector<1x16x32xbf16>
    %11 = vector.shape_cast %10 : vector<1x16x32xbf16> to vector<16x32xbf16>
    %c0_14 = arith.constant 0 : index
    %c0_15 = arith.constant 0 : index
    %c0_16 = arith.constant 0 : index
    %12 = vector.load %arg8[%c0_14, %c0_15, %c0_16] : memref<4x16x32xbf16, #tpu.memory_space<vmem>>, vector<1x16x32xbf16>
    %13 = vector.shape_cast %12 : vector<1x16x32xbf16> to vector<16x32xbf16>
    %14 = vector.shape_cast %11 : vector<16x32xbf16> to vector<1x16x32xbf16>
    tpu.vector_store %arg8[%c0_14, %c0_15, %c0_16], %14 {strides = array<i32>} : memref<4x16x32xbf16, #tpu.memory_space<vmem>>, vector<1x16x32xbf16>,
    %c0_17 = arith.constant 0 : index
    %c0_18 = arith.constant 0 : index
    %c32 = arith.constant 32 : index
    %15 = vector.load %arg2[%c0_17, %c0_18, %c32] : memref<1x16x128xbf16, #tpu.memory_space<vmem>>, vector<1x16x32xbf16>
    %16 = vector.shape_cast %15 : vector<1x16x32xbf16> to vector<16x32xbf16>
    %c1 = arith.constant 1 : index
    %c0_19 = arith.constant 0 : index
    %c0_20 = arith.constant 0 : index
    %17 = vector.load %arg6[%c1, %c0_19, %c0_20] : memref<4x16x32xbf16, #tpu.memory_space<vmem>>, vector<1x16x32xbf16>
    %18 = vector.shape_cast %17 : vector<1x16x32xbf16> to vector<16x32xbf16>
    %19 = vector.shape_cast %16 : vector<16x32xbf16> to vector<1x16x32xbf16>
    tpu.vector_store %arg6[%c1, %c0_19, %c0_20], %19 {strides = array<i32>} : memref<4x16x32xbf16, #tpu.memory_space<vmem>>, vector<1x16x32xbf16>,
    %c0_21 = arith.constant 0 : index
    %c0_22 = arith.constant 0 : index
    %c32_23 = arith.constant 32 : index
    %20 = vector.load %arg3[%c0_21, %c0_22, %c32_23] : memref<1x16x128xbf16, #tpu.memory_space<vmem>>, vector<1x16x32xbf16>
    %21 = vector.shape_cast %20 : vector<1x16x32xbf16> to vector<16x32xbf16>
    %c1_24 = arith.constant 1 : index
    %c0_25 = arith.constant 0 : index
    %c0_26 = arith.constant 0 : index
    %22 = vector.load %arg7[%c1_24, %c0_25, %c0_26] : memref<4x16x32xbf16, #tpu.memory_space<vmem>>, vector<1x16x32xbf16>
    %23 = vector.shape_cast %22 : vector<1x16x32xbf16> to vector<16x32xbf16>
    %24 = vector.shape_cast %21 : vector<16x32xbf16> to vector<1x16x32xbf16>
    tpu.vector_store %arg7[%c1_24, %c0_25, %c0_26], %24 {strides = array<i32>} : memref<4x16x32xbf16, #tpu.memory_space<vmem>>, vector<1x16x32xbf16>,
    %c0_27 = arith.constant 0 : index
    %c0_28 = arith.constant 0 : index
    %c32_29 = arith.constant 32 : index
    %25 = vector.load %arg4[%c0_27, %c0_28, %c32_29] : memref<1x16x128xbf16, #tpu.memory_space<vmem>>, vector<1x16x32xbf16>
    %26 = vector.shape_cast %25 : vector<1x16x32xbf16> to vector<16x32xbf16>
    %c1_30 = arith.constant 1 : index
    %c0_31 = arith.constant 0 : index
    %c0_32 = arith.constant 0 : index
    %27 = vector.load %arg8[%c1_30, %c0_31, %c0_32] : memref<4x16x32xbf16, #tpu.memory_space<vmem>>, vector<1x16x32xbf16>
    %28 = vector.shape_cast %27 : vector<1x16x32xbf16> to vector<16x32xbf16>
    %29 = vector.shape_cast %26 : vector<16x32xbf16> to vector<1x16x32xbf16>
    tpu.vector_store %arg8[%c1_30, %c0_31, %c0_32], %29 {strides = array<i32>} : memref<4x16x32xbf16, #tpu.memory_space<vmem>>, vector<1x16x32xbf16>,
    %c0_33 = arith.constant 0 : index
    %c0_34 = arith.constant 0 : index
    %c64 = arith.constant 64 : index
    %30 = vector.load %arg2[%c0_33, %c0_34, %c64] : memref<1x16x128xbf16, #tpu.memory_space<vmem>>, vector<1x16x32xbf16>
    %31 = vector.shape_cast %30 : vector<1x16x32xbf16> to vector<16x32xbf16>
    %c2 = arith.constant 2 : index
    %c0_35 = arith.constant 0 : index
    %c0_36 = arith.constant 0 : index
    %32 = vector.load %arg6[%c2, %c0_35, %c0_36] : memref<4x16x32xbf16, #tpu.memory_space<vmem>>, vector<1x16x32xbf16>
    %33 = vector.shape_cast %32 : vector<1x16x32xbf16> to vector<16x32xbf16>
    %34 = vector.shape_cast %31 : vector<16x32xbf16> to vector<1x16x32xbf16>
    tpu.vector_store %arg6[%c2, %c0_35, %c0_36], %34 {strides = array<i32>} : memref<4x16x32xbf16, #tpu.memory_space<vmem>>, vector<1x16x32xbf16>,
    %c0_37 = arith.constant 0 : index
    %c0_38 = arith.constant 0 : index
    %c64_39 = arith.constant 64 : index
    %35 = vector.load %arg3[%c0_37, %c0_38, %c64_39] : memref<1x16x128xbf16, #tpu.memory_space<vmem>>, vector<1x16x32xbf16>
    %36 = vector.shape_cast %35 : vector<1x16x32xbf16> to vector<16x32xbf16>
    %c2_40 = arith.constant 2 : index
    %c0_41 = arith.constant 0 : index
    %c0_42 = arith.constant 0 : index
    %37 = vector.load %arg7[%c2_40, %c0_41, %c0_42] : memref<4x16x32xbf16, #tpu.memory_space<vmem>>, vector<1x16x32xbf16>
    %38 = vector.shape_cast %37 : vector<1x16x32xbf16> to vector<16x32xbf16>
    %39 = vector.shape_cast %36 : vector<16x32xbf16> to vector<1x16x32xbf16>
    tpu.vector_store %arg7[%c2_40, %c0_41, %c0_42], %39 {strides = array<i32>} : memref<4x16x32xbf16, #tpu.memory_space<vmem>>, vector<1x16x32xbf16>,
    %c0_43 = arith.constant 0 : index
    %c0_44 = arith.constant 0 : index
    %c64_45 = arith.constant 64 : index
    %40 = vector.load %arg4[%c0_43, %c0_44, %c64_45] : memref<1x16x128xbf16, #tpu.memory_space<vmem>>, vector<1x16x32xbf16>
    %41 = vector.shape_cast %40 : vector<1x16x32xbf16> to vector<16x32xbf16>
    %c2_46 = arith.constant 2 : index
    %c0_47 = arith.constant 0 : index
    %c0_48 = arith.constant 0 : index
    %42 = vector.load %arg8[%c2_46, %c0_47, %c0_48] : memref<4x16x32xbf16, #tpu.memory_space<vmem>>, vector<1x16x32xbf16>
    %43 = vector.shape_cast %42 : vector<1x16x32xbf16> to vector<16x32xbf16>
    %44 = vector.shape_cast %41 : vector<16x32xbf16> to vector<1x16x32xbf16>
    tpu.vector_store %arg8[%c2_46, %c0_47, %c0_48], %44 {strides = array<i32>} : memref<4x16x32xbf16, #tpu.memory_space<vmem>>, vector<1x16x32xbf16>,
    %c0_49 = arith.constant 0 : index
    %c0_50 = arith.constant 0 : index
    %c96 = arith.constant 96 : index
    %45 = vector.load %arg2[%c0_49, %c0_50, %c96] : memref<1x16x128xbf16, #tpu.memory_space<vmem>>, vector<1x16x32xbf16>
    %46 = vector.shape_cast %45 : vector<1x16x32xbf16> to vector<16x32xbf16>
    %c3 = arith.constant 3 : index
    %c0_51 = arith.constant 0 : index
    %c0_52 = arith.constant 0 : index
    %47 = vector.load %arg6[%c3, %c0_51, %c0_52] : memref<4x16x32xbf16, #tpu.memory_space<vmem>>, vector<1x16x32xbf16>
    %48 = vector.shape_cast %47 : vector<1x16x32xbf16> to vector<16x32xbf16>
    %49 = vector.shape_cast %46 : vector<16x32xbf16> to vector<1x16x32xbf16>
    tpu.vector_store %arg6[%c3, %c0_51, %c0_52], %49 {strides = array<i32>} : memref<4x16x32xbf16, #tpu.memory_space<vmem>>, vector<1x16x32xbf16>,
    %c0_53 = arith.constant 0 : index
    %c0_54 = arith.constant 0 : index
    %c96_55 = arith.constant 96 : index
    %50 = vector.load %arg3[%c0_53, %c0_54, %c96_55] : memref<1x16x128xbf16, #tpu.memory_space<vmem>>, vector<1x16x32xbf16>
    %51 = vector.shape_cast %50 : vector<1x16x32xbf16> to vector<16x32xbf16>
    %c3_56 = arith.constant 3 : index
    %c0_57 = arith.constant 0 : index
    %c0_58 = arith.constant 0 : index
    %52 = vector.load %arg7[%c3_56, %c0_57, %c0_58] : memref<4x16x32xbf16, #tpu.memory_space<vmem>>, vector<1x16x32xbf16>
    %53 = vector.shape_cast %52 : vector<1x16x32xbf16> to vector<16x32xbf16>
    %54 = vector.shape_cast %51 : vector<16x32xbf16> to vector<1x16x32xbf16>
    tpu.vector_store %arg7[%c3_56, %c0_57, %c0_58], %54 {strides = array<i32>} : memref<4x16x32xbf16, #tpu.memory_space<vmem>>, vector<1x16x32xbf16>,
    %c0_59 = arith.constant 0 : index
    %c0_60 = arith.constant 0 : index
    %c96_61 = arith.constant 96 : index
    %55 = vector.load %arg4[%c0_59, %c0_60, %c96_61] : memref<1x16x128xbf16, #tpu.memory_space<vmem>>, vector<1x16x32xbf16>
    %56 = vector.shape_cast %55 : vector<1x16x32xbf16> to vector<16x32xbf16>
    %c3_62 = arith.constant 3 : index
    %c0_63 = arith.constant 0 : index
    %c0_64 = arith.constant 0 : index
    %57 = vector.load %arg8[%c3_62, %c0_63, %c0_64] : memref<4x16x32xbf16, #tpu.memory_space<vmem>>, vector<1x16x32xbf16>
    %58 = vector.shape_cast %57 : vector<1x16x32xbf16> to vector<16x32xbf16>
    %59 = vector.shape_cast %56 : vector<16x32xbf16> to vector<1x16x32xbf16>
    tpu.vector_store %arg8[%c3_62, %c0_63, %c0_64], %59 {strides = array<i32>} : memref<4x16x32xbf16, #tpu.memory_space<vmem>>, vector<1x16x32xbf16>,
    %c0_65 = arith.constant 0 : index
    %c0_66 = arith.constant 0 : index
    %c0_67 = arith.constant 0 : index
    %60 = vector.load %arg6[%c0_65, %c0_66, %c0_67] : memref<4x16x32xbf16, #tpu.memory_space<vmem>>, vector<4x16x32xbf16>
    %c0_68 = arith.constant 0 : index
    %c0_69 = arith.constant 0 : index
    %c0_70 = arith.constant 0 : index
    %61 = vector.load %arg7[%c0_68, %c0_69, %c0_70] : memref<4x16x32xbf16, #tpu.memory_space<vmem>>, vector<4x16x32xbf16>
    "tpu.trace_start"() <{level = 10 : i32, message = "hqd,hkd->hqk"}> : () -> ()
    %cst = arith.constant dense<0.000000e+00> : vector<4x16x16xf32>
    %62 = tpu.matmul %60, %61, %cst {dimension_numbers = #tpu.dot_dimension_numbers<[2], [2], [1], [1], [0, 0, 0, 1, 1, 1], [0], [0]>} : vector<4x16x32xbf16>, vector<4x16x32xbf16>, vector<4x16x16xf32> -> vector<4x16x16xf32>
    "tpu.trace_stop"() : () -> ()
    %cst_71 = arith.constant 0.176776692 : f32
    %63 = vector.broadcast %cst_71 : f32 to vector<4x16x16xf32>
    %64 = arith.mulf %62, %63 : vector<4x16x16xf32>
    %cst_72 = arith.constant dense<0xFF800000> : vector<4x16xf32>
    %65 = vector.multi_reduction <maximumf>, %64, %cst_72 [2] : vector<4x16x16xf32> to vector<4x16xf32>
    %66 = vector.shape_cast %65 : vector<4x16xf32> to vector<4x16x1xf32>
    %67 = vector.broadcast %66 : vector<4x16x1xf32> to vector<4x16x16xf32>
    %68 = arith.subf %64, %67 : vector<4x16x16xf32>
    %69 = math.exp %68 : vector<4x16x16xf32>
    %cst_73 = arith.constant dense<0.000000e+00> : vector<4x16xf32>
    %70 = vector.multi_reduction <add>, %69, %cst_73 [2] : vector<4x16x16xf32> to vector<4x16xf32>
    %71 = vector.shape_cast %70 : vector<4x16xf32> to vector<4x16x1xf32>
    %72 = tpu.reciprocal %71 {approx = true} : vector<4x16x1xf32> -> vector<4x16x1xf32>
    %73 = vector.broadcast %72 : vector<4x16x1xf32> to vector<4x16x16xf32>
    %74 = arith.mulf %69, %73 : vector<4x16x16xf32>
    %75 = arith.truncf %74 : vector<4x16x16xf32> to vector<4x16x16xbf16>
    %c0_74 = arith.constant 0 : index
    %c0_75 = arith.constant 0 : index
    %c0_76 = arith.constant 0 : index
    %76 = vector.load %arg8[%c0_74, %c0_75, %c0_76] : memref<4x16x32xbf16, #tpu.memory_space<vmem>>, vector<4x16x32xbf16>
    "tpu.trace_start"() <{level = 10 : i32, message = "hqk,hkd->hqd"}> : () -> ()
    %cst_77 = arith.constant dense<0.000000e+00> : vector<4x16x32xf32>
    %77 = tpu.matmul %75, %76, %cst_77 {dimension_numbers = #tpu.dot_dimension_numbers<[2], [1], [1], [2], [0, 0, 0, 1, 1, 2], [0], [0]>} : vector<4x16x16xbf16>, vector<4x16x32xbf16>, vector<4x16x32xf32> -> vector<4x16x32xf32>
    "tpu.trace_stop"() : () -> ()
    %78 = vector.extract_strided_slice %77 {offsets = [0, 0, 0], sizes = [1, 16, 32], strides = [1, 1, 1]} : vector<4x16x32xf32> to vector<1x16x32xf32>
    %79 = vector.shape_cast %78 : vector<1x16x32xf32> to vector<16x32xf32>
    %80 = arith.truncf %79 : vector<16x32xf32> to vector<16x32xbf16>
    %c0_78 = arith.constant 0 : index
    %c0_79 = arith.constant 0 : index
    %c0_80 = arith.constant 0 : index
    %81 = vector.load %arg5[%c0_78, %c0_79, %c0_80] : memref<1x16x128xbf16, #tpu.memory_space<vmem>>, vector<1x16x32xbf16>
    %82 = vector.shape_cast %81 : vector<1x16x32xbf16> to vector<16x32xbf16>
    %83 = vector.shape_cast %80 : vector<16x32xbf16> to vector<1x16x32xbf16>
    tpu.vector_store %arg5[%c0_78, %c0_79, %c0_80], %83 {strides = array<i32>} : memref<1x16x128xbf16, #tpu.memory_space<vmem>>, vector<1x16x32xbf16>,
    %84 = vector.extract_strided_slice %77 {offsets = [1, 0, 0], sizes = [1, 16, 32], strides = [1, 1, 1]} : vector<4x16x32xf32> to vector<1x16x32xf32>
    %85 = vector.shape_cast %84 : vector<1x16x32xf32> to vector<16x32xf32>
    %86 = arith.truncf %85 : vector<16x32xf32> to vector<16x32xbf16>
    %c0_81 = arith.constant 0 : index
    %c0_82 = arith.constant 0 : index
    %c32_83 = arith.constant 32 : index
    %87 = vector.load %arg5[%c0_81, %c0_82, %c32_83] : memref<1x16x128xbf16, #tpu.memory_space<vmem>>, vector<1x16x32xbf16>
    %88 = vector.shape_cast %87 : vector<1x16x32xbf16> to vector<16x32xbf16>
    %89 = vector.shape_cast %86 : vector<16x32xbf16> to vector<1x16x32xbf16>
    tpu.vector_store %arg5[%c0_81, %c0_82, %c32_83], %89 {strides = array<i32>} : memref<1x16x128xbf16, #tpu.memory_space<vmem>>, vector<1x16x32xbf16>,
    %90 = vector.extract_strided_slice %77 {offsets = [2, 0, 0], sizes = [1, 16, 32], strides = [1, 1, 1]} : vector<4x16x32xf32> to vector<1x16x32xf32>
    %91 = vector.shape_cast %90 : vector<1x16x32xf32> to vector<16x32xf32>
    %92 = arith.truncf %91 : vector<16x32xf32> to vector<16x32xbf16>
    %c0_84 = arith.constant 0 : index
    %c0_85 = arith.constant 0 : index
    %c64_86 = arith.constant 64 : index
    %93 = vector.load %arg5[%c0_84, %c0_85, %c64_86] : memref<1x16x128xbf16, #tpu.memory_space<vmem>>, vector<1x16x32xbf16>
    %94 = vector.shape_cast %93 : vector<1x16x32xbf16> to vector<16x32xbf16>
    %95 = vector.shape_cast %92 : vector<16x32xbf16> to vector<1x16x32xbf16>
    tpu.vector_store %arg5[%c0_84, %c0_85, %c64_86], %95 {strides = array<i32>} : memref<1x16x128xbf16, #tpu.memory_space<vmem>>, vector<1x16x32xbf16>,
    %96 = vector.extract_strided_slice %77 {offsets = [3, 0, 0], sizes = [1, 16, 32], strides = [1, 1, 1]} : vector<4x16x32xf32> to vector<1x16x32xf32>
    %97 = vector.shape_cast %96 : vector<1x16x32xf32> to vector<16x32xf32>
    %98 = arith.truncf %97 : vector<16x32xf32> to vector<16x32xbf16>
    %c0_87 = arith.constant 0 : index
    %c0_88 = arith.constant 0 : index
    %c96_89 = arith.constant 96 : index
    %99 = vector.load %arg5[%c0_87, %c0_88, %c96_89] : memref<1x16x128xbf16, #tpu.memory_space<vmem>>, vector<1x16x32xbf16>
    %100 = vector.shape_cast %99 : vector<1x16x32xbf16> to vector<16x32xbf16>
    %101 = vector.shape_cast %98 : vector<16x32xbf16> to vector<1x16x32xbf16>
    tpu.vector_store %arg5[%c0_87, %c0_88, %c96_89], %101 {strides = array<i32>} : memref<1x16x128xbf16, #tpu.memory_space<vmem>>, vector<1x16x32xbf16>,
    return
  }
  func.func @transform_0(%arg0: i32, %arg1: i32) -> (i32, i32, i32) {
    %c0_i32 = arith.constant 0 : i32
    %c0_i32_0 = arith.constant 0 : i32
    return %arg0, %arg1, %c0_i32 : i32, i32, i32
  }
  func.func @transform_1(%arg0: i32, %arg1: i32) -> (i32, i32, i32) {
    %c0_i32 = arith.constant 0 : i32
    %c1_i32 = arith.constant 1 : i32
    %c0_i32_0 = arith.constant 0 : i32
    return %arg0, %c0_i32, %c1_i32 : i32, i32, i32
  }
  func.func @transform_2(%arg0: i32, %arg1: i32) -> (i32, i32, i32) {
    %c0_i32 = arith.constant 0 : i32
    %c2_i32 = arith.constant 2 : i32
    %c0_i32_0 = arith.constant 0 : i32
    return %arg0, %c0_i32, %c2_i32 : i32, i32, i32
  }
  func.func @transform_3(%arg0: i32, %arg1: i32) -> (i32, i32, i32) {
    %c0_i32 = arith.constant 0 : i32
    %c0_i32_0 = arith.constant 0 : i32
    return %arg0, %arg1, %c0_i32 : i32, i32, i32
  }
}

module attributes {stable_mosaic.version = 11 : i64} {
  func.func @_fused_linear_kernel(%arg0: i32, %arg1: i32, %arg2: i32, %arg3: memref<32x128xbf16, #tpu.memory_space<vmem>>, %arg4: memref<128x384xbf16, #tpu.memory_space<vmem>>, %arg5: memref<1x384xf32, #tpu.memory_space<vmem>>, %arg6: memref<32x384xbf16, #tpu.memory_space<vmem>>, %arg7: memref<32x384xf32, #tpu.memory_space<vmem>>) attributes {dimension_semantics = [#tpu.dimension_semantics<parallel>, #tpu.dimension_semantics<parallel>, #tpu.dimension_semantics<arbitrary>], iteration_bounds = array<i64: 1, 1, 1>, scalar_prefetch = 0 : i64, scratch_operands = 1 : i64, tpu.core_type = #tpu.core_type<tc>, window_params = [{transform_indices = @transform_0, window_bounds = array<i64: 32, 128>}, {transform_indices = @transform_1, window_bounds = array<i64: 128, 384>}, {transform_indices = @transform_2, window_bounds = array<i64: 1, 384>}, {transform_indices = @transform_3, window_bounds = array<i64: 32, 384>}]} {
    %c0_i32 = arith.constant 0 : i32
    %0 = arith.cmpi eq, %arg2, %c0_i32 : i32
    %1 = arith.extui %0 : i1 to i32
    %c0_i32_0 = arith.constant 0 : i32
    %2 = arith.cmpi ne, %1, %c0_i32_0 : i32
    scf.if %2 {
      %cst_10 = arith.constant 0.000000e+00 : f32
      %12 = vector.broadcast %cst_10 : f32 to vector<32x384xf32>
      %c0_11 = arith.constant 0 : index
      %c0_12 = arith.constant 0 : index
      %13 = vector.load %arg7[%c0_11, %c0_12] : memref<32x384xf32, #tpu.memory_space<vmem>>, vector<32x384xf32>
      tpu.vector_store %arg7[%c0_11, %c0_12], %12 {strides = array<i32>} : memref<32x384xf32, #tpu.memory_space<vmem>>, vector<32x384xf32>,
    } else {
    }
    %c0 = arith.constant 0 : index
    %c0_1 = arith.constant 0 : index
    %3 = vector.load %arg7[%c0, %c0_1] : memref<32x384xf32, #tpu.memory_space<vmem>>, vector<32x384xf32>
    %c0_2 = arith.constant 0 : index
    %c0_3 = arith.constant 0 : index
    %4 = vector.load %arg3[%c0_2, %c0_3] : memref<32x128xbf16, #tpu.memory_space<vmem>>, vector<32x128xbf16>
    %c0_4 = arith.constant 0 : index
    %c0_5 = arith.constant 0 : index
    %5 = vector.load %arg4[%c0_4, %c0_5] : memref<128x384xbf16, #tpu.memory_space<vmem>>, vector<128x384xbf16>
    %cst = arith.constant dense<0.000000e+00> : vector<32x384xf32>
    %6 = tpu.matmul %4, %5, %cst {dimension_numbers = #tpu.dot_dimension_numbers<[1], [0], [0], [1], [0, 0, 1, 1], [], []>} : vector<32x128xbf16>, vector<128x384xbf16>, vector<32x384xf32> -> vector<32x384xf32>
    %7 = arith.addf %3, %6 : vector<32x384xf32>
    %c0_6 = arith.constant 0 : index
    %c0_7 = arith.constant 0 : index
    %8 = vector.load %arg7[%c0_6, %c0_7] : memref<32x384xf32, #tpu.memory_space<vmem>>, vector<32x384xf32>
    tpu.vector_store %arg7[%c0_6, %c0_7], %7 {strides = array<i32>} : memref<32x384xf32, #tpu.memory_space<vmem>>, vector<32x384xf32>,
    %c0_i32_8 = arith.constant 0 : i32
    %9 = arith.cmpi eq, %arg2, %c0_i32_8 : i32
    %10 = arith.extui %9 : i1 to i32
    %c0_i32_9 = arith.constant 0 : i32
    %11 = arith.cmpi ne, %10, %c0_i32_9 : i32
    scf.if %11 {
      %c0_10 = arith.constant 0 : index
      %c0_11 = arith.constant 0 : index
      %12 = vector.load %arg7[%c0_10, %c0_11] : memref<32x384xf32, #tpu.memory_space<vmem>>, vector<32x384xf32>
      %c0_12 = arith.constant 0 : index
      %c0_13 = arith.constant 0 : index
      %13 = vector.load %arg5[%c0_12, %c0_13] : memref<1x384xf32, #tpu.memory_space<vmem>>, vector<1x384xf32>
      %14 = vector.broadcast %13 : vector<1x384xf32> to vector<32x384xf32>
      %15 = arith.addf %12, %14 : vector<32x384xf32>
      %16 = arith.truncf %15 : vector<32x384xf32> to vector<32x384xbf16>
      %c0_14 = arith.constant 0 : index
      %c0_15 = arith.constant 0 : index
      %17 = vector.load %arg6[%c0_14, %c0_15] : memref<32x384xbf16, #tpu.memory_space<vmem>>, vector<32x384xbf16>
      tpu.vector_store %arg6[%c0_14, %c0_15], %16 {strides = array<i32>} : memref<32x384xbf16, #tpu.memory_space<vmem>>, vector<32x384xbf16>,
    } else {
    }
    return
  }
  func.func @transform_0(%arg0: i32, %arg1: i32, %arg2: i32) -> (i32, i32) {
    %c0_i32 = arith.constant 0 : i32
    return %arg0, %arg2 : i32, i32
  }
  func.func @transform_1(%arg0: i32, %arg1: i32, %arg2: i32) -> (i32, i32) {
    %c0_i32 = arith.constant 0 : i32
    return %arg2, %arg1 : i32, i32
  }
  func.func @transform_2(%arg0: i32, %arg1: i32, %arg2: i32) -> (i32, i32) {
    %c0_i32 = arith.constant 0 : i32
    %c0_i32_0 = arith.constant 0 : i32
    return %c0_i32, %arg1 : i32, i32
  }
  func.func @transform_3(%arg0: i32, %arg1: i32, %arg2: i32) -> (i32, i32) {
    %c0_i32 = arith.constant 0 : i32
    return %arg0, %arg1 : i32, i32
  }
}

module attributes {stable_mosaic.version = 11 : i64} {
  func.func @_fused_linear_kernel(%arg0: i32, %arg1: i32, %arg2: i32, %arg3: memref<32x128xbf16, #tpu.memory_space<vmem>>, %arg4: memref<128x128xbf16, #tpu.memory_space<vmem>>, %arg5: memref<1x128xf32, #tpu.memory_space<vmem>>, %arg6: memref<32x128xbf16, #tpu.memory_space<vmem>>, %arg7: memref<1x128xf32, #tpu.memory_space<vmem>>, %arg8: memref<1x128xf32, #tpu.memory_space<vmem>>, %arg9: memref<32x128xbf16, #tpu.memory_space<vmem>>, %arg10: memref<32x128xf32, #tpu.memory_space<vmem>>) attributes {dimension_semantics = [#tpu.dimension_semantics<parallel>, #tpu.dimension_semantics<parallel>, #tpu.dimension_semantics<arbitrary>], iteration_bounds = array<i64: 1, 1, 1>, scalar_prefetch = 0 : i64, scratch_operands = 1 : i64, tpu.core_type = #tpu.core_type<tc>, window_params = [{transform_indices = @transform_0, window_bounds = array<i64: 32, 128>}, {transform_indices = @transform_1, window_bounds = array<i64: 128, 128>}, {transform_indices = @transform_2, window_bounds = array<i64: 1, 128>}, {transform_indices = @transform_3, window_bounds = array<i64: 32, 128>}, {transform_indices = @transform_4, window_bounds = array<i64: 1, 128>}, {transform_indices = @transform_5, window_bounds = array<i64: 1, 128>}, {transform_indices = @transform_6, window_bounds = array<i64: 32, 128>}]} {
    %c0_i32 = arith.constant 0 : i32
    %0 = arith.cmpi eq, %arg2, %c0_i32 : i32
    %1 = arith.extui %0 : i1 to i32
    %c0_i32_0 = arith.constant 0 : i32
    %2 = arith.cmpi ne, %1, %c0_i32_0 : i32
    scf.if %2 {
      %cst_10 = arith.constant 0.000000e+00 : f32
      %12 = vector.broadcast %cst_10 : f32 to vector<32x128xf32>
      %c0_11 = arith.constant 0 : index
      %c0_12 = arith.constant 0 : index
      %13 = vector.load %arg10[%c0_11, %c0_12] : memref<32x128xf32, #tpu.memory_space<vmem>>, vector<32x128xf32>
      tpu.vector_store %arg10[%c0_11, %c0_12], %12 {strides = array<i32>} : memref<32x128xf32, #tpu.memory_space<vmem>>, vector<32x128xf32>,
    } else {
    }
    %c0 = arith.constant 0 : index
    %c0_1 = arith.constant 0 : index
    %3 = vector.load %arg10[%c0, %c0_1] : memref<32x128xf32, #tpu.memory_space<vmem>>, vector<32x128xf32>
    %c0_2 = arith.constant 0 : index
    %c0_3 = arith.constant 0 : index
    %4 = vector.load %arg3[%c0_2, %c0_3] : memref<32x128xbf16, #tpu.memory_space<vmem>>, vector<32x128xbf16>
    %c0_4 = arith.constant 0 : index
    %c0_5 = arith.constant 0 : index
    %5 = vector.load %arg4[%c0_4, %c0_5] : memref<128x128xbf16, #tpu.memory_space<vmem>>, vector<128x128xbf16>
    %cst = arith.constant dense<0.000000e+00> : vector<32x128xf32>
    %6 = tpu.matmul %4, %5, %cst {dimension_numbers = #tpu.dot_dimension_numbers<[1], [0], [0], [1], [0, 0, 1, 1], [], []>} : vector<32x128xbf16>, vector<128x128xbf16>, vector<32x128xf32> -> vector<32x128xf32>
    %7 = arith.addf %3, %6 : vector<32x128xf32>
    %c0_6 = arith.constant 0 : index
    %c0_7 = arith.constant 0 : index
    %8 = vector.load %arg10[%c0_6, %c0_7] : memref<32x128xf32, #tpu.memory_space<vmem>>, vector<32x128xf32>
    tpu.vector_store %arg10[%c0_6, %c0_7], %7 {strides = array<i32>} : memref<32x128xf32, #tpu.memory_space<vmem>>, vector<32x128xf32>,
    %c0_i32_8 = arith.constant 0 : i32
    %9 = arith.cmpi eq, %arg2, %c0_i32_8 : i32
    %10 = arith.extui %9 : i1 to i32
    %c0_i32_9 = arith.constant 0 : i32
    %11 = arith.cmpi ne, %10, %c0_i32_9 : i32
    scf.if %11 {
      %c0_10 = arith.constant 0 : index
      %c0_11 = arith.constant 0 : index
      %12 = vector.load %arg10[%c0_10, %c0_11] : memref<32x128xf32, #tpu.memory_space<vmem>>, vector<32x128xf32>
      %c0_12 = arith.constant 0 : index
      %c0_13 = arith.constant 0 : index
      %13 = vector.load %arg5[%c0_12, %c0_13] : memref<1x128xf32, #tpu.memory_space<vmem>>, vector<1x128xf32>
      %14 = vector.broadcast %13 : vector<1x128xf32> to vector<32x128xf32>
      %15 = arith.addf %12, %14 : vector<32x128xf32>
      %c0_14 = arith.constant 0 : index
      %c0_15 = arith.constant 0 : index
      %16 = vector.load %arg6[%c0_14, %c0_15] : memref<32x128xbf16, #tpu.memory_space<vmem>>, vector<32x128xbf16>
      %17 = arith.extf %16 : vector<32x128xbf16> to vector<32x128xf32>
      %18 = arith.addf %15, %17 : vector<32x128xf32>
      %cst_16 = arith.constant dense<0.000000e+00> : vector<32xf32>
      %19 = vector.multi_reduction <add>, %18, %cst_16 [1] : vector<32x128xf32> to vector<32xf32>
      %20 = vector.shape_cast %19 : vector<32xf32> to vector<32x1xf32>
      %cst_17 = arith.constant 1.280000e+02 : f32
      %21 = vector.broadcast %cst_17 : f32 to vector<32x1xf32>
      %22 = arith.divf %20, %21 : vector<32x1xf32>
      %23 = vector.broadcast %22 : vector<32x1xf32> to vector<32x128xf32>
      %24 = arith.subf %18, %23 : vector<32x128xf32>
      %25 = arith.mulf %24, %24 : vector<32x128xf32>
      %cst_18 = arith.constant dense<0.000000e+00> : vector<32xf32>
      %26 = vector.multi_reduction <add>, %25, %cst_18 [1] : vector<32x128xf32> to vector<32xf32>
      %27 = vector.shape_cast %26 : vector<32xf32> to vector<32x1xf32>
      %cst_19 = arith.constant 1.280000e+02 : f32
      %28 = vector.broadcast %cst_19 : f32 to vector<32x1xf32>
      %29 = arith.divf %27, %28 : vector<32x1xf32>
      %30 = vector.broadcast %22 : vector<32x1xf32> to vector<32x128xf32>
      %31 = arith.subf %18, %30 : vector<32x128xf32>
      %cst_20 = arith.constant 9.99999996E-13 : f32
      %32 = vector.broadcast %cst_20 : f32 to vector<32x1xf32>
      %33 = arith.addf %29, %32 : vector<32x1xf32>
      %34 = math.rsqrt %33 : vector<32x1xf32>
      %35 = vector.broadcast %34 : vector<32x1xf32> to vector<32x128xf32>
      %36 = arith.mulf %31, %35 : vector<32x128xf32>
      %c0_21 = arith.constant 0 : index
      %c0_22 = arith.constant 0 : index
      %37 = vector.load %arg7[%c0_21, %c0_22] : memref<1x128xf32, #tpu.memory_space<vmem>>, vector<1x128xf32>
      %38 = vector.broadcast %37 : vector<1x128xf32> to vector<32x128xf32>
      %39 = arith.mulf %36, %38 : vector<32x128xf32>
      %c0_23 = arith.constant 0 : index
      %c0_24 = arith.constant 0 : index
      %40 = vector.load %arg8[%c0_23, %c0_24] : memref<1x128xf32, #tpu.memory_space<vmem>>, vector<1x128xf32>
      %41 = vector.broadcast %40 : vector<1x128xf32> to vector<32x128xf32>
      %42 = arith.addf %39, %41 : vector<32x128xf32>
      %43 = arith.truncf %42 : vector<32x128xf32> to vector<32x128xbf16>
      %c0_25 = arith.constant 0 : index
      %c0_26 = arith.constant 0 : index
      %44 = vector.load %arg9[%c0_25, %c0_26] : memref<32x128xbf16, #tpu.memory_space<vmem>>, vector<32x128xbf16>
      tpu.vector_store %arg9[%c0_25, %c0_26], %43 {strides = array<i32>} : memref<32x128xbf16, #tpu.memory_space<vmem>>, vector<32x128xbf16>,
    } else {
    }
    return
  }
  func.func @transform_0(%arg0: i32, %arg1: i32, %arg2: i32) -> (i32, i32) {
    %c0_i32 = arith.constant 0 : i32
    return %arg0, %arg2 : i32, i32
  }
  func.func @transform_1(%arg0: i32, %arg1: i32, %arg2: i32) -> (i32, i32) {
    %c0_i32 = arith.constant 0 : i32
    return %arg2, %arg1 : i32, i32
  }
  func.func @transform_2(%arg0: i32, %arg1: i32, %arg2: i32) -> (i32, i32) {
    %c0_i32 = arith.constant 0 : i32
    %c0_i32_0 = arith.constant 0 : i32
    return %c0_i32, %arg1 : i32, i32
  }
  func.func @transform_3(%arg0: i32, %arg1: i32, %arg2: i32) -> (i32, i32) {
    %c0_i32 = arith.constant 0 : i32
    return %arg0, %arg1 : i32, i32
  }
  func.func @transform_4(%arg0: i32, %arg1: i32, %arg2: i32) -> (i32, i32) {
    %c0_i32 = arith.constant 0 : i32
    %c0_i32_0 = arith.constant 0 : i32
    return %c0_i32, %arg1 : i32, i32
  }
  func.func @transform_5(%arg0: i32, %arg1: i32, %arg2: i32) -> (i32, i32) {
    %c0_i32 = arith.constant 0 : i32
    %c0_i32_0 = arith.constant 0 : i32
    return %c0_i32, %arg1 : i32, i32
  }
  func.func @transform_6(%arg0: i32, %arg1: i32, %arg2: i32) -> (i32, i32) {
    %c0_i32 = arith.constant 0 : i32
    return %arg0, %arg1 : i32, i32
  }
}

module attributes {stable_mosaic.version = 11 : i64} {
  func.func @_fused_linear_kernel(%arg0: i32, %arg1: i32, %arg2: i32, %arg3: memref<32x128xbf16, #tpu.memory_space<vmem>>, %arg4: memref<128x512xbf16, #tpu.memory_space<vmem>>, %arg5: memref<1x512xf32, #tpu.memory_space<vmem>>, %arg6: memref<32x512xbf16, #tpu.memory_space<vmem>>, %arg7: memref<32x512xf32, #tpu.memory_space<vmem>>) attributes {dimension_semantics = [#tpu.dimension_semantics<parallel>, #tpu.dimension_semantics<parallel>, #tpu.dimension_semantics<arbitrary>], iteration_bounds = array<i64: 1, 1, 1>, scalar_prefetch = 0 : i64, scratch_operands = 1 : i64, tpu.core_type = #tpu.core_type<tc>, window_params = [{transform_indices = @transform_0, window_bounds = array<i64: 32, 128>}, {transform_indices = @transform_1, window_bounds = array<i64: 128, 512>}, {transform_indices = @transform_2, window_bounds = array<i64: 1, 512>}, {transform_indices = @transform_3, window_bounds = array<i64: 32, 512>}]} {
    %c0_i32 = arith.constant 0 : i32
    %0 = arith.cmpi eq, %arg2, %c0_i32 : i32
    %1 = arith.extui %0 : i1 to i32
    %c0_i32_0 = arith.constant 0 : i32
    %2 = arith.cmpi ne, %1, %c0_i32_0 : i32
    scf.if %2 {
      %cst_10 = arith.constant 0.000000e+00 : f32
      %12 = vector.broadcast %cst_10 : f32 to vector<32x512xf32>
      %c0_11 = arith.constant 0 : index
      %c0_12 = arith.constant 0 : index
      %13 = vector.load %arg7[%c0_11, %c0_12] : memref<32x512xf32, #tpu.memory_space<vmem>>, vector<32x512xf32>
      tpu.vector_store %arg7[%c0_11, %c0_12], %12 {strides = array<i32>} : memref<32x512xf32, #tpu.memory_space<vmem>>, vector<32x512xf32>,
    } else {
    }
    %c0 = arith.constant 0 : index
    %c0_1 = arith.constant 0 : index
    %3 = vector.load %arg7[%c0, %c0_1] : memref<32x512xf32, #tpu.memory_space<vmem>>, vector<32x512xf32>
    %c0_2 = arith.constant 0 : index
    %c0_3 = arith.constant 0 : index
    %4 = vector.load %arg3[%c0_2, %c0_3] : memref<32x128xbf16, #tpu.memory_space<vmem>>, vector<32x128xbf16>
    %c0_4 = arith.constant 0 : index
    %c0_5 = arith.constant 0 : index
    %5 = vector.load %arg4[%c0_4, %c0_5] : memref<128x512xbf16, #tpu.memory_space<vmem>>, vector<128x512xbf16>
    %cst = arith.constant dense<0.000000e+00> : vector<32x512xf32>
    %6 = tpu.matmul %4, %5, %cst {dimension_numbers = #tpu.dot_dimension_numbers<[1], [0], [0], [1], [0, 0, 1, 1], [], []>} : vector<32x128xbf16>, vector<128x512xbf16>, vector<32x512xf32> -> vector<32x512xf32>
    %7 = arith.addf %3, %6 : vector<32x512xf32>
    %c0_6 = arith.constant 0 : index
    %c0_7 = arith.constant 0 : index
    %8 = vector.load %arg7[%c0_6, %c0_7] : memref<32x512xf32, #tpu.memory_space<vmem>>, vector<32x512xf32>
    tpu.vector_store %arg7[%c0_6, %c0_7], %7 {strides = array<i32>} : memref<32x512xf32, #tpu.memory_space<vmem>>, vector<32x512xf32>,
    %c0_i32_8 = arith.constant 0 : i32
    %9 = arith.cmpi eq, %arg2, %c0_i32_8 : i32
    %10 = arith.extui %9 : i1 to i32
    %c0_i32_9 = arith.constant 0 : i32
    %11 = arith.cmpi ne, %10, %c0_i32_9 : i32
    scf.if %11 {
      %c0_10 = arith.constant 0 : index
      %c0_11 = arith.constant 0 : index
      %12 = vector.load %arg7[%c0_10, %c0_11] : memref<32x512xf32, #tpu.memory_space<vmem>>, vector<32x512xf32>
      %c0_12 = arith.constant 0 : index
      %c0_13 = arith.constant 0 : index
      %13 = vector.load %arg5[%c0_12, %c0_13] : memref<1x512xf32, #tpu.memory_space<vmem>>, vector<1x512xf32>
      %14 = vector.broadcast %13 : vector<1x512xf32> to vector<32x512xf32>
      %15 = arith.addf %12, %14 : vector<32x512xf32>
      %cst_14 = arith.constant 5.000000e-01 : f32
      %16 = vector.broadcast %cst_14 : f32 to vector<32x512xf32>
      %17 = arith.mulf %16, %15 : vector<32x512xf32>
      %cst_15 = arith.constant 4.471500e-02 : f32
      %18 = vector.broadcast %cst_15 : f32 to vector<32x512xf32>
      %19 = arith.mulf %18, %15 : vector<32x512xf32>
      %20 = arith.mulf %19, %15 : vector<32x512xf32>
      %21 = arith.mulf %20, %15 : vector<32x512xf32>
      %22 = arith.addf %15, %21 : vector<32x512xf32>
      %cst_16 = arith.constant 0.797884583 : f32
      %23 = vector.broadcast %cst_16 : f32 to vector<32x512xf32>
      %24 = arith.mulf %23, %22 : vector<32x512xf32>
      %25 = math.tanh %24 : vector<32x512xf32>
      %cst_17 = arith.constant 1.000000e+00 : f32
      %26 = vector.broadcast %cst_17 : f32 to vector<32x512xf32>
      %27 = arith.addf %26, %25 : vector<32x512xf32>
      %28 = arith.mulf %17, %27 : vector<32x512xf32>
      %29 = arith.truncf %28 : vector<32x512xf32> to vector<32x512xbf16>
      %c0_18 = arith.constant 0 : index
      %c0_19 = arith.constant 0 : index
      %30 = vector.load %arg6[%c0_18, %c0_19] : memref<32x512xbf16, #tpu.memory_space<vmem>>, vector<32x512xbf16>
      tpu.vector_store %arg6[%c0_18, %c0_19], %29 {strides = array<i32>} : memref<32x512xbf16, #tpu.memory_space<vmem>>, vector<32x512xbf16>,
    } else {
    }
    return
  }
  func.func @transform_0(%arg0: i32, %arg1: i32, %arg2: i32) -> (i32, i32) {
    %c0_i32 = arith.constant 0 : i32
    return %arg0, %arg2 : i32, i32
  }
  func.func @transform_1(%arg0: i32, %arg1: i32, %arg2: i32) -> (i32, i32) {
    %c0_i32 = arith.constant 0 : i32
    return %arg2, %arg1 : i32, i32
  }
  func.func @transform_2(%arg0: i32, %arg1: i32, %arg2: i32) -> (i32, i32) {
    %c0_i32 = arith.constant 0 : i32
    %c0_i32_0 = arith.constant 0 : i32
    return %c0_i32, %arg1 : i32, i32
  }
  func.func @transform_3(%arg0: i32, %arg1: i32, %arg2: i32) -> (i32, i32) {
    %c0_i32 = arith.constant 0 : i32
    return %arg0, %arg1 : i32, i32
  }
}

module attributes {stable_mosaic.version = 11 : i64} {
  func.func @_fused_linear_kernel(%arg0: i32, %arg1: i32, %arg2: i32, %arg3: memref<32x512xbf16, #tpu.memory_space<vmem>>, %arg4: memref<512x128xbf16, #tpu.memory_space<vmem>>, %arg5: memref<1x128xf32, #tpu.memory_space<vmem>>, %arg6: memref<32x128xbf16, #tpu.memory_space<vmem>>, %arg7: memref<1x128xf32, #tpu.memory_space<vmem>>, %arg8: memref<1x128xf32, #tpu.memory_space<vmem>>, %arg9: memref<32x128xbf16, #tpu.memory_space<vmem>>, %arg10: memref<32x128xf32, #tpu.memory_space<vmem>>) attributes {dimension_semantics = [#tpu.dimension_semantics<parallel>, #tpu.dimension_semantics<parallel>, #tpu.dimension_semantics<arbitrary>], iteration_bounds = array<i64: 1, 1, 1>, scalar_prefetch = 0 : i64, scratch_operands = 1 : i64, tpu.core_type = #tpu.core_type<tc>, window_params = [{transform_indices = @transform_0, window_bounds = array<i64: 32, 512>}, {transform_indices = @transform_1, window_bounds = array<i64: 512, 128>}, {transform_indices = @transform_2, window_bounds = array<i64: 1, 128>}, {transform_indices = @transform_3, window_bounds = array<i64: 32, 128>}, {transform_indices = @transform_4, window_bounds = array<i64: 1, 128>}, {transform_indices = @transform_5, window_bounds = array<i64: 1, 128>}, {transform_indices = @transform_6, window_bounds = array<i64: 32, 128>}]} {
    %c0_i32 = arith.constant 0 : i32
    %0 = arith.cmpi eq, %arg2, %c0_i32 : i32
    %1 = arith.extui %0 : i1 to i32
    %c0_i32_0 = arith.constant 0 : i32
    %2 = arith.cmpi ne, %1, %c0_i32_0 : i32
    scf.if %2 {
      %cst_10 = arith.constant 0.000000e+00 : f32
      %12 = vector.broadcast %cst_10 : f32 to vector<32x128xf32>
      %c0_11 = arith.constant 0 : index
      %c0_12 = arith.constant 0 : index
      %13 = vector.load %arg10[%c0_11, %c0_12] : memref<32x128xf32, #tpu.memory_space<vmem>>, vector<32x128xf32>
      tpu.vector_store %arg10[%c0_11, %c0_12], %12 {strides = array<i32>} : memref<32x128xf32, #tpu.memory_space<vmem>>, vector<32x128xf32>,
    } else {
    }
    %c0 = arith.constant 0 : index
    %c0_1 = arith.constant 0 : index
    %3 = vector.load %arg10[%c0, %c0_1] : memref<32x128xf32, #tpu.memory_space<vmem>>, vector<32x128xf32>
    %c0_2 = arith.constant 0 : index
    %c0_3 = arith.constant 0 : index
    %4 = vector.load %arg3[%c0_2, %c0_3] : memref<32x512xbf16, #tpu.memory_space<vmem>>, vector<32x512xbf16>
    %c0_4 = arith.constant 0 : index
    %c0_5 = arith.constant 0 : index
    %5 = vector.load %arg4[%c0_4, %c0_5] : memref<512x128xbf16, #tpu.memory_space<vmem>>, vector<512x128xbf16>
    %cst = arith.constant dense<0.000000e+00> : vector<32x128xf32>
    %6 = tpu.matmul %4, %5, %cst {dimension_numbers = #tpu.dot_dimension_numbers<[1], [0], [0], [1], [0, 0, 1, 1], [], []>} : vector<32x512xbf16>, vector<512x128xbf16>, vector<32x128xf32> -> vector<32x128xf32>
    %7 = arith.addf %3, %6 : vector<32x128xf32>
    %c0_6 = arith.constant 0 : index
    %c0_7 = arith.constant 0 : index
    %8 = vector.load %arg10[%c0_6, %c0_7] : memref<32x128xf32, #tpu.memory_space<vmem>>, vector<32x128xf32>
    tpu.vector_store %arg10[%c0_6, %c0_7], %7 {strides = array<i32>} : memref<32x128xf32, #tpu.memory_space<vmem>>, vector<32x128xf32>,
    %c0_i32_8 = arith.constant 0 : i32
    %9 = arith.cmpi eq, %arg2, %c0_i32_8 : i32
    %10 = arith.extui %9 : i1 to i32
    %c0_i32_9 = arith.constant 0 : i32
    %11 = arith.cmpi ne, %10, %c0_i32_9 : i32
    scf.if %11 {
      %c0_10 = arith.constant 0 : index
      %c0_11 = arith.constant 0 : index
      %12 = vector.load %arg10[%c0_10, %c0_11] : memref<32x128xf32, #tpu.memory_space<vmem>>, vector<32x128xf32>
      %c0_12 = arith.constant 0 : index
      %c0_13 = arith.constant 0 : index
      %13 = vector.load %arg5[%c0_12, %c0_13] : memref<1x128xf32, #tpu.memory_space<vmem>>, vector<1x128xf32>
      %14 = vector.broadcast %13 : vector<1x128xf32> to vector<32x128xf32>
      %15 = arith.addf %12, %14 : vector<32x128xf32>
      %c0_14 = arith.constant 0 : index
      %c0_15 = arith.constant 0 : index
      %16 = vector.load %arg6[%c0_14, %c0_15] : memref<32x128xbf16, #tpu.memory_space<vmem>>, vector<32x128xbf16>
      %17 = arith.extf %16 : vector<32x128xbf16> to vector<32x128xf32>
      %18 = arith.addf %15, %17 : vector<32x128xf32>
      %cst_16 = arith.constant dense<0.000000e+00> : vector<32xf32>
      %19 = vector.multi_reduction <add>, %18, %cst_16 [1] : vector<32x128xf32> to vector<32xf32>
      %20 = vector.shape_cast %19 : vector<32xf32> to vector<32x1xf32>
      %cst_17 = arith.constant 1.280000e+02 : f32
      %21 = vector.broadcast %cst_17 : f32 to vector<32x1xf32>
      %22 = arith.divf %20, %21 : vector<32x1xf32>
      %23 = vector.broadcast %22 : vector<32x1xf32> to vector<32x128xf32>
      %24 = arith.subf %18, %23 : vector<32x128xf32>
      %25 = arith.mulf %24, %24 : vector<32x128xf32>
      %cst_18 = arith.constant dense<0.000000e+00> : vector<32xf32>
      %26 = vector.multi_reduction <add>, %25, %cst_18 [1] : vector<32x128xf32> to vector<32xf32>
      %27 = vector.shape_cast %26 : vector<32xf32> to vector<32x1xf32>
      %cst_19 = arith.constant 1.280000e+02 : f32
      %28 = vector.broadcast %cst_19 : f32 to vector<32x1xf32>
      %29 = arith.divf %27, %28 : vector<32x1xf32>
      %30 = vector.broadcast %22 : vector<32x1xf32> to vector<32x128xf32>
      %31 = arith.subf %18, %30 : vector<32x128xf32>
      %cst_20 = arith.constant 9.99999996E-13 : f32
      %32 = vector.broadcast %cst_20 : f32 to vector<32x1xf32>
      %33 = arith.addf %29, %32 : vector<32x1xf32>
      %34 = math.rsqrt %33 : vector<32x1xf32>
      %35 = vector.broadcast %34 : vector<32x1xf32> to vector<32x128xf32>
      %36 = arith.mulf %31, %35 : vector<32x128xf32>
      %c0_21 = arith.constant 0 : index
      %c0_22 = arith.constant 0 : index
      %37 = vector.load %arg7[%c0_21, %c0_22] : memref<1x128xf32, #tpu.memory_space<vmem>>, vector<1x128xf32>
      %38 = vector.broadcast %37 : vector<1x128xf32> to vector<32x128xf32>
      %39 = arith.mulf %36, %38 : vector<32x128xf32>
      %c0_23 = arith.constant 0 : index
      %c0_24 = arith.constant 0 : index
      %40 = vector.load %arg8[%c0_23, %c0_24] : memref<1x128xf32, #tpu.memory_space<vmem>>, vector<1x128xf32>
      %41 = vector.broadcast %40 : vector<1x128xf32> to vector<32x128xf32>
      %42 = arith.addf %39, %41 : vector<32x128xf32>
      %43 = arith.truncf %42 : vector<32x128xf32> to vector<32x128xbf16>
      %c0_25 = arith.constant 0 : index
      %c0_26 = arith.constant 0 : index
      %44 = vector.load %arg9[%c0_25, %c0_26] : memref<32x128xbf16, #tpu.memory_space<vmem>>, vector<32x128xbf16>
      tpu.vector_store %arg9[%c0_25, %c0_26], %43 {strides = array<i32>} : memref<32x128xbf16, #tpu.memory_space<vmem>>, vector<32x128xbf16>,
    } else {
    }
    return
  }
  func.func @transform_0(%arg0: i32, %arg1: i32, %arg2: i32) -> (i32, i32) {
    %c0_i32 = arith.constant 0 : i32
    return %arg0, %arg2 : i32, i32
  }
  func.func @transform_1(%arg0: i32, %arg1: i32, %arg2: i32) -> (i32, i32) {
    %c0_i32 = arith.constant 0 : i32
    return %arg2, %arg1 : i32, i32
  }
  func.func @transform_2(%arg0: i32, %arg1: i32, %arg2: i32) -> (i32, i32) {
    %c0_i32 = arith.constant 0 : i32
    %c0_i32_0 = arith.constant 0 : i32
    return %c0_i32, %arg1 : i32, i32
  }
  func.func @transform_3(%arg0: i32, %arg1: i32, %arg2: i32) -> (i32, i32) {
    %c0_i32 = arith.constant 0 : i32
    return %arg0, %arg1 : i32, i32
  }
  func.func @transform_4(%arg0: i32, %arg1: i32, %arg2: i32) -> (i32, i32) {
    %c0_i32 = arith.constant 0 : i32
    %c0_i32_0 = arith.constant 0 : i32
    return %c0_i32, %arg1 : i32, i32
  }
  func.func @transform_5(%arg0: i32, %arg1: i32, %arg2: i32) -> (i32, i32) {
    %c0_i32 = arith.constant 0 : i32
    %c0_i32_0 = arith.constant 0 : i32
    return %c0_i32, %arg1 : i32, i32
  }
  func.func @transform_6(%arg0: i32, %arg1: i32, %arg2: i32) -> (i32, i32) {
    %c0_i32 = arith.constant 0 : i32
    return %arg0, %arg1 : i32, i32
  }
}

module attributes {stable_mosaic.version = 11 : i64} {
  func.func @_fused_linear_kernel(%arg0: i32, %arg1: i32, %arg2: i32, %arg3: memref<2x128xbf16, #tpu.memory_space<vmem>>, %arg4: memref<128x128xbf16, #tpu.memory_space<vmem>>, %arg5: memref<1x128xf32, #tpu.memory_space<vmem>>, %arg6: memref<2x128xbf16, #tpu.memory_space<vmem>>, %arg7: memref<2x128xf32, #tpu.memory_space<vmem>>) attributes {dimension_semantics = [#tpu.dimension_semantics<parallel>, #tpu.dimension_semantics<parallel>, #tpu.dimension_semantics<arbitrary>], iteration_bounds = array<i64: 1, 1, 1>, scalar_prefetch = 0 : i64, scratch_operands = 1 : i64, tpu.core_type = #tpu.core_type<tc>, window_params = [{transform_indices = @transform_0, window_bounds = array<i64: 2, 128>}, {transform_indices = @transform_1, window_bounds = array<i64: 128, 128>}, {transform_indices = @transform_2, window_bounds = array<i64: 1, 128>}, {transform_indices = @transform_3, window_bounds = array<i64: 2, 128>}]} {
    %c0_i32 = arith.constant 0 : i32
    %0 = arith.cmpi eq, %arg2, %c0_i32 : i32
    %1 = arith.extui %0 : i1 to i32
    %c0_i32_0 = arith.constant 0 : i32
    %2 = arith.cmpi ne, %1, %c0_i32_0 : i32
    scf.if %2 {
      %cst_10 = arith.constant 0.000000e+00 : f32
      %12 = vector.broadcast %cst_10 : f32 to vector<2x128xf32>
      %c0_11 = arith.constant 0 : index
      %c0_12 = arith.constant 0 : index
      %13 = vector.load %arg7[%c0_11, %c0_12] : memref<2x128xf32, #tpu.memory_space<vmem>>, vector<2x128xf32>
      tpu.vector_store %arg7[%c0_11, %c0_12], %12 {strides = array<i32>} : memref<2x128xf32, #tpu.memory_space<vmem>>, vector<2x128xf32>,
    } else {
    }
    %c0 = arith.constant 0 : index
    %c0_1 = arith.constant 0 : index
    %3 = vector.load %arg7[%c0, %c0_1] : memref<2x128xf32, #tpu.memory_space<vmem>>, vector<2x128xf32>
    %c0_2 = arith.constant 0 : index
    %c0_3 = arith.constant 0 : index
    %4 = vector.load %arg3[%c0_2, %c0_3] : memref<2x128xbf16, #tpu.memory_space<vmem>>, vector<2x128xbf16>
    %c0_4 = arith.constant 0 : index
    %c0_5 = arith.constant 0 : index
    %5 = vector.load %arg4[%c0_4, %c0_5] : memref<128x128xbf16, #tpu.memory_space<vmem>>, vector<128x128xbf16>
    %cst = arith.constant dense<0.000000e+00> : vector<2x128xf32>
    %6 = tpu.matmul %4, %5, %cst {dimension_numbers = #tpu.dot_dimension_numbers<[1], [0], [0], [1], [0, 0, 1, 1], [], []>} : vector<2x128xbf16>, vector<128x128xbf16>, vector<2x128xf32> -> vector<2x128xf32>
    %7 = arith.addf %3, %6 : vector<2x128xf32>
    %c0_6 = arith.constant 0 : index
    %c0_7 = arith.constant 0 : index
    %8 = vector.load %arg7[%c0_6, %c0_7] : memref<2x128xf32, #tpu.memory_space<vmem>>, vector<2x128xf32>
    tpu.vector_store %arg7[%c0_6, %c0_7], %7 {strides = array<i32>} : memref<2x128xf32, #tpu.memory_space<vmem>>, vector<2x128xf32>,
    %c0_i32_8 = arith.constant 0 : i32
    %9 = arith.cmpi eq, %arg2, %c0_i32_8 : i32
    %10 = arith.extui %9 : i1 to i32
    %c0_i32_9 = arith.constant 0 : i32
    %11 = arith.cmpi ne, %10, %c0_i32_9 : i32
    scf.if %11 {
      %c0_10 = arith.constant 0 : index
      %c0_11 = arith.constant 0 : index
      %12 = vector.load %arg7[%c0_10, %c0_11] : memref<2x128xf32, #tpu.memory_space<vmem>>, vector<2x128xf32>
      %c0_12 = arith.constant 0 : index
      %c0_13 = arith.constant 0 : index
      %13 = vector.load %arg5[%c0_12, %c0_13] : memref<1x128xf32, #tpu.memory_space<vmem>>, vector<1x128xf32>
      %14 = vector.broadcast %13 : vector<1x128xf32> to vector<2x128xf32>
      %15 = arith.addf %12, %14 : vector<2x128xf32>
      %16 = math.tanh %15 : vector<2x128xf32>
      %17 = arith.truncf %16 : vector<2x128xf32> to vector<2x128xbf16>
      %c0_14 = arith.constant 0 : index
      %c0_15 = arith.constant 0 : index
      %18 = vector.load %arg6[%c0_14, %c0_15] : memref<2x128xbf16, #tpu.memory_space<vmem>>, vector<2x128xbf16>
      tpu.vector_store %arg6[%c0_14, %c0_15], %17 {strides = array<i32>} : memref<2x128xbf16, #tpu.memory_space<vmem>>, vector<2x128xbf16>,
    } else {
    }
    return
  }
  func.func @transform_0(%arg0: i32, %arg1: i32, %arg2: i32) -> (i32, i32) {
    %c0_i32 = arith.constant 0 : i32
    return %arg0, %arg2 : i32, i32
  }
  func.func @transform_1(%arg0: i32, %arg1: i32, %arg2: i32) -> (i32, i32) {
    %c0_i32 = arith.constant 0 : i32
    return %arg2, %arg1 : i32, i32
  }
  func.func @transform_2(%arg0: i32, %arg1: i32, %arg2: i32) -> (i32, i32) {
    %c0_i32 = arith.constant 0 : i32
    %c0_i32_0 = arith.constant 0 : i32
    return %c0_i32, %arg1 : i32, i32
  }
  func.func @transform_3(%arg0: i32, %arg1: i32, %arg2: i32) -> (i32, i32) {
    %c0_i32 = arith.constant 0 : i32
    return %arg0, %arg1 : i32, i32
  }
}

module attributes {stable_mosaic.version = 11 : i64} {
  func.func @_fused_linear_kernel(%arg0: i32, %arg1: i32, %arg2: i32, %arg3: memref<32x128xbf16, #tpu.memory_space<vmem>>, %arg4: memref<128x128xbf16, #tpu.memory_space<vmem>>, %arg5: memref<1x128xf32, #tpu.memory_space<vmem>>, %arg6: memref<1x128xf32, #tpu.memory_space<vmem>>, %arg7: memref<1x128xf32, #tpu.memory_space<vmem>>, %arg8: memref<32x128xbf16, #tpu.memory_space<vmem>>, %arg9: memref<32x128xf32, #tpu.memory_space<vmem>>) attributes {dimension_semantics = [#tpu.dimension_semantics<parallel>, #tpu.dimension_semantics<parallel>, #tpu.dimension_semantics<arbitrary>], iteration_bounds = array<i64: 1, 1, 1>, scalar_prefetch = 0 : i64, scratch_operands = 1 : i64, tpu.core_type = #tpu.core_type<tc>, window_params = [{transform_indices = @transform_0, window_bounds = array<i64: 32, 128>}, {transform_indices = @transform_1, window_bounds = array<i64: 128, 128>}, {transform_indices = @transform_2, window_bounds = array<i64: 1, 128>}, {transform_indices = @transform_3, window_bounds = array<i64: 1, 128>}, {transform_indices = @transform_4, window_bounds = array<i64: 1, 128>}, {transform_indices = @transform_5, window_bounds = array<i64: 32, 128>}]} {
    %c0_i32 = arith.constant 0 : i32
    %0 = arith.cmpi eq, %arg2, %c0_i32 : i32
    %1 = arith.extui %0 : i1 to i32
    %c0_i32_0 = arith.constant 0 : i32
    %2 = arith.cmpi ne, %1, %c0_i32_0 : i32
    scf.if %2 {
      %cst_10 = arith.constant 0.000000e+00 : f32
      %12 = vector.broadcast %cst_10 : f32 to vector<32x128xf32>
      %c0_11 = arith.constant 0 : index
      %c0_12 = arith.constant 0 : index
      %13 = vector.load %arg9[%c0_11, %c0_12] : memref<32x128xf32, #tpu.memory_space<vmem>>, vector<32x128xf32>
      tpu.vector_store %arg9[%c0_11, %c0_12], %12 {strides = array<i32>} : memref<32x128xf32, #tpu.memory_space<vmem>>, vector<32x128xf32>,
    } else {
    }
    %c0 = arith.constant 0 : index
    %c0_1 = arith.constant 0 : index
    %3 = vector.load %arg9[%c0, %c0_1] : memref<32x128xf32, #tpu.memory_space<vmem>>, vector<32x128xf32>
    %c0_2 = arith.constant 0 : index
    %c0_3 = arith.constant 0 : index
    %4 = vector.load %arg3[%c0_2, %c0_3] : memref<32x128xbf16, #tpu.memory_space<vmem>>, vector<32x128xbf16>
    %c0_4 = arith.constant 0 : index
    %c0_5 = arith.constant 0 : index
    %5 = vector.load %arg4[%c0_4, %c0_5] : memref<128x128xbf16, #tpu.memory_space<vmem>>, vector<128x128xbf16>
    %cst = arith.constant dense<0.000000e+00> : vector<32x128xf32>
    %6 = tpu.matmul %4, %5, %cst {dimension_numbers = #tpu.dot_dimension_numbers<[1], [0], [0], [1], [0, 0, 1, 1], [], []>} : vector<32x128xbf16>, vector<128x128xbf16>, vector<32x128xf32> -> vector<32x128xf32>
    %7 = arith.addf %3, %6 : vector<32x128xf32>
    %c0_6 = arith.constant 0 : index
    %c0_7 = arith.constant 0 : index
    %8 = vector.load %arg9[%c0_6, %c0_7] : memref<32x128xf32, #tpu.memory_space<vmem>>, vector<32x128xf32>
    tpu.vector_store %arg9[%c0_6, %c0_7], %7 {strides = array<i32>} : memref<32x128xf32, #tpu.memory_space<vmem>>, vector<32x128xf32>,
    %c0_i32_8 = arith.constant 0 : i32
    %9 = arith.cmpi eq, %arg2, %c0_i32_8 : i32
    %10 = arith.extui %9 : i1 to i32
    %c0_i32_9 = arith.constant 0 : i32
    %11 = arith.cmpi ne, %10, %c0_i32_9 : i32
    scf.if %11 {
      %c0_10 = arith.constant 0 : index
      %c0_11 = arith.constant 0 : index
      %12 = vector.load %arg9[%c0_10, %c0_11] : memref<32x128xf32, #tpu.memory_space<vmem>>, vector<32x128xf32>
      %c0_12 = arith.constant 0 : index
      %c0_13 = arith.constant 0 : index
      %13 = vector.load %arg5[%c0_12, %c0_13] : memref<1x128xf32, #tpu.memory_space<vmem>>, vector<1x128xf32>
      %14 = vector.broadcast %13 : vector<1x128xf32> to vector<32x128xf32>
      %15 = arith.addf %12, %14 : vector<32x128xf32>
      %cst_14 = arith.constant 5.000000e-01 : f32
      %16 = vector.broadcast %cst_14 : f32 to vector<32x128xf32>
      %17 = arith.mulf %16, %15 : vector<32x128xf32>
      %cst_15 = arith.constant 4.471500e-02 : f32
      %18 = vector.broadcast %cst_15 : f32 to vector<32x128xf32>
      %19 = arith.mulf %18, %15 : vector<32x128xf32>
      %20 = arith.mulf %19, %15 : vector<32x128xf32>
      %21 = arith.mulf %20, %15 : vector<32x128xf32>
      %22 = arith.addf %15, %21 : vector<32x128xf32>
      %cst_16 = arith.constant 0.797884583 : f32
      %23 = vector.broadcast %cst_16 : f32 to vector<32x128xf32>
      %24 = arith.mulf %23, %22 : vector<32x128xf32>
      %25 = math.tanh %24 : vector<32x128xf32>
      %cst_17 = arith.constant 1.000000e+00 : f32
      %26 = vector.broadcast %cst_17 : f32 to vector<32x128xf32>
      %27 = arith.addf %26, %25 : vector<32x128xf32>
      %28 = arith.mulf %17, %27 : vector<32x128xf32>
      %cst_18 = arith.constant dense<0.000000e+00> : vector<32xf32>
      %29 = vector.multi_reduction <add>, %28, %cst_18 [1] : vector<32x128xf32> to vector<32xf32>
      %30 = vector.shape_cast %29 : vector<32xf32> to vector<32x1xf32>
      %cst_19 = arith.constant 1.280000e+02 : f32
      %31 = vector.broadcast %cst_19 : f32 to vector<32x1xf32>
      %32 = arith.divf %30, %31 : vector<32x1xf32>
      %33 = vector.broadcast %32 : vector<32x1xf32> to vector<32x128xf32>
      %34 = arith.subf %28, %33 : vector<32x128xf32>
      %35 = arith.mulf %34, %34 : vector<32x128xf32>
      %cst_20 = arith.constant dense<0.000000e+00> : vector<32xf32>
      %36 = vector.multi_reduction <add>, %35, %cst_20 [1] : vector<32x128xf32> to vector<32xf32>
      %37 = vector.shape_cast %36 : vector<32xf32> to vector<32x1xf32>
      %cst_21 = arith.constant 1.280000e+02 : f32
      %38 = vector.broadcast %cst_21 : f32 to vector<32x1xf32>
      %39 = arith.divf %37, %38 : vector<32x1xf32>
      %40 = vector.broadcast %32 : vector<32x1xf32> to vector<32x128xf32>
      %41 = arith.subf %28, %40 : vector<32x128xf32>
      %cst_22 = arith.constant 9.99999996E-13 : f32
      %42 = vector.broadcast %cst_22 : f32 to vector<32x1xf32>
      %43 = arith.addf %39, %42 : vector<32x1xf32>
      %44 = math.rsqrt %43 : vector<32x1xf32>
      %45 = vector.broadcast %44 : vector<32x1xf32> to vector<32x128xf32>
      %46 = arith.mulf %41, %45 : vector<32x128xf32>
      %c0_23 = arith.constant 0 : index
      %c0_24 = arith.constant 0 : index
      %47 = vector.load %arg6[%c0_23, %c0_24] : memref<1x128xf32, #tpu.memory_space<vmem>>, vector<1x128xf32>
      %48 = vector.broadcast %47 : vector<1x128xf32> to vector<32x128xf32>
      %49 = arith.mulf %46, %48 : vector<32x128xf32>
      %c0_25 = arith.constant 0 : index
      %c0_26 = arith.constant 0 : index
      %50 = vector.load %arg7[%c0_25, %c0_26] : memref<1x128xf32, #tpu.memory_space<vmem>>, vector<1x128xf32>
      %51 = vector.broadcast %50 : vector<1x128xf32> to vector<32x128xf32>
      %52 = arith.addf %49, %51 : vector<32x128xf32>
      %53 = arith.truncf %52 : vector<32x128xf32> to vector<32x128xbf16>
      %c0_27 = arith.constant 0 : index
      %c0_28 = arith.constant 0 : index
      %54 = vector.load %arg8[%c0_27, %c0_28] : memref<32x128xbf16, #tpu.memory_space<vmem>>, vector<32x128xbf16>
      tpu.vector_store %arg8[%c0_27, %c0_28], %53 {strides = array<i32>} : memref<32x128xbf16, #tpu.memory_space<vmem>>, vector<32x128xbf16>,
    } else {
    }
    return
  }
  func.func @transform_0(%arg0: i32, %arg1: i32, %arg2: i32) -> (i32, i32) {
    %c0_i32 = arith.constant 0 : i32
    return %arg0, %arg2 : i32, i32
  }
  func.func @transform_1(%arg0: i32, %arg1: i32, %arg2: i32) -> (i32, i32) {
    %c0_i32 = arith.constant 0 : i32
    return %arg2, %arg1 : i32, i32
  }
  func.func @transform_2(%arg0: i32, %arg1: i32, %arg2: i32) -> (i32, i32) {
    %c0_i32 = arith.constant 0 : i32
    %c0_i32_0 = arith.constant 0 : i32
    return %c0_i32, %arg1 : i32, i32
  }
  func.func @transform_3(%arg0: i32, %arg1: i32, %arg2: i32) -> (i32, i32) {
    %c0_i32 = arith.constant 0 : i32
    %c0_i32_0 = arith.constant 0 : i32
    return %c0_i32, %arg1 : i32, i32
  }
  func.func @transform_4(%arg0: i32, %arg1: i32, %arg2: i32) -> (i32, i32) {
    %c0_i32 = arith.constant 0 : i32
    %c0_i32_0 = arith.constant 0 : i32
    return %c0_i32, %arg1 : i32, i32
  }
  func.func @transform_5(%arg0: i32, %arg1: i32, %arg2: i32) -> (i32, i32) {
    %c0_i32 = arith.constant 0 : i32
    return %arg0, %arg1 : i32, i32
  }
}

module attributes {stable_mosaic.version = 11 : i64} {
  func.func @_fused_linear_kernel(%arg0: i32, %arg1: i32, %arg2: i32, %arg3: memref<2x128xbf16, #tpu.memory_space<vmem>>, %arg4: memref<128x2xbf16, #tpu.memory_space<vmem>>, %arg5: memref<1x2xf32, #tpu.memory_space<vmem>>, %arg6: memref<2x2xf32, #tpu.memory_space<vmem>>, %arg7: memref<2x2xf32, #tpu.memory_space<vmem>>) attributes {dimension_semantics = [#tpu.dimension_semantics<parallel>, #tpu.dimension_semantics<parallel>, #tpu.dimension_semantics<arbitrary>], iteration_bounds = array<i64: 1, 1, 1>, scalar_prefetch = 0 : i64, scratch_operands = 1 : i64, tpu.core_type = #tpu.core_type<tc>, window_params = [{transform_indices = @transform_0, window_bounds = array<i64: 2, 128>}, {transform_indices = @transform_1, window_bounds = array<i64: 128, 2>}, {transform_indices = @transform_2, window_bounds = array<i64: 1, 2>}, {transform_indices = @transform_3, window_bounds = array<i64: 2, 2>}]} {
    %c0_i32 = arith.constant 0 : i32
    %0 = arith.cmpi eq, %arg2, %c0_i32 : i32
    %1 = arith.extui %0 : i1 to i32
    %c0_i32_0 = arith.constant 0 : i32
    %2 = arith.cmpi ne, %1, %c0_i32_0 : i32
    scf.if %2 {
      %cst_10 = arith.constant 0.000000e+00 : f32
      %12 = vector.broadcast %cst_10 : f32 to vector<2x2xf32>
      %c0_11 = arith.constant 0 : index
      %c0_12 = arith.constant 0 : index
      %13 = vector.load %arg7[%c0_11, %c0_12] : memref<2x2xf32, #tpu.memory_space<vmem>>, vector<2x2xf32>
      tpu.vector_store %arg7[%c0_11, %c0_12], %12 {strides = array<i32>} : memref<2x2xf32, #tpu.memory_space<vmem>>, vector<2x2xf32>,
    } else {
    }
    %c0 = arith.constant 0 : index
    %c0_1 = arith.constant 0 : index
    %3 = vector.load %arg7[%c0, %c0_1] : memref<2x2xf32, #tpu.memory_space<vmem>>, vector<2x2xf32>
    %c0_2 = arith.constant 0 : index
    %c0_3 = arith.constant 0 : index
    %4 = vector.load %arg3[%c0_2, %c0_3] : memref<2x128xbf16, #tpu.memory_space<vmem>>, vector<2x128xbf16>
    %c0_4 = arith.constant 0 : index
    %c0_5 = arith.constant 0 : index
    %5 = vector.load %arg4[%c0_4, %c0_5] : memref<128x2xbf16, #tpu.memory_space<vmem>>, vector<128x2xbf16>
    %cst = arith.constant dense<0.000000e+00> : vector<2x2xf32>
    %6 = tpu.matmul %4, %5, %cst {dimension_numbers = #tpu.dot_dimension_numbers<[1], [0], [0], [1], [0, 0, 1, 1], [], []>} : vector<2x128xbf16>, vector<128x2xbf16>, vector<2x2xf32> -> vector<2x2xf32>
    %7 = arith.addf %3, %6 : vector<2x2xf32>
    %c0_6 = arith.constant 0 : index
    %c0_7 = arith.constant 0 : index
    %8 = vector.load %arg7[%c0_6, %c0_7] : memref<2x2xf32, #tpu.memory_space<vmem>>, vector<2x2xf32>
    tpu.vector_store %arg7[%c0_6, %c0_7], %7 {strides = array<i32>} : memref<2x2xf32, #tpu.memory_space<vmem>>, vector<2x2xf32>,
    %c0_i32_8 = arith.constant 0 : i32
    %9 = arith.cmpi eq, %arg2, %c0_i32_8 : i32
    %10 = arith.extui %9 : i1 to i32
    %c0_i32_9 = arith.constant 0 : i32
    %11 = arith.cmpi ne, %10, %c0_i32_9 : i32
    scf.if %11 {
      %c0_10 = arith.constant 0 : index
      %c0_11 = arith.constant 0 : index
      %12 = vector.load %arg7[%c0_10, %c0_11] : memref<2x2xf32, #tpu.memory_space<vmem>>, vector<2x2xf32>
      %c0_12 = arith.constant 0 : index
      %c0_13 = arith.constant 0 : index
      %13 = vector.load %arg5[%c0_12, %c0_13] : memref<1x2xf32, #tpu.memory_space<vmem>>, vector<1x2xf32>
      %14 = vector.broadcast %13 : vector<1x2xf32> to vector<2x2xf32>
      %15 = arith.addf %12, %14 : vector<2x2xf32>
      %c0_14 = arith.constant 0 : index
      %c0_15 = arith.constant 0 : index
      %16 = vector.load %arg6[%c0_14, %c0_15] : memref<2x2xf32, #tpu.memory_space<vmem>>, vector<2x2xf32>
      tpu.vector_store %arg6[%c0_14, %c0_15], %15 {strides = array<i32>} : memref<2x2xf32, #tpu.memory_space<vmem>>, vector<2x2xf32>,
    } else {
    }
    return
  }
  func.func @transform_0(%arg0: i32, %arg1: i32, %arg2: i32) -> (i32, i32) {
    %c0_i32 = arith.constant 0 : i32
    return %arg0, %arg2 : i32, i32
  }
  func.func @transform_1(%arg0: i32, %arg1: i32, %arg2: i32) -> (i32, i32) {
    %c0_i32 = arith.constant 0 : i32
    return %arg2, %arg1 : i32, i32
  }
  func.func @transform_2(%arg0: i32, %arg1: i32, %arg2: i32) -> (i32, i32) {
    %c0_i32 = arith.constant 0 : i32
    %c0_i32_0 = arith.constant 0 : i32
    return %c0_i32, %arg1 : i32, i32
  }
  func.func @transform_3(%arg0: i32, %arg1: i32, %arg2: i32) -> (i32, i32) {
    %c0_i32 = arith.constant 0 : i32
    return %arg0, %arg1 : i32, i32
  }
}

module attributes {stable_mosaic.version = 11 : i64} {
  func.func @_fused_linear_kernel(%arg0: i32, %arg1: i32, %arg2: i32, %arg3: memref<32x128xbf16, #tpu.memory_space<vmem>>, %arg4: memref<128x512xbf16, #tpu.memory_space<vmem>>, %arg5: memref<1x512xf32, #tpu.memory_space<vmem>>, %arg6: memref<32x512xf32, #tpu.memory_space<vmem>>, %arg7: memref<32x512xf32, #tpu.memory_space<vmem>>) attributes {dimension_semantics = [#tpu.dimension_semantics<parallel>, #tpu.dimension_semantics<parallel>, #tpu.dimension_semantics<arbitrary>], iteration_bounds = array<i64: 1, 1, 1>, scalar_prefetch = 0 : i64, scratch_operands = 1 : i64, tpu.core_type = #tpu.core_type<tc>, window_params = [{transform_indices = @transform_0, window_bounds = array<i64: 32, 128>}, {transform_indices = @transform_1, window_bounds = array<i64: 128, 512>}, {transform_indices = @transform_2, window_bounds = array<i64: 1, 512>}, {transform_indices = @transform_3, window_bounds = array<i64: 32, 512>}]} {
    %c0_i32 = arith.constant 0 : i32
    %0 = arith.cmpi eq, %arg2, %c0_i32 : i32
    %1 = arith.extui %0 : i1 to i32
    %c0_i32_0 = arith.constant 0 : i32
    %2 = arith.cmpi ne, %1, %c0_i32_0 : i32
    scf.if %2 {
      %cst_10 = arith.constant 0.000000e+00 : f32
      %12 = vector.broadcast %cst_10 : f32 to vector<32x512xf32>
      %c0_11 = arith.constant 0 : index
      %c0_12 = arith.constant 0 : index
      %13 = vector.load %arg7[%c0_11, %c0_12] : memref<32x512xf32, #tpu.memory_space<vmem>>, vector<32x512xf32>
      tpu.vector_store %arg7[%c0_11, %c0_12], %12 {strides = array<i32>} : memref<32x512xf32, #tpu.memory_space<vmem>>, vector<32x512xf32>,
    } else {
    }
    %c0 = arith.constant 0 : index
    %c0_1 = arith.constant 0 : index
    %3 = vector.load %arg7[%c0, %c0_1] : memref<32x512xf32, #tpu.memory_space<vmem>>, vector<32x512xf32>
    %c0_2 = arith.constant 0 : index
    %c0_3 = arith.constant 0 : index
    %4 = vector.load %arg3[%c0_2, %c0_3] : memref<32x128xbf16, #tpu.memory_space<vmem>>, vector<32x128xbf16>
    %c0_4 = arith.constant 0 : index
    %c0_5 = arith.constant 0 : index
    %5 = vector.load %arg4[%c0_4, %c0_5] : memref<128x512xbf16, #tpu.memory_space<vmem>>, vector<128x512xbf16>
    %cst = arith.constant dense<0.000000e+00> : vector<32x512xf32>
    %6 = tpu.matmul %4, %5, %cst {dimension_numbers = #tpu.dot_dimension_numbers<[1], [0], [0], [1], [0, 0, 1, 1], [], []>} : vector<32x128xbf16>, vector<128x512xbf16>, vector<32x512xf32> -> vector<32x512xf32>
    %7 = arith.addf %3, %6 : vector<32x512xf32>
    %c0_6 = arith.constant 0 : index
    %c0_7 = arith.constant 0 : index
    %8 = vector.load %arg7[%c0_6, %c0_7] : memref<32x512xf32, #tpu.memory_space<vmem>>, vector<32x512xf32>
    tpu.vector_store %arg7[%c0_6, %c0_7], %7 {strides = array<i32>} : memref<32x512xf32, #tpu.memory_space<vmem>>, vector<32x512xf32>,
    %c0_i32_8 = arith.constant 0 : i32
    %9 = arith.cmpi eq, %arg2, %c0_i32_8 : i32
    %10 = arith.extui %9 : i1 to i32
    %c0_i32_9 = arith.constant 0 : i32
    %11 = arith.cmpi ne, %10, %c0_i32_9 : i32
    scf.if %11 {
      %c0_10 = arith.constant 0 : index
      %c0_11 = arith.constant 0 : index
      %12 = vector.load %arg7[%c0_10, %c0_11] : memref<32x512xf32, #tpu.memory_space<vmem>>, vector<32x512xf32>
      %c0_12 = arith.constant 0 : index
      %c0_13 = arith.constant 0 : index
      %13 = vector.load %arg5[%c0_12, %c0_13] : memref<1x512xf32, #tpu.memory_space<vmem>>, vector<1x512xf32>
      %14 = vector.broadcast %13 : vector<1x512xf32> to vector<32x512xf32>
      %15 = arith.addf %12, %14 : vector<32x512xf32>
      %c0_14 = arith.constant 0 : index
      %c0_15 = arith.constant 0 : index
      %16 = vector.load %arg6[%c0_14, %c0_15] : memref<32x512xf32, #tpu.memory_space<vmem>>, vector<32x512xf32>
      tpu.vector_store %arg6[%c0_14, %c0_15], %15 {strides = array<i32>} : memref<32x512xf32, #tpu.memory_space<vmem>>, vector<32x512xf32>,
    } else {
    }
    return
  }
  func.func @transform_0(%arg0: i32, %arg1: i32, %arg2: i32) -> (i32, i32) {
    %c0_i32 = arith.constant 0 : i32
    return %arg0, %arg2 : i32, i32
  }
  func.func @transform_1(%arg0: i32, %arg1: i32, %arg2: i32) -> (i32, i32) {
    %c0_i32 = arith.constant 0 : i32
    return %arg2, %arg1 : i32, i32
  }
  func.func @transform_2(%arg0: i32, %arg1: i32, %arg2: i32) -> (i32, i32) {
    %c0_i32 = arith.constant 0 : i32
    %c0_i32_0 = arith.constant 0 : i32
    return %c0_i32, %arg1 : i32, i32
  }
  func.func @transform_3(%arg0: i32, %arg1: i32, %arg2: i32) -> (i32, i32) {
    %c0_i32 = arith.constant 0 : i32
    return %arg0, %arg1 : i32, i32
  }
}

</mosaic_0001>

<bundles_post_ra>
// kernel: stage1_forward.64
= control target key start
LH: loop header
LB: loop body
LE: loop exit
PB: predicated region body
PF: predicated region fallthrough
CT: control target
= control target key end

     0   :  { %8 = vsyncpa [#allocation4], 0  ;;  %s787_s0 = inlined_call_operand.hbm [shape: bf16[32,128], index: 0, kind: input, shape index: {}]   ;;  %s788_s1 = inlined_call_operand.hbm [shape: bf16[128,384], index: 1, kind: input, shape index: {}]   ;;  %s789_s2 = inlined_call_operand.hbm [shape: f32[1,384], index: 2, kind: input, shape index: {}]   ;;  %s790_s3 = inlined_call_operand.hbm [shape: bf16[32,384], index: 3, kind: output, shape index: {}]  }
   0x1   :  { %9 = vsyncpa [#allocation7], 0 }
   0x2   :  { %10 = vsyncpa [#allocation5], 0  ;;  %s704_s12 = smov [#allocation6]   ;;  %s610_s16 = scalar_lea.hbm %s788_s1, 3072 }
   0x3   :  { %s28_s13 = sshll.u32 %s704_s12, 4  ;;  %p611_p0 = scmp.ne.s32.totalorder %s788_s1, %s610_s16  ;;  %s29_s13 = int_to_ptr.vmem [resolvable:$true] %s28_s13 }
   0x4   :  { %p614_p1 = scmp.lt.u32.totalorder %s610_s16, %s788_s1 }
   0x6   :  { %p616_p2 = pnand %p614_p1, %p611_p0 }
   0x8   :  { %619 = shalt.err (!%p616_p2)
}
   0x9   :  { %s620_s21 = scalar_lea.vmem %s29_s13, 3072  ;;  %p625_p4 = scmp.lt.s32.totalorder %s29_s13, %s29_s13 }
   0xa   :  { %p621_p3 = scmp.ne.s32.totalorder %s29_s13, %s620_s21  ;;  %p626_p5 = scmp.lt.s32.totalorder %s620_s21, %s620_s21 }
   0xc   :  { %p627_p6 = por %p626_p5, %p625_p4 }
   0xe   :  { %p628_p7 = pnand %p627_p6, %p621_p3 }
  0x10   :  { %631 = shalt.err (!%p628_p7)
}
  0x11   :  { %s705_s22 = smov 192   ;;  %s706_s23 = smov 12  }
  0x12   :  { %34 = dma.hbm_to_vmem [thread:$0]  %s788_s1, 3072, %s29_s13, [#allocation7], %s705_s22, %s705_s22, %s706_s23  }
  0x13   :  { %s707_s26 = smov [#allocation3]   ;;  %s632_s30 = scalar_lea.hbm %s787_s0, 256 }
  0x14   :  { %s16_s27 = sshll.u32 %s707_s26, 4  ;;  %p633_p8 = scmp.ne.s32.totalorder %s787_s0, %s632_s30  ;;  %s17_s27 = int_to_ptr.vmem [resolvable:$true] %s16_s27 }
  0x15   :  { %p636_p9 = scmp.lt.u32.totalorder %s632_s30, %s787_s0 }
  0x17   :  { %p638_p10 = pnand %p636_p9, %p633_p8 }
  0x19   :  { %641 = shalt.err (!%p638_p10)
}
  0x1a   :  { %s642_s8 = scalar_lea.vmem %s17_s27, 256  ;;  %p647_p12 = scmp.lt.s32.totalorder %s17_s27, %s17_s27 }
  0x1b   :  { %p643_p11 = scmp.ne.s32.totalorder %s17_s27, %s642_s8  ;;  %p648_p13 = scmp.lt.s32.totalorder %s642_s8, %s642_s8 }
  0x1d   :  { %p649_p0 = por %p648_p13, %p647_p12 }
  0x1f   :  { %p650_p1 = pnand %p649_p0, %p643_p11 }
  0x21   :  { %653 = shalt.err (!%p650_p1)
}
  0x22   :  { %s708_s1 = smov 64   ;;  %s709_s9 = smov 4  }
  0x23   :  { %22 = dma.hbm_to_vmem [thread:$0]  %s787_s0, 256, %s17_s27, [#allocation4], %s708_s1, %s708_s1, %s709_s9  }
  0x24   :  { %s710_s12 = smov [#allocation8]   ;;  %s654_s16 = scalar_lea.hbm %s789_s2, 48 }
  0x25   :  { %s41_s13 = sshll.u32 %s710_s12, 4  ;;  %p655_p2 = scmp.ne.s32.totalorder %s789_s2, %s654_s16  ;;  %s42_s13 = int_to_ptr.vmem [resolvable:$true] %s41_s13 }
  0x26   :  { %p658_p3 = scmp.lt.u32.totalorder %s654_s16, %s789_s2 }
  0x28   :  { %p660_p4 = pnand %p658_p3, %p655_p2 }
  0x2a   :  { %663 = shalt.err (!%p660_p4)
}
  0x2b   :  { %s664_s21 = scalar_lea.vmem %s42_s13, 48  ;;  %s668_s0 = scalar_lea.vmem %s42_s13, 64 }
  0x2c   :  { %p665_p5 = scmp.ne.s32.totalorder %s42_s13, %s664_s21  ;;  %p669_p6 = scmp.lt.s32.totalorder %s42_s13, %s42_s13 }
  0x2d   :  { %p670_p7 = scmp.lt.s32.totalorder %s668_s0, %s664_s21 }
  0x2f   :  { %p671_p8 = por %p670_p7, %p669_p6 }
  0x31   :  { %p672_p9 = pnand %p671_p8, %p665_p5 }
  0x33   :  { %675 = shalt.err (!%p672_p9)
}
  0x34   :  { %44 = dma.hbm_to_vmem [thread:$0]  %s789_s2, 48, %s42_s13, [#allocation7]  }
  0x35   :  { %698 = dma.done.wait [#allocation4], 256  }
  0x36   :  { %699 = vsyncadd [#allocation4], 4294967040 }
  0x37   :  { %700 = dma.done.wait [#allocation7], 3120  }
  0x38   :  { %701 = vsyncadd [#allocation7], 4294964176  ;;  %v711_v0 = vmov 0   ;;  %v576_v1 = vld [vmem:[#allocation6 + $0x4] ss:$12 sps:$4 sm:$0xff]   ;;  %v609_v26 = vld [vmem:[#allocation3 + $0x8] sm:$0xff]   ;;  %v402_v27 = vlaneseq }
  0x39   :  { %291 = vmatprep.mubr.bf16.mxu0 %v711_v0  ;;  %v578_v2 = vld [vmem:[#allocation6] ss:$12 sps:$4 sm:$0xff]   ;;  %259 = vmatprep.subr.bf16.mxu0 %v576_v1  ;;  %v579_v3 = vld [vmem:[#allocation6 + $0x1c] ss:$12 sps:$4 sm:$0xff]   ;;  %v581_v4 = vld [vmem:[#allocation6 + $0x18] ss:$12 sps:$4 sm:$0xff]  }
  0x3a   :  { %260 = vmatpush1.bf16.msra.mxu0 %v578_v2  ;;  %v582_v5 = vld [vmem:[#allocation6 + $0x8] ss:$12 sps:$4 sm:$0xff]   ;;  %v586_v7 = vld [vmem:[#allocation6 + $0x20] ss:$12 sps:$4 sm:$0xff]   ;;  %v585_v8 = vld [vmem:[#allocation6 + $0x30] ss:$12 sps:$4 sm:$0xff]  }
  0x3b   :  { %261 = vmatprep.subr.bf16.mxu0 %v579_v3  ;;  %v583_v6 = vld [vmem:[#allocation6 + $0x34] ss:$12 sps:$4 sm:$0xff]   ;;  %547 = vmatprep.subr.bf16.mxu1 %v582_v5  ;;  %v587_v9 = vld [vmem:[#allocation6 + $0x4c] ss:$12 sps:$4 sm:$0xff]   ;;  %v594_v12 = vld [vmem:[#allocation6 + $0x50] ss:$12 sps:$4 sm:$0xff]  }
  0x3c   :  { %548 = vmatpush3.bf16.msra.mxu1 %v582_v5  ;;  %v590_v10 = vld [vmem:[#allocation6 + $0x38] ss:$12 sps:$4 sm:$0xff]   ;;  %v589_v11 = vld [vmem:[#allocation6 + $0x48] ss:$12 sps:$4 sm:$0xff]   ;;  %v593_v14 = vld [vmem:[#allocation6 + $0x60] ss:$12 sps:$4 sm:$0xff]  }
  0x3d   :  { %549 = vmatprep.subr.bf16.mxu1 %v586_v7  ;;  %v591_v13 = vld [vmem:[#allocation6 + $0x64] ss:$12 sps:$4 sm:$0xff]   ;;  %v598_v15 = vld [vmem:[#allocation6 + $0x68] ss:$12 sps:$4 sm:$0xff]   ;;  %v602_v19 = vld [vmem:[#allocation6 + $0x80] ss:$12 sps:$4 sm:$0xff]  }
  0x3e   :  { %262 = vmatpush1.bf16.msra.mxu0 %v581_v4  ;;  %v595_v16 = vld [vmem:[#allocation6 + $0x7c] ss:$12 sps:$4 sm:$0xff]   ;;  %v597_v17 = vld [vmem:[#allocation6 + $0x78] ss:$12 sps:$4 sm:$0xff]   ;;  %v607_v18 = vld [vmem:[#allocation3] sm:$0xff]   ;;  %v403_v28 = vshrl.u32 %v402_v27, 7 }
  0x3f   :  { %263 = vmatprep.subr.bf16.mxu0 %v583_v6  ;;  %v599_v20 = vld [vmem:[#allocation6 + $0x94] ss:$12 sps:$4 sm:$0xff]   ;;  %563 = vmatprep.mubr.bf16.mxu1 %v607_v18  ;;  %v601_v21 = vld [vmem:[#allocation6 + $0x90] ss:$12 sps:$4 sm:$0xff]   ;;  %v606_v22 = vld [vmem:[#allocation6 + $0x98] ss:$12 sps:$4 sm:$0xff]  }
  0x40   :  { %550 = vmatpush3.bf16.msra.mxu1 %v586_v7  ;;  %v603_v23 = vld [vmem:[#allocation6 + $0xac] ss:$12 sps:$4 sm:$0xff]   ;;  %v605_v24 = vld [vmem:[#allocation6 + $0xa8] ss:$12 sps:$4 sm:$0xff]   ;;  %v608_v25 = vld [vmem:[#allocation6 + $0xb0] ss:$12 sps:$4 sm:$0xff]  }
  0x41   :  { %551 = vmatprep.subr.bf16.mxu1 %v590_v10  ;;  %v404_v29 = vsub.s32 0, %v403_v28  ;;  %v400_v30 = vld [vmem:[#allocation8] sm:$0x7]  ;;  %v408_v31 = vsub.s32 1, %v403_v28  ;;  %v412_v32 = vsub.s32 2, %v403_v28  ;;  %s712_s2 = smov [#allocation9]  }
  0x42   :  { %264 = vmatpush1.bf16.msra.mxu0 %v585_v8  ;;  %s482_s26 = sshll.u32 %s712_s2, 4  ;;  %s483_s26 = int_to_ptr.vmem [resolvable:$true] %s482_s26 }
  0x43   :  { %265 = vmatprep.subr.bf16.mxu0 %v587_v9  ;;  %v405_v33 = vrot.slane %v400_v30, %v404_v29  ;;  %v409_v34 = vrot.slane %v400_v30, %v408_v31  ;;  %v413_v36 = vrot.slane %v400_v30, %v412_v32  ;;  %s676_s27 = scalar_lea.vmem %s483_s26, 768  ;;  %p681_p11 = scmp.lt.s32.totalorder %s483_s26, %s483_s26 }
  0x44   :  { %552 = vmatpush3.bf16.msra.mxu1 %v590_v10  ;;  %p677_p10 = scmp.ne.s32.totalorder %s483_s26, %s676_s27  ;;  %p682_p12 = scmp.lt.s32.totalorder %s676_s27, %s676_s27 }
  0x45   :  { %553 = vmatprep.subr.bf16.mxu1 %v594_v12 }
  0x46   :  { %266 = vmatpush1.bf16.msra.mxu0 %v589_v11  ;;  %p683_p13 = por %p682_p12, %p681_p11 }
  0x47   :  { %267 = vmatprep.subr.bf16.mxu0 %v591_v13 }
  0x48   :  { %554 = vmatpush3.bf16.msra.mxu1 %v594_v12  ;;  %p684_p0 = pnand %p683_p13, %p677_p10 }
  0x49   :  { %555 = vmatprep.subr.bf16.mxu1 %v598_v15 }
  0x4a   :  { %268 = vmatpush1.bf16.msra.mxu0 %v593_v14 }
  0x4b   :  { %269 = vmatprep.subr.bf16.mxu0 %v595_v16 }
  0x4c   :  { %556 = vmatpush3.bf16.msra.mxu1 %v598_v15 }
  0x4d   :  { %557 = vmatprep.subr.bf16.mxu1 %v602_v19 }
  0x4e   :  { %270 = vmatpush1.bf16.msra.mxu0 %v597_v17 }
  0x4f   :  { %271 = vmatprep.subr.bf16.mxu0 %v599_v20 }
  0x50   :  { %558 = vmatpush3.bf16.msra.mxu1 %v602_v19 }
  0x51   :  { %559 = vmatprep.subr.bf16.mxu1 %v606_v22 }
  0x52   :  { %272 = vmatpush1.bf16.msra.mxu0 %v601_v21 }
  0x53   :  { %273 = vmatprep.subr.bf16.mxu0 %v603_v23 }
  0x54   :  { %560 = vmatpush3.bf16.msra.mxu1 %v606_v22 }
  0x55   :  { %561 = vmatprep.subr.bf16.mxu1 %v608_v25 }
  0x56   :  { %274 = vmatpush1.bf16.msra.mxu0 %v605_v24 }
  0x58   :  { %562 = vmatpush3.bf16.msra.mxu1 %v608_v25 }
  0x59   :  { %292 = vmatmul.mubr.bf16.vlgmr.msra.gmra.mrb[0].mxu0 %v607_v18 }
  0x5a   :  { %301 = vmatprep.mubr.bf16.mxu0 %v711_v0 }
  0x5b   :  { %564 = vmatmul.mubr.bf16.vlgmr.msra.gmra.mrb[0].mxu1 %v609_v26 }
  0x61   :  { %302 = vmatmul.mubr.bf16.gmra.mrb[4].mxu0 %v609_v26 }
 0x12c   :  { %v293_v35 = vpop.f32.mrb[0].mxu0 }
 0x12d   :  { %v417_v37 = vadd.f32 %v405_v33, %v293_v35  ;;  %v295_v38 = vpop.f32.mrb[1].mxu0 }
 0x12e   :  { %v418_v39 = vadd.f32 %v409_v34, %v295_v38  ;;  %v297_v40 = vpop.f32.mrb[2].mxu0  ;;  %v565_v43 = vpop.f32.mrb[0].mxu1 }
 0x12f   :  { %v420_v41 = vadd.f32 %v405_v33, %v297_v40  ;;  %v299_v42 = vpop.f32.mrb[3].mxu0  ;;  %v425_v46 = vadd.f32 %v565_v43, %v413_v36  ;;  %v346_v47 = vpop.f32.mrb[1].mxu1 }
 0x130   :  { %v529_v44 = vpack.c.bf16 %v418_v39, %v417_v37  ;;  %v421_v45 = vadd.f32 %v409_v34, %v299_v42  ;;  %v419_v48 = vadd.f32 %v413_v36, %v346_v47  ;;  %v566_v49 = vpop.f32.mrb[2].mxu1 }
 0x131   :  { %v534_v51 = vpack.c.bf16 %v425_v46, %v425_v46  ;;  %v428_v52 = vadd.f32 %v566_v49, %v413_v36  ;;  %v349_v53 = vpop.f32.mrb[3].mxu1 }
 0x132   :  { %469 = vst [vmem:[#allocation9] sm:$0xff] %v529_v44  ;;  %v531_v50 = vpack.c.bf16 %v421_v45, %v420_v41  ;;  %v530_v54 = vpack.c.bf16 %v419_v48, %v419_v48  ;;  %v422_v55 = vadd.f32 %v413_v36, %v349_v53 }
 0x133   :  { %474 = vst [vmem:[#allocation9 + $0x20] sm:$0xf] %v534_v51  ;;  %v536_v56 = vpack.c.bf16 %v428_v52, %v428_v52 }
 0x134   :  { %471 = vst [vmem:[#allocation9 + $0xc] sm:$0xff] %v531_v50  ;;  %v303_v57 = vpop.f32.mrb[4].mxu0  ;;  %470 = vst [vmem:[#allocation9 + $0x8] sm:$0xf] %v530_v54  ;;  %v532_v59 = vpack.c.bf16 %v422_v55, %v422_v55 }
 0x135   :  { %v423_v58 = vadd.f32 %v405_v33, %v303_v57  ;;  %v305_v60 = vpop.f32.mrb[5].mxu0  ;;  %476 = vst [vmem:[#allocation9 + $0x2c] sm:$0xf] %v536_v56 }
 0x136   :  { %v424_v61 = vadd.f32 %v409_v34, %v305_v60  ;;  %v307_v62 = vpop.f32.mrb[6].mxu0  ;;  %472 = vst [vmem:[#allocation9 + $0x14] sm:$0xf] %v532_v59 }
 0x137   :  { %v426_v63 = vadd.f32 %v405_v33, %v307_v62  ;;  %v309_v0 = vpop.f32.mrb[7].mxu0 }
 0x138   :  { %v533_v1 = vpack.c.bf16 %v424_v61, %v423_v58  ;;  %v427_v2 = vadd.f32 %v409_v34, %v309_v0 }
 0x13a   :  { %473 = vst [vmem:[#allocation9 + $0x18] sm:$0xff] %v533_v1  ;;  %v535_v3 = vpack.c.bf16 %v427_v2, %v426_v63 }
 0x13c   :  { %475 = vst [vmem:[#allocation9 + $0x24] sm:$0xff] %v535_v3 }
 0x13d   :  { %687 = shalt.err (!%p684_p0)
}
 0x13e   :  { %s688_s30 = scalar_lea.hbm %s790_s3, 768 }
 0x13f   :  { %p689_p1 = scmp.ne.s32.totalorder %s790_s3, %s688_s30  ;;  %p692_p2 = scmp.lt.u32.totalorder %s688_s30, %s790_s3 }
 0x141   :  { %p694_p3 = pnand %p692_p2, %p689_p1 }
 0x143   :  { %697 = shalt.err (!%p694_p3)
}
 0x144   :  { %488 = dma.vmem_to_hbm [thread:$0]  %s483_s26, 768, %s790_s3, [#allocation5], %s705_s22, %s705_s22, %s706_s23  }
 0x145   :  { %702 = dma.done.wait [#allocation5], 768  }
 0x146   :  { %703 = vsyncadd [#allocation5], 4294966528 }
 0x147   :  { %492 = vsyncpa [#allocation4], 1 }
 0x148   :  { %493 = vsyncpa [#allocation7], 1 }
 0x149   :  { %494 = vsyncpa [#allocation5], 1 }

// kernel: stage1_forward.66
= control target key start
LH: loop header
LB: loop body
LE: loop exit
PB: predicated region body
PF: predicated region fallthrough
CT: control target
= control target key end

     0   :  { %11 = vsyncpa [#allocation4], 0  ;;  %s796_s0 = inlined_call_operand.hbm [shape: bf16[32,128], index: 0, kind: input, shape index: {}]   ;;  %s797_s1 = inlined_call_operand.hbm [shape: bf16[128,128], index: 1, kind: input, shape index: {}]   ;;  %s798_s2 = inlined_call_operand.hbm [shape: f32[1,128], index: 2, kind: input, shape index: {}]   ;;  %s799_s3 = inlined_call_operand.hbm [shape: bf16[32,128], index: 3, kind: input, shape index: {}]   ;;  %s800_s4 = inlined_call_operand.hbm [shape: f32[1,128], index: 4, kind: input, shape index: {}]   ;;  %s801_s5 = inlined_call_operand.hbm [shape: f32[1,128], index: 5, kind: input, shape index: {}]   ;;  %s802_s6 = inlined_call_operand.hbm [shape: bf16[32,128], index: 6, kind: output, shape index: {}]  }
   0x1   :  { %12 = vsyncpa [#allocation7], 0 }
   0x2   :  { %13 = vsyncpa [#allocation10], 0 }
   0x3   :  { %14 = vsyncpa [#allocation13], 0 }
   0x4   :  { %15 = vsyncpa [#allocation5], 0  ;;  %s649_s21 = smov [#allocation6]   ;;  %s650_s23 = smov [#allocation9]  }
   0x5   :  { %s33_s22 = sshll.u32 %s649_s21, 4  ;;  %s55_s24 = sshll.u32 %s650_s23, 4  ;;  %s34_s22 = int_to_ptr.vmem [resolvable:$true] %s33_s22  ;;  %s693_s24 = int_to_ptr.vmem [resolvable:$true] %s55_s24 }
   0x6   :  { %s485_s27 = scalar_lea.hbm %s797_s1, 1024 }
   0x7   :  { %p486_p0 = scmp.ne.s32.totalorder %s797_s1, %s485_s27  ;;  %p489_p1 = scmp.lt.u32.totalorder %s485_s27, %s797_s1 }
   0x9   :  { %p491_p2 = pnand %p489_p1, %p486_p0 }
   0xb   :  { %494 = shalt.err (!%p491_p2)
}
   0xc   :  { %s495_s8 = scalar_lea.vmem %s34_s22, 1024  ;;  %p500_p4 = scmp.lt.s32.totalorder %s34_s22, %s34_s22 }
   0xd   :  { %p496_p3 = scmp.ne.s32.totalorder %s34_s22, %s495_s8  ;;  %p501_p5 = scmp.lt.s32.totalorder %s495_s8, %s495_s8 }
   0xf   :  { %p502_p6 = por %p501_p5, %p500_p4 }
  0x11   :  { %p503_p7 = pnand %p502_p6, %p496_p3 }
  0x13   :  { %506 = shalt.err (!%p503_p7)
}
  0x14   :  { %s651_s9 = smov 64   ;;  %s652_s10 = smov 4  }
  0x15   :  { %39 = dma.hbm_to_vmem [thread:$0]  %s797_s1, 1024, %s34_s22, [#allocation7], %s651_s9, %s651_s9, %s652_s10  }
  0x16   :  { %s507_s15 = scalar_lea.hbm %s799_s3, 256 }
  0x17   :  { %p508_p8 = scmp.ne.s32.totalorder %s799_s3, %s507_s15  ;;  %p511_p9 = scmp.lt.u32.totalorder %s507_s15, %s799_s3 }
  0x19   :  { %p513_p10 = pnand %p511_p9, %p508_p8 }
  0x1b   :  { %516 = shalt.err (!%p513_p10)
}
  0x1c   :  { %s517_s20 = scalar_lea.vmem %s693_s24, 256  ;;  %p522_p12 = scmp.lt.s32.totalorder %s693_s24, %s693_s24 }
  0x1d   :  { %p518_p11 = scmp.ne.s32.totalorder %s693_s24, %s517_s20  ;;  %p523_p13 = scmp.lt.s32.totalorder %s517_s20, %s517_s20 }
  0x1f   :  { %p524_p0 = por %p523_p13, %p522_p12 }
  0x21   :  { %p525_p1 = pnand %p524_p0, %p518_p11 }
  0x23   :  { %528 = shalt.err (!%p525_p1)
}
  0x24   :  { %61 = dma.hbm_to_vmem [thread:$0]  %s799_s3, 256, %s693_s24, [#allocation10], %s651_s9, %s651_s9, %s652_s10  }
  0x25   :  { %s653_s22 = smov [#allocation3]   ;;  %s654_s25 = smov [#allocation8]  }
  0x26   :  { %s21_s23 = sshll.u32 %s653_s22, 4  ;;  %s46_s26 = sshll.u32 %s654_s25, 4  ;;  %s22_s23 = int_to_ptr.vmem [resolvable:$true] %s21_s23  ;;  %s47_s26 = int_to_ptr.vmem [resolvable:$true] %s46_s26 }
  0x27   :  { %s529_s29 = scalar_lea.hbm %s796_s0, 256 }
  0x28   :  { %p530_p2 = scmp.ne.s32.totalorder %s796_s0, %s529_s29  ;;  %p533_p3 = scmp.lt.u32.totalorder %s529_s29, %s796_s0 }
  0x2a   :  { %p535_p4 = pnand %p533_p3, %p530_p2 }
  0x2c   :  { %538 = shalt.err (!%p535_p4)
}
  0x2d   :  { %s539_s3 = scalar_lea.vmem %s22_s23, 256  ;;  %p544_p6 = scmp.lt.s32.totalorder %s22_s23, %s22_s23 }
  0x2e   :  { %p540_p5 = scmp.ne.s32.totalorder %s22_s23, %s539_s3  ;;  %p545_p7 = scmp.lt.s32.totalorder %s539_s3, %s539_s3 }
  0x30   :  { %p546_p8 = por %p545_p7, %p544_p6 }
  0x32   :  { %p547_p9 = pnand %p546_p8, %p540_p5 }
  0x34   :  { %550 = shalt.err (!%p547_p9)
}
  0x35   :  { %27 = dma.hbm_to_vmem [thread:$0]  %s796_s0, 256, %s22_s23, [#allocation4], %s651_s9, %s651_s9, %s652_s10  }
  0x36   :  { %s551_s15 = scalar_lea.hbm %s798_s2, 16 }
  0x37   :  { %p552_p10 = scmp.ne.s32.totalorder %s798_s2, %s551_s15  ;;  %p555_p11 = scmp.lt.u32.totalorder %s551_s15, %s798_s2 }
  0x39   :  { %p557_p12 = pnand %p555_p11, %p552_p10 }
  0x3b   :  { %560 = shalt.err (!%p557_p12)
}
  0x3c   :  { %s561_s20 = scalar_lea.vmem %s47_s26, 16  ;;  %s565_s1 = scalar_lea.vmem %s47_s26, 32 }
  0x3d   :  { %p562_p13 = scmp.ne.s32.totalorder %s47_s26, %s561_s20  ;;  %p566_p0 = scmp.lt.s32.totalorder %s47_s26, %s47_s26 }
  0x3e   :  { %p567_p1 = scmp.lt.s32.totalorder %s565_s1, %s561_s20 }
  0x40   :  { %p568_p2 = por %p567_p1, %p566_p0 }
  0x42   :  { %p569_p3 = pnand %p568_p2, %p562_p13 }
  0x44   :  { %572 = shalt.err (!%p569_p3)
}
  0x45   :  { %49 = dma.hbm_to_vmem [thread:$0]  %s798_s2, 16, %s47_s26, [#allocation7]  }
  0x46   :  { %s655_s22 = smov [#allocation11]   ;;  %s656_s25 = smov [#allocation12]  }
  0x47   :  { %s68_s23 = sshll.u32 %s655_s22, 4  ;;  %s78_s27 = sshll.u32 %s656_s25, 4  ;;  %s69_s23 = int_to_ptr.vmem [resolvable:$true] %s68_s23  ;;  %s79_s27 = int_to_ptr.vmem [resolvable:$true] %s78_s27 }
  0x48   :  { %s573_s30 = scalar_lea.hbm %s800_s4, 16 }
  0x49   :  { %p574_p4 = scmp.ne.s32.totalorder %s800_s4, %s573_s30  ;;  %p577_p5 = scmp.lt.u32.totalorder %s573_s30, %s800_s4 }
  0x4b   :  { %p579_p6 = pnand %p577_p5, %p574_p4 }
  0x4d   :  { %582 = shalt.err (!%p579_p6)
}
  0x4e   :  { %s583_s2 = scalar_lea.vmem %s69_s23, 16  ;;  %s587_s26 = scalar_lea.vmem %s69_s23, 32 }
  0x4f   :  { %p584_p7 = scmp.ne.s32.totalorder %s69_s23, %s583_s2  ;;  %p588_p8 = scmp.lt.s32.totalorder %s69_s23, %s69_s23 }
  0x50   :  { %p589_p9 = scmp.lt.s32.totalorder %s587_s26, %s583_s2 }
  0x52   :  { %p590_p10 = por %p589_p9, %p588_p8 }
  0x54   :  { %p591_p11 = pnand %p590_p10, %p584_p7 }
  0x56   :  { %594 = shalt.err (!%p591_p11)
}
  0x57   :  { %71 = dma.hbm_to_vmem [thread:$0]  %s800_s4, 16, %s69_s23, [#allocation10]  }
  0x58   :  { %s595_s15 = scalar_lea.hbm %s801_s5, 16 }
  0x59   :  { %p596_p12 = scmp.ne.s32.totalorder %s801_s5, %s595_s15  ;;  %p599_p13 = scmp.lt.u32.totalorder %s595_s15, %s801_s5 }
  0x5b   :  { %p601_p0 = pnand %p599_p13, %p596_p12 }
  0x5d   :  { %604 = shalt.err (!%p601_p0)
}
  0x5e   :  { %s605_s20 = scalar_lea.vmem %s79_s27, 16  ;;  %s609_s1 = scalar_lea.vmem %s79_s27, 32 }
  0x5f   :  { %p606_p1 = scmp.ne.s32.totalorder %s79_s27, %s605_s20  ;;  %p610_p2 = scmp.lt.s32.totalorder %s79_s27, %s79_s27 }
  0x60   :  { %p611_p3 = scmp.lt.s32.totalorder %s609_s1, %s605_s20 }
  0x62   :  { %p612_p4 = por %p611_p3, %p610_p2 }
  0x64   :  { %p613_p5 = pnand %p612_p4, %p606_p1 }
  0x66   :  { %616 = shalt.err (!%p613_p5)
}
  0x67   :  { %81 = dma.hbm_to_vmem [thread:$0]  %s801_s5, 16, %s79_s27, [#allocation13]  }
  0x68   :  { %639 = dma.done.wait [#allocation4], 256  }
  0x69   :  { %640 = vsyncadd [#allocation4], 4294967040 }
  0x6a   :  { %641 = dma.done.wait [#allocation7], 1040  }
  0x6b   :  { %642 = vsyncadd [#allocation7], 4294966256 }
  0x6c   :  { %643 = dma.done.wait [#allocation10], 272  }
  0x6d   :  { %644 = vsyncadd [#allocation10], 4294967024 }
  0x6e   :  { %645 = dma.done.wait [#allocation13], 16  }
  0x6f   :  { %646 = vsyncadd [#allocation13], 4294967280  ;;  %v467_v0 = vld [vmem:[#allocation6] sm:$0xff]   ;;  %v468_v1 = vld [vmem:[#allocation6 + $0x8] sm:$0xff]   ;;  %s657_s5 = smov [#allocation14]  }
  0x70   :  { %438 = vmatprep.subr.bf16.mxu0 %v467_v0  ;;  %v469_v2 = vld [vmem:[#allocation6 + $0x10] sm:$0xff]   ;;  %v470_v3 = vld [vmem:[#allocation6 + $0x18] sm:$0xff]   ;;  %v471_v5 = vld [vmem:[#allocation6 + $0x20] sm:$0xff]   ;;  %s372_s21 = sshll.u32 %s657_s5, 4  ;;  %s373_s21 = int_to_ptr.vmem [resolvable:$true] %s372_s21 }
  0x71   :  { %439 = vmatpush3.bf16.msra.mxu0 %v467_v0  ;;  %v475_v4 = vld [vmem:[#allocation3] sm:$0xff]   ;;  %v472_v6 = vld [vmem:[#allocation6 + $0x28] sm:$0xff]   ;;  %v474_v8 = vld [vmem:[#allocation6 + $0x38] sm:$0xff]   ;;  %s617_s22 = scalar_lea.vmem %s373_s21, 256  ;;  %p622_p7 = scmp.lt.s32.totalorder %s373_s21, %s373_s21 }
  0x72   :  { %440 = vmatprep.subr.bf16.mxu0 %v468_v1  ;;  %454 = vmatprep.mubr.bf16.mxu0 %v475_v4  ;;  %v473_v7 = vld [vmem:[#allocation6 + $0x30] sm:$0xff]   ;;  %v476_v9 = vld [vmem:[#allocation3 + $0x8] sm:$0xff]   ;;  %v409_v11 = vld [vmem:[#allocation9] sm:$0xff]   ;;  %p618_p6 = scmp.ne.s32.totalorder %s373_s21, %s617_s22  ;;  %p623_p8 = scmp.lt.s32.totalorder %s617_s22, %s617_s22 }
  0x73   :  { %v426_v10 = vld [vmem:[#allocation9 + $0x8] sm:$0xff]   ;;  %v397_v12 = vld [vmem:[#allocation8] ss:$0 sm:$0xff]  ;;  %v410_v15 = vunpack.c.l.bf16 %v409_v11  ;;  %v411_v26 = vunpack.c.h.bf16 %v409_v11  ;;  %v398_v59 = vld [vmem:[#allocation11] ss:$0 sm:$0xff] }
  0x74   :  { %v414_v13 = vunpack.c.l.bf16 %v426_v10  ;;  %v415_v23 = vunpack.c.h.bf16 %v426_v10  ;;  %p624_p9 = por %p623_p8, %p622_p7 }
  0x75   :  { %441 = vmatpush3.bf16.msra.mxu0 %v468_v1  ;;  %v399_v1 = vld [vmem:[#allocation12] ss:$0 sm:$0xff] }
  0x76   :  { %442 = vmatprep.subr.bf16.mxu0 %v469_v2  ;;  %p625_p10 = pnand %p624_p9, %p618_p6 }
  0x79   :  { %443 = vmatpush3.bf16.msra.mxu0 %v469_v2 }
  0x7a   :  { %444 = vmatprep.subr.bf16.mxu0 %v470_v3 }
  0x7d   :  { %445 = vmatpush3.bf16.msra.mxu0 %v470_v3 }
  0x7e   :  { %446 = vmatprep.subr.bf16.mxu0 %v471_v5 }
  0x81   :  { %447 = vmatpush3.bf16.msra.mxu0 %v471_v5 }
  0x82   :  { %448 = vmatprep.subr.bf16.mxu0 %v472_v6 }
  0x85   :  { %449 = vmatpush3.bf16.msra.mxu0 %v472_v6 }
  0x86   :  { %450 = vmatprep.subr.bf16.mxu0 %v473_v7 }
  0x89   :  { %451 = vmatpush3.bf16.msra.mxu0 %v473_v7 }
  0x8a   :  { %452 = vmatprep.subr.bf16.mxu0 %v474_v8 }
  0x8d   :  { %453 = vmatpush3.bf16.msra.mxu0 %v474_v8 }
  0x90   :  { %455 = vmatmul.mubr.bf16.vlgmr.msra.gmra.mrb[0].mxu0 %v476_v9 }
 0x163   :  { %v456_v14 = vpop.f32.mrb[0].mxu0 }
 0x164   :  { %v266_v16 = vadd.f32 %v456_v14, %v397_v12  ;;  %v227_v17 = vpop.f32.mrb[1].mxu0 }
 0x165   :  { %v264_v18 = vadd.f32 %v397_v12, %v227_v17  ;;  %v457_v19 = vpop.f32.mrb[2].mxu0 }
 0x166   :  { %v267_v20 = vadd.f32 %v457_v19, %v397_v12  ;;  %v230_v21 = vpop.f32.mrb[3].mxu0  ;;  %v278_v22 = vadd.f32 %v414_v13, %v266_v16 }
 0x167   :  { %v265_v24 = vadd.f32 %v397_v12, %v230_v21  ;;  %v276_v25 = vadd.f32 %v410_v15, %v264_v18 }
 0x168   :  { %284 = vadd.xlane.f32.xlu1 %v278_v22  ;;  %v279_v27 = vadd.f32 %v415_v23, %v267_v20 }
 0x169   :  { %280 = vadd.xlane.f32.xlu0 %v276_v25  ;;  %v277_v28 = vadd.f32 %v411_v26, %v265_v24 }
 0x16c   :  { %286 = vadd.xlane.f32.xlu1 %v279_v27 }
 0x16d   :  { %282 = vadd.xlane.f32.xlu0 %v277_v28 }
 0x1f5   :  { %v285_v29 = vpop.xlane.xlu1 %284 }
 0x1f6   :  { %v281_v30 = vpop.xlane.xlu0 %280  ;;  %v291_v31 = vmul.f32 0.0078125, %v285_v29 }
 0x1f7   :  { %v289_v32 = vmul.f32 0.0078125, %v281_v30 }
 0x1f8   :  { %v295_v36 = vsub.f32 %v278_v22, %v291_v31 }
 0x1f9   :  { %v293_v33 = vsub.f32 %v276_v25, %v289_v32  ;;  %v287_v34 = vpop.xlane.xlu1 %286 }
 0x1fa   :  { %v283_v35 = vpop.xlane.xlu0 %282  ;;  %v292_v37 = vmul.f32 0.0078125, %v287_v34  ;;  %v299_v42 = vmul.f32 %v295_v36, %v295_v36 }
 0x1fb   :  { %v290_v38 = vmul.f32 0.0078125, %v283_v35  ;;  %v297_v39 = vmul.f32 %v293_v33, %v293_v33 }
 0x1fc   :  { %v296_v41 = vsub.f32 %v279_v27, %v292_v37 }
 0x1fd   :  { %v294_v40 = vsub.f32 %v277_v28, %v290_v38  ;;  %301 = vadd.xlane.f32.xlu0 %v297_v39 }
 0x1fe   :  { %v300_v44 = vmul.f32 %v296_v41, %v296_v41 }
 0x1ff   :  { %v298_v43 = vmul.f32 %v294_v40, %v294_v40 }
 0x201   :  { %305 = vadd.xlane.f32.xlu0 %v299_v42  ;;  %303 = vadd.xlane.f32.xlu1 %v298_v43 }
 0x205   :  { %307 = vadd.xlane.f32.xlu1 %v300_v44 }
 0x28a   :  { %v302_v45 = vpop.xlane.xlu0 %301 }
 0x28b   :  { %v309_v46 = vmul.f32 0.0078125, %v302_v45 }
 0x28d   :  { %v313_v47 = vadd.f32 1e-12, %v309_v46 }
 0x28e   :  { %v304_v48 = vpop.xlane.xlu1 %303  ;;  %v306_v49 = vpop.xlane.xlu0 %305 }
 0x28f   :  { %477 = vrsqrt.f32 %v313_v47  ;;  %v310_v50 = vmul.f32 0.0078125, %v304_v48  ;;  %v311_v51 = vmul.f32 0.0078125, %v306_v49 }
 0x291   :  { %v314_v52 = vadd.f32 1e-12, %v310_v50  ;;  %v315_v53 = vadd.f32 1e-12, %v311_v51 }
 0x292   :  { %v308_v54 = vpop.xlane.xlu1 %307 }
 0x293   :  { %479 = vrsqrt.f32 %v314_v52  ;;  %v312_v55 = vmul.f32 0.0078125, %v308_v54 }
 0x294   :  { %481 = vrsqrt.f32 %v315_v53 }
 0x295   :  { %v316_v56 = vadd.f32 1e-12, %v312_v55 }
 0x297   :  { %483 = vrsqrt.f32 %v316_v56 }
 0x299   :  { %v478_v57 = vpop.eup %477 }
 0x29a   :  { %v321_v58 = vmul.f32 %v478_v57, %v293_v33 }
 0x29c   :  { %v332_v63 = vmul.f32 %v398_v59, %v321_v58 }
 0x29d   :  { %v480_v60 = vpop.eup %479 }
 0x29e   :  { %v482_v61 = vpop.eup %481  ;;  %v322_v62 = vmul.f32 %v480_v60, %v294_v40  ;;  %v343_v6 = vadd.f32 %v399_v1, %v332_v63 }
 0x29f   :  { %v323_v0 = vmul.f32 %v482_v61, %v295_v36 }
 0x2a0   :  { %v333_v2 = vmul.f32 %v398_v59, %v322_v62 }
 0x2a1   :  { %v484_v3 = vpop.eup %483  ;;  %v334_v5 = vmul.f32 %v398_v59, %v323_v0 }
 0x2a2   :  { %v324_v4 = vmul.f32 %v484_v3, %v296_v41  ;;  %v344_v7 = vadd.f32 %v399_v1, %v333_v2 }
 0x2a3   :  { %v345_v10 = vadd.f32 %v399_v1, %v334_v5 }
 0x2a4   :  { %v335_v8 = vmul.f32 %v398_v59, %v324_v4  ;;  %v419_v9 = vpack.c.bf16 %v344_v7, %v343_v6 }
 0x2a6   :  { %v346_v11 = vadd.f32 %v399_v1, %v335_v8  ;;  %420 = vst [vmem:[#allocation14] sm:$0xff] %v419_v9  }
 0x2a8   :  { %v424_v12 = vpack.c.bf16 %v346_v11, %v345_v10 }
 0x2aa   :  { %427 = vst [vmem:[#allocation14 + $0x8] sm:$0xff] %v424_v12  }
 0x2ab   :  { %628 = shalt.err (!%p625_p10)
}
 0x2ac   :  { %s629_s27 = scalar_lea.hbm %s802_s6, 256 }
 0x2ad   :  { %p630_p11 = scmp.ne.s32.totalorder %s802_s6, %s629_s27  ;;  %p633_p12 = scmp.lt.u32.totalorder %s629_s27, %s802_s6 }
 0x2af   :  { %p635_p13 = pnand %p633_p12, %p630_p11 }
 0x2b1   :  { %638 = shalt.err (!%p635_p13)
}
 0x2b2   :  { %378 = dma.vmem_to_hbm [thread:$0]  %s373_s21, 256, %s802_s6, [#allocation5], %s651_s9, %s651_s9, %s652_s10  }
 0x2b3   :  { %647 = dma.done.wait [#allocation5], 256  }
 0x2b4   :  { %648 = vsyncadd [#allocation5], 4294967040 }
 0x2b5   :  { %382 = vsyncpa [#allocation4], 1 }
 0x2b6   :  { %383 = vsyncpa [#allocation7], 1 }
 0x2b7   :  { %384 = vsyncpa [#allocation10], 1 }
 0x2b8   :  { %385 = vsyncpa [#allocation13], 1 }
 0x2b9   :  { %386 = vsyncpa [#allocation5], 1 }

// kernel: stage1_forward.65
= control target key start
LH: loop header
LB: loop body
LE: loop exit
PB: predicated region body
PF: predicated region fallthrough
CT: control target
= control target key end

     0   :  { %s1963_s0 = inlined_call_operand.hbm [shape: bf16[2,16,384], index: 0, kind: input, shape index: {}, may-alias: {0,1,2}]   ;;  %s1964_s1 = inlined_call_operand.hbm [shape: bf16[2,16,384], index: 1, kind: input, shape index: {}, may-alias: {0,1,2}]   ;;  %s1965_s2 = inlined_call_operand.hbm [shape: bf16[2,16,384], index: 2, kind: input, shape index: {}, may-alias: {0,1,2}]   ;;  %s1966_s3 = inlined_call_operand.hbm [shape: bf16[2,16,128], index: 3, kind: output, shape index: {}]  }
   0x1   :  { %1978 = sst [smem:[#allocation18_spill]] %s1963_s0 }
   0x2   :  { %1979 = sst [smem:[#allocation19_spill]] %s1964_s1 }
   0x3   :  { %8 = vsyncpa [#allocation6], 0 }
   0x4   :  { %10 = vsyncpa [#allocation6 + $0x1], 0 }
   0x5   :  { %11 = vsyncpa [#allocation9], 0 }
   0x6   :  { %13 = vsyncpa [#allocation9 + $0x1], 0 }
   0x7   :  { %14 = vsyncpa [#allocation7], 0 }
   0x8   :  { %16 = vsyncpa [#allocation7 + $0x1], 0  ;;  %s1569_s12 = smov 0   ;;  %s1571_s13 = smov 0  }
   0x9   :  { %s1573_s14 = smov 0   ;;  %s1575_s15 = smov 0  }
   0xa   :  { %s1577_s16 = smov 0   ;;  %s1579_s17 = smov 0  }
   0xb LB: > { %1980 = sst [smem:[#allocation15_spill]] %s1530_s16  ;;  %s1600_s18 = sadd.s32 4294967295, %s1534_s17   ;;  %s1534_s17 = sphi %s1579_s17, %s22_s17   ;;  %s1530_s16 = sphi %s1577_s16, %s2003_s16   ;;  %s1526_s15 = sphi %s1575_s15, %s2002_s15   ;;  %s1522_s14 = sphi %s1573_s14, %s2006_s14   ;;  %s1518_s13 = sphi %s1571_s13, %s2005_s13   ;;  %s1514_s12 = sphi %s1569_s12, %s2004_s12  }
   0xc   : > { %s1110_s19 = sadd.s32 4294967294, %s1534_s17   ;;  %s34_s20 = sadd.s32 1, %s1530_s16 }
   0xd   : > { %s43_s21 = sadd.s32 1, %s1522_s14  ;;  %p36_p0 = scmp.ge.s32.totalorder %s34_s20, 2 }
   0xe   : > { %p50_p1 = scmp.ne.s32.totalorder %s1522_s14, %s1518_s13  ;;  %p51_p2 = scmp.eq.s32.totalorder %s1534_s17, 0 }
   0xf   : > { %p56_p3 = scmp.ne.s32.totalorder %s1518_s13, %s1514_s12  ;;  %s2008_s20 = smov (%p36_p0, %s34_s20), 0 }
  0x10   : > { %1981 = sst [smem:[#allocation16_spill]] %s2008_s20  ;;  %p1612_p4 = por %p51_p2, %p50_p1 }
  0x11   : > { %p57_p5 = scmp.eq.s32.totalorder %s1600_s18, 0  ;;  %s38_s23 = ssub.s32 %s1530_s16, %s2008_s20 }
  0x12   : > { %p134_p6 = scmp.eq.s32.totalorder %s1600_s18, 1  ;;  %p41_p7 = scmp.eq.s32.totalorder %s38_s23, 0 }
  0x13   : > { %p1620_p8 = por %p57_p5, %p56_p3  ;;  %p140_p10 = scmp.eq.s32.totalorder %s1110_s19, 1 }
  0x14   : > { %p1624_p9 = por %p134_p6, %p50_p1  ;;  %p1253_p13 = scmp.lt.s32.totalorder %s1534_s17, 2 }
  0x15   : > { %s1983_s24 = scalar_select %p1620_p8, 1, 0 }
  0x16   : > { %s1984_s25 = scalar_select %p1624_p9, 1, 0 }
  0x17   : > { %s1629_s26 = scalar_select %p41_p7, %s1522_s14, %s43_s21  }
  0x18   : > { %p1631_p11 = por %p140_p10, %p56_p3  ;;  %s1967_s28 = sand.u32 1, %s1522_s14  }
  0x19   : > { %1985 = sst [smem:[#allocation17_spill]] %s1629_s26  ;;  %s1640_s29 = sshll.u32 %s1967_s28, 3 }
  0x1a   : > { %s1986_s27 = scalar_select %p1631_p11, 1, 0 }
  0x1b   : > { %s1643_s30 = smul.u32 384, %s1530_s16  ;;  %p1647_p0 = pnand %p1253_p13, %p1612_p4 }
  0x1c   : > { %s184_s5 = sand.u32 1, %s1534_s17   ;;  %s1988_s1 = sld [smem:[#allocation19_spill]] }
  0x1d   : > { %s188_s9 = scalar_lea.vmem [#allocation8], %s1640_s29  ;;  %s1661_s19 = scalar_lea.sflag [#allocation9], %s184_s5 }
  0x1e   : > { %s196_s10 = sshll.u32 %s188_s9, 4  ;;  %p1666_p2 = pneg %p1647_p0  ;;  %s1659_s10 = int_to_ptr.vmem [resolvable:$true] %s196_s10 }
  0x22   : > { %s1018_s8 = scalar_lea.hbm %s1988_s1, %s1643_s30  ;;  %s1361_s7 = scalar_lea.hbm %s1988_s1, 768 }
  0x23   : > { %s1657_s11 = scalar_lea.hbm %s1018_s8, 64  ;;  %s1386_s21 = scalar_lea.hbm %s1018_s8, 192 }
  0x24   : > { %p1357_p1 = scmp.ne.s32.totalorder %s1657_s11, %s1386_s21  ;;  %p1362_p5 = scmp.lt.u32.totalorder %s1657_s11, %s1988_s1 }
  0x25   : > { %p1363_p6 = scmp.lt.u32.totalorder %s1361_s7, %s1386_s21  ;;  %p1365_p10 = scmp.lt.u32.totalorder %s1386_s21, %s1657_s11 }
  0x26   : > { %p1359_p3 = pnand %p1666_p2, %p1357_p1 }
  0x27   : > { %p1364_p7 = por %p1363_p6, %p1362_p5 }
  0x28   : > { %p1360_p4 = pneg %p1359_p3 }
  0x29   : > { %p1366_p13 = por %p1365_p10, %p1364_p7 }
  0x2b   : > { %p1367_p12 = pnand %p1366_p13, %p1360_p4 }
  0x2d   : > { %1370 = shalt.err (!%p1367_p12)
}
  0x2e   : > { %s1371_s5 = scalar_lea.vmem %s1659_s10, 128  ;;  %s1536_s8 = smov [#allocation8]  }
  0x2f   : > { %p1372_p1 = scmp.ne.s32.totalorder %s1659_s10, %s1371_s5  ;;  %s1376_s23 = sshll.u32 %s1536_s8, 4  ;;  %s1377_s23 = int_to_ptr.vmem [resolvable:$false] %s1376_s23 }
  0x30   : > { %s1378_s28 = scalar_lea.vmem %s1377_s23, 256  ;;  %p1379_p9 = scmp.lt.s32.totalorder %s1659_s10, %s1377_s23 }
  0x31   : > { %p1374_p3 = pnand %p1372_p1, %p1666_p2  ;;  %p1380_p8 = scmp.lt.s32.totalorder %s1378_s28, %s1371_s5 }
  0x33   : > { %p1375_p11 = pneg %p1374_p3  ;;  %p1381_p5 = por %p1380_p8, %p1379_p9 }
  0x35   : > { %p1382_p6 = pnand %p1381_p5, %p1375_p11 }
  0x37   : > { %1385 = shalt.err (!%p1382_p6)
}
  0x38   : > { %s1970_s21 = smov 192   ;;  %s1972_s6 = smov 64  }
  0x39   : > { %s1974_s7 = smov 4   ;;  %p1119_p8 = scmp.ge.s32.totalorder %s1534_s17, 1 }
  0x3a   : > { %1245 = dma.hbm_to_vmem [thread:$0]  (!%p1647_p0), %s1657_s11, 128, %s1659_s10, %s1661_s19, %s1970_s21, %s1972_s6, %s1974_s7  }
  0x3b   : > { %p226_p9 = scmp.lt.s32.totalorder %s1534_s17, 3  ;;  %s1991_s0 = sld [smem:[#allocation18_spill]] }
  0x3c   : > { %s164_s28 = scalar_lea.vmem [#allocation5], %s1640_s29  ;;  %s1712_s21 = scalar_lea.hbm %s1965_s2, %s1643_s30 }
  0x3d   : > { %p1695_p11 = pnand %p1119_p8, %p226_p9  ;;  %s174_s1 = sshll.u32 %s164_s28, 4  ;;  %s1706_s1 = int_to_ptr.vmem [resolvable:$true] %s174_s1 }
  0x3e   : > { %s1992_s6 = sand.u32 1, %s1522_s14  }
  0x3f   : > { %s1990_s9 = scalar_select %p1695_p11, 1, 0 }
  0x40   : > { %s1716_s7 = scalar_lea.sflag [#allocation6], %s1992_s6 }
  0x41   : > { %s1703_s23 = scalar_lea.hbm %s1991_s0, %s1643_s30  ;;  %s1392_s16 = scalar_lea.hbm %s1991_s0, 768 }
  0x42   : > { %s1387_s20 = scalar_lea.hbm %s1703_s23, 128  ;;  %p1393_p10 = scmp.lt.u32.totalorder %s1703_s23, %s1991_s0 }
  0x43   : > { %p1388_p12 = scmp.ne.s32.totalorder %s1703_s23, %s1387_s20  ;;  %p1394_p13 = scmp.lt.u32.totalorder %s1392_s16, %s1387_s20 }
  0x44   : > { %p1396_p3 = scmp.lt.u32.totalorder %s1387_s20, %s1703_s23 }
  0x45   : > { %p1390_p4 = pnand %p1388_p12, %p1666_p2  ;;  %p1395_p1 = por %p1394_p13, %p1393_p10 }
  0x47   : > { %p1391_p7 = pneg %p1390_p4  ;;  %p1397_p5 = por %p1396_p3, %p1395_p1 }
  0x49   : > { %p1398_p6 = pnand %p1397_p5, %p1391_p7 }
  0x4b   : > { %1401 = shalt.err (!%p1398_p6)
}
  0x4c   : > { %s1402_s30 = scalar_lea.vmem %s1706_s1, 128  ;;  %s1540_s6 = smov [#allocation5]  }
  0x4d   : > { %p1403_p8 = scmp.ne.s32.totalorder %s1706_s1, %s1402_s30  ;;  %s1407_s10 = sshll.u32 %s1540_s6, 4  ;;  %s1408_s10 = int_to_ptr.vmem [resolvable:$false] %s1407_s10 }
  0x4e   : > { %s1409_s26 = scalar_lea.vmem %s1408_s10, 256  ;;  %p1410_p4 = scmp.lt.s32.totalorder %s1706_s1, %s1408_s10 }
  0x4f   : > { %p1405_p9 = pnand %p1403_p8, %p1666_p2  ;;  %p1411_p11 = scmp.lt.s32.totalorder %s1409_s26, %s1402_s30 }
  0x51   : > { %p1406_p12 = pneg %p1405_p9  ;;  %p1412_p10 = por %p1411_p11, %p1410_p4 }
  0x53   : > { %p1413_p13 = pnand %p1412_p10, %p1406_p12 }
  0x55   : > { %1416 = shalt.err (!%p1413_p13)
}
  0x56   : > { %s1993_s16 = smov 4   ;;  %s1994_s20 = smov 64  }
  0x57   : > { %s1995_s11 = smov 192   ;;  %s1744_s5 = scalar_lea.hbm %s1712_s21, 128 }
  0x58   : > { %1242 = dma.hbm_to_vmem [thread:$0]  (!%p1647_p0), %s1703_s23, 128, %s1706_s1, %s1716_s7, %s1995_s11, %s1994_s20, %s1993_s16  }
  0x59   : > { %s210_s8 = scalar_lea.vmem [#allocation10], %s1640_s29  ;;  %s1447_s30 = scalar_lea.hbm %s1712_s21, 256 }
  0x5a   : > { %s218_s28 = sshll.u32 %s210_s8, 4  ;;  %p1418_p11 = scmp.ne.s32.totalorder %s1744_s5, %s1447_s30  ;;  %s1747_s28 = int_to_ptr.vmem [resolvable:$true] %s218_s28 }
  0x5b   : > { %s1422_s26 = scalar_lea.hbm %s1965_s2, 768  ;;  %p1423_p3 = scmp.lt.u32.totalorder %s1744_s5, %s1965_s2 }
  0x5c   : > { %p1420_p7 = pnand %p1418_p11, %p1666_p2  ;;  %p1424_p5 = scmp.lt.u32.totalorder %s1422_s26, %s1447_s30 }
  0x5d   : > { %p1426_p8 = scmp.lt.u32.totalorder %s1447_s30, %s1744_s5 }
  0x5e   : > { %p1421_p1 = pneg %p1420_p7  ;;  %p1425_p6 = por %p1424_p5, %p1423_p3 }
  0x60   : > { %p1427_p9 = por %p1426_p8, %p1425_p6 }
  0x62   : > { %p1428_p12 = pnand %p1427_p9, %p1421_p1 }
  0x64   : > { %1431 = shalt.err (!%p1428_p12)
}
  0x65   : > { %s1432_s29 = scalar_lea.vmem %s1747_s28, 128  ;;  %s1541_s21 = smov [#allocation10]  }
  0x66   : > { %p1433_p4 = scmp.ne.s32.totalorder %s1747_s28, %s1432_s29  ;;  %s1437_s7 = sshll.u32 %s1541_s21, 4  ;;  %s1438_s7 = int_to_ptr.vmem [resolvable:$false] %s1437_s7 }
  0x67   : > { %s1439_s0 = scalar_lea.vmem %s1438_s7, 256  ;;  %p1440_p11 = scmp.lt.s32.totalorder %s1747_s28, %s1438_s7 }
  0x68   : > { %p1435_p10 = pnand %p1433_p4, %p1666_p2  ;;  %p1441_p7 = scmp.lt.s32.totalorder %s1439_s0, %s1432_s29 }
  0x6a   : > { %p1436_p13 = pneg %p1435_p10  ;;  %p1442_p3 = por %p1441_p7, %p1440_p11 }
  0x6c   : > { %p1443_p5 = pnand %p1442_p3, %p1436_p13 }
  0x6e   : > { %1446 = shalt.err (!%p1443_p5)
}
  0x6f   : > { %1248 = dma.hbm_to_vmem [thread:$0]  (!%p1647_p0), %s1744_s5, 128, %s1747_s28, %s1661_s19, %s1995_s11, %s1994_s20, %s1993_s16  }
  0x70   : > { %p1996_p2 = scmp.ne.s32.totalorder %s1990_s9, 0 }
  0x71   : > { %s1777_s22 = sand.u32 (!%p1996_p2), 1, %s1518_s13   ;;  %p1997_p1 = scmp.ne.s32.totalorder (!%p1996_p2), %s1983_s24, 0 }
  0x72   : > { %230 = sbr.rel (%p1996_p2) target bundleno = 1152 (0x480), region = 32  ;;  %s1780_s23 = sshll.u32 (!%p1996_p2), %s1777_s22, 3 }
  0x73   : > { %s233_s4 = scalar_lea.sflag (!%p1996_p2), [#allocation6], %s1777_s22  ;;  %s1784_s8 = scalar_lea.vmem (!%p1996_p2), [#allocation5], %s1780_s23 }
  0x79   : > { %1501 = dma.done.wait (%p1997_p1), %s233_s4, 128  }
  0x7a   : > { %1503 = vsyncadd (%p1997_p1), %s233_s4, 4294967168  ;;  %s241_s19 = sand.u32 1, %s1600_s18   ;;  %s245_s16 = scalar_lea.vmem [#allocation8], %s1780_s23 }
  0x7b   : > { %s242_s9 = scalar_lea.sflag [#allocation9], %s241_s19 }
  0x7c   : > { %1505 = dma.done.wait (%p1997_p1), %s242_s9, 256  }
  0x7d   : > { %1507 = vsyncadd (%p1997_p1), %s242_s9, 4294967040  ;;  %v1542_v0 = vmov 0.0   ;;  %vm1543_vm0 = vmmov 0   ;;  %v1312_v1 = vld [vmem:[%s245_s16] sm:$0xff]   ;;  %s1544_s18 = smov 96   ;;  %v1314_v3 = vld [vmem:[%s1784_s8] sm:$0xff]  }
  0x7e   : > { %1182 = vmatprep.subr.bf16.mxu0 %v1542_v0  ;;  %1184 = vmatprep.mubr.msk.bf16.mxu0 %vm1543_vm0, %v1542_v0  ;;  %v1313_v2 = vld [vmem:[%s245_s16] sm:$0xff]   ;;  %vm298_vm1 = vcmask 261120   ;;  %s1545_s24 = smov 64   ;;  %v1317_v6 = vld [vmem:[%s1784_s8] sm:$0xff]   ;;  %s1546_s20 = smov 32   ;;  %vm630_vm2 = vcmask 130048  }
  0x7f   : > { %1188 = vmatprep.subr.bf16.mxu1 %v1542_v0  ;;  %1190 = vmatprep.mubr.msk.bf16.mxu1 %vm1543_vm0, %v1542_v0  ;;  %v1315_v4 = vld [vmem:[%s245_s16] sm:$0xff]   ;;  %v1319_v7 = vld [vmem:[%s1784_s8] sm:$0xff]   ;;  %s1841_s11 = scalar_lea.vmem [#allocation10], %s1780_s23  ;;  %vm911_vm3 = vcmask 257024   ;;  %s1889_s5 = scalar_lea.vmem [#allocation11], %s1780_s23  ;;  %vm926_vm4 = vcmask 519424  }
  0x80   : > { %337 = vrot.lane.b32.xlu0 %v1312_v1, %s1544_s18  ;;  %325 = vrot.lane.b32.xlu1 %v1314_v3, %s1544_s18  ;;  %v1316_v5 = vld [vmem:[%s245_s16] sm:$0xff]   ;;  %v1318_v8 = vld [vmem:[%s1784_s8] sm:$0xff]   ;;  %299 = vst.msk [vmem:[#allocation2] sm:$0xff] %vm298_vm1, %v1319_v7  ;;  %vm941_vm5 = vcmask 781824   ;;  %s1165_s28 = sshll.u32 %s1526_s15, 7  ;;  %vm956_vm6 = vcmask 1044224  }
  0x81   : > { %308 = vst.msk [vmem:[#allocation3] sm:$0xff] %vm298_vm1, %v1316_v5  ;;  %v1320_v28 = vld [vmem:[%s1841_s11] sm:$0xff]   ;;  %s975_s30 = sshll.u32 %s1889_s5, 4  ;;  %s1908_s26 = scalar_lea.hbm %s1966_s3, %s1165_s28  ;;  %s1911_s30 = int_to_ptr.vmem [resolvable:$true] %s975_s30 }
  0x82   : > { %317 = vst.msk [vmem:[#allocation4] sm:$0xff] %vm298_vm1, %v1320_v28  ;;  %v1321_v60 = vld [vmem:[%s1841_s11] sm:$0xff]   ;;  %s960_s1 = scalar_lea.sflag [#allocation7], %s1777_s22  ;;  %s1448_s15 = scalar_lea.vmem %s1911_s30, 128 }
  0x83   : > { %p1449_p0 = scmp.ne.s32.totalorder %s1911_s30, %s1448_s15  ;;  %p1998_p6 = scmp.ne.s32.totalorder %s1984_s25, 0 }
  0x84   : > { %373 = vrot.lane.b32.xlu0 %v1313_v2, %s1545_s24  ;;  %409 = vrot.lane.b32.xlu1 %v1315_v4, %s1546_s20  ;;  %s1547_s29 = smov [#allocation11]  }
  0x85   : > { %p1450_p8 = pnand %p1449_p0, %p1998_p6  ;;  %s1452_s21 = sshll.u32 %s1547_s29, 4  ;;  %s1453_s21 = int_to_ptr.vmem [resolvable:$false] %s1452_s21 }
  0x86   : > { %s1454_s7 = scalar_lea.vmem %s1453_s21, 256  ;;  %p1455_p12 = scmp.lt.s32.totalorder %s1911_s30, %s1453_s21 }
  0x87   : > { %v426_v11 = vld [vmem:[#allocation2] sm:$0xff]  ;;  %p1451_p9 = pneg %p1450_p8  ;;  %p1456_p4 = scmp.lt.s32.totalorder %s1454_s7, %s1448_s15 }
  0x88   : > { %361 = vrot.lane.b32.xlu0 %v1317_v6, %s1545_s24  ;;  %397 = vrot.lane.b32.xlu1 %v1318_v8, %s1546_s20  ;;  %v430_v9 = vld [vmem:[#allocation3] sm:$0xff] }
  0x89   : > { %v438_v10 = vsel %vm298_vm1, %v430_v9, 0  ;;  %v723_v8 = vld [vmem:[#allocation4] sm:$0xff]  ;;  %p1457_p10 = por %p1456_p4, %p1455_p12 }
  0x8a   : > { %1183 = vmatpush3.bf16.xpose.msra.mxu0 %v438_v10 }
  0x8b   : > { %1194 = vmatprep.subr.bf16.mxu0 %v1542_v0  ;;  %p1458_p13 = pnand %p1457_p10, %p1451_p9 }
  0x91   : > { %1185 = vmatmul.mubr.msk.bf16.vlgmr.msra.gmra.mrb[0].mxu0 %vm298_vm1, %v426_v11 }
  0x92   : > { %1196 = vmatprep.mubr.msk.bf16.mxu0 %vm1543_vm0, %v1542_v0 }
  0xf2   : > { %v338_v12 = vpop.permute.xlu0 %337  ;;  %v326_v13 = vpop.permute.xlu1 %325 }
  0xf3   : > { %341 = vst.msk [vmem:[#allocation3 + $0x8] sm:$0xff] %vm298_vm1, %v338_v12  ;;  %329 = vst.msk [vmem:[#allocation2 + $0x8] sm:$0xff] %vm298_vm1, %v326_v13 }
  0xf6   : > { %v374_v14 = vpop.permute.xlu0 %373  ;;  %v410_v15 = vpop.permute.xlu1 %409 }
  0xf7   : > { %377 = vst.msk [vmem:[#allocation3 + $0x10] sm:$0xff] %vm298_vm1, %v374_v14  ;;  %413 = vst.msk [vmem:[#allocation3 + $0x18] sm:$0xff] %vm298_vm1, %v410_v15 }
  0xfa   : > { %v431_v16 = vld [vmem:[#allocation3 + $0x8] sm:$0xff]  ;;  %v362_v17 = vpop.permute.xlu0 %361  ;;  %v398_v19 = vpop.permute.xlu1 %397 }
  0xfb   : > { %v485_v18 = vsel %vm298_vm1, %v431_v16, 0  ;;  %365 = vst.msk [vmem:[#allocation2 + $0x10] sm:$0xff] %vm298_vm1, %v362_v17  ;;  %401 = vst.msk [vmem:[#allocation2 + $0x18] sm:$0xff] %vm298_vm1, %v398_v19  ;;  %v427_v24 = vld [vmem:[#allocation2 + $0x8] sm:$0xff] }
  0xfc   : > { %1189 = vmatpush3.bf16.xpose.msra.mxu1 %v485_v18 }
  0xfd   : > { %1200 = vmatprep.subr.bf16.mxu1 %v1542_v0 }
  0xfe   : > { %v432_v20 = vld [vmem:[#allocation3 + $0x10] sm:$0xff]  ;;  %v433_v22 = vld [vmem:[#allocation3 + $0x18] sm:$0xff] }
  0xff   : > { %v532_v21 = vsel %vm298_vm1, %v432_v20, 0  ;;  %v579_v23 = vsel %vm298_vm1, %v433_v22, 0 }
 0x100   : > { %1195 = vmatpush3.bf16.xpose.msra.mxu0 %v532_v21 }
 0x101   : > { %1206 = vmatprep.subr.bf16.mxu0 %v1542_v0 }
 0x102   : > { %v428_v25 = vld [vmem:[#allocation2 + $0x10] sm:$0xff]  ;;  %v429_v26 = vld [vmem:[#allocation2 + $0x18] sm:$0xff] }
 0x103   : > { %1191 = vmatmul.mubr.msk.bf16.vlgmr.msra.gmra.mrb[0].mxu1 %vm298_vm1, %v427_v24 }
 0x104   : > { %1201 = vmatpush3.bf16.xpose.msra.mxu1 %v579_v23  ;;  %1202 = vmatprep.mubr.msk.bf16.mxu1 %vm1543_vm0, %v1542_v0 }
 0x105   : > { %1212 = vmatprep.subr.bf16.mxu1 %v1542_v0 }
 0x107   : > { %1197 = vmatmul.mubr.msk.bf16.vlgmr.msra.gmra.mrb[4].mxu0 %vm298_vm1, %v428_v25 }
 0x108   : > { %1208 = vmatprep.mubr.msk.bf16.mxu0 %vm1543_vm0, %v1542_v0  ;;  %1207 = vmatpush3.bf16.msra.mxu0 %v723_v8 }
 0x109   : > { %1218 = vmatprep.subr.bf16.mxu0 %v1542_v0 }
 0x10b   : > { %1203 = vmatmul.mubr.msk.bf16.vlgmr.msra.gmra.mrb[4].mxu1 %vm298_vm1, %v429_v26 }
 0x10c   : > { %1214 = vmatprep.mubr.msk.bf16.mxu1 %vm1543_vm0, %v1542_v0 }
 0x164   : > { %v474_v27 = vpop.f32.mrb[0].mxu0 }
 0x165   : > { %v622_v29 = vmul.f32 0.17677669, %v474_v27  ;;  %v1186_v30 = vpop.f32.mrb[1].mxu0 }
 0x166   : > { %v477_v31 = vpop.f32.mrb[2].mxu0 }
 0x167   : > { %v623_v32 = vmul.f32 0.17677669, %v477_v31  ;;  %v631_v33 = vsel %vm630_vm2, %v622_v29, -inf  ;;  %v1187_v34 = vpop.f32.mrb[3].mxu0 }
 0x168   : > { %632 = vmax.xlane.f32.xlu0 %v631_v33 }
 0x169   : > { %v634_v35 = vsel %vm630_vm2, %v623_v32, -inf }
 0x16a   : > { %635 = vmax.xlane.f32.xlu1 %v634_v35 }
 0x1d6   : > { %v521_v36 = vpop.f32.mrb[0].mxu1 }
 0x1d7   : > { %v624_v37 = vmul.f32 0.17677669, %v521_v36  ;;  %v1192_v38 = vpop.f32.mrb[1].mxu1 }
 0x1d8   : > { %v524_v39 = vpop.f32.mrb[2].mxu1 }
 0x1d9   : > { %v625_v40 = vmul.f32 0.17677669, %v524_v39  ;;  %v1193_v41 = vpop.f32.mrb[3].mxu1  ;;  %v637_v42 = vsel %vm630_vm2, %v624_v37, -inf }
 0x1da   : > { %638 = vmax.xlane.f32.xlu0 %v637_v42  ;;  %v568_v43 = vpop.f32.mrb[4].mxu0  ;;  %v1322_v41 = vld [vmem:[%s1841_s11] sm:$0xff]  }
 0x1db   : > { %v626_v44 = vmul.f32 0.17677669, %v568_v43  ;;  %v1198_v45 = vpop.f32.mrb[5].mxu0  ;;  %v640_v49 = vsel %vm630_vm2, %v625_v40, -inf  ;;  %v1323_v42 = vld [vmem:[%s1841_s11] sm:$0xff]  }
 0x1dc   : > { %v571_v46 = vpop.f32.mrb[6].mxu0 }
 0x1dd   : > { %v627_v47 = vmul.f32 0.17677669, %v571_v46  ;;  %v1199_v48 = vpop.f32.mrb[7].mxu0  ;;  %v643_v50 = vsel %vm630_vm2, %v626_v44, -inf }
 0x1de   : > { %v615_v51 = vpop.f32.mrb[4].mxu1  ;;  %641 = vmax.xlane.f32.xlu0 %v640_v49  ;;  %644 = vmax.xlane.f32.xlu1 %v643_v50 }
 0x1df   : > { %v628_v52 = vmul.f32 0.17677669, %v615_v51  ;;  %v1204_v53 = vpop.f32.mrb[5].mxu1  ;;  %v646_v58 = vsel %vm630_vm2, %v627_v47, -inf }
 0x1e0   : > { %v618_v54 = vpop.f32.mrb[6].mxu1 }
 0x1e1   : > { %v629_v55 = vmul.f32 0.17677669, %v618_v54  ;;  %v1205_v56 = vpop.f32.mrb[7].mxu1  ;;  %v649_v57 = vsel %vm630_vm2, %v628_v52, -inf }
 0x1e2   : > { %650 = vmax.xlane.f32.xlu1 %v649_v57  ;;  %647 = vmax.xlane.f32.xlu0 %v646_v58 }
 0x1e3   : > { %v652_v59 = vsel %vm630_vm2, %v629_v55, -inf }
 0x1e6   : > { %653 = vmax.xlane.f32.xlu0 %v652_v59 }
 0x1f3   : > { %349 = vrot.lane.b32.xlu1 %v1321_v60, %s1544_s18 }
 0x1f5   : > { %v633_v1 = vpop.xlane.xlu0 %632 }
 0x1f6   : > { %v655_v2 = vsub.f32 %v622_v29, %v633_v1 }
 0x1f7   : > { %v636_v61 = vpop.xlane.xlu1 %635 }
 0x1f8   : > { %v656_v62 = vsub.f32 %v623_v32, %v636_v61  ;;  %v663_v3 = vmul.f32 1.442695, %v655_v2 }
 0x1fa   : > { %v665_v63 = vmul.f32 1.442695, %v656_v62 }
 0x1fc   : > { %1324 = vpow2.f32 %v665_v63 }
 0x1fd   : > { %1326 = vpow2.f32 %v663_v3 }
 0x206   : > { %v1855_v4 = vpop.eup %1324 }
 0x207   : > { %v682_v5 = vsel %vm630_vm2, %v1855_v4, 0.0  ;;  %v1859_v6 = vpop.eup %1326 }
 0x208   : > { %683 = vadd.xlane.f32.xlu0 %v682_v5  ;;  %v679_v7 = vsel %vm630_vm2, %v1859_v6, 0.0 }
 0x217   : > { %680 = vadd.xlane.f32.xlu1 %v679_v7 }
 0x267   : > { %v639_v9 = vpop.xlane.xlu0 %638 }
 0x268   : > { %v657_v10 = vsub.f32 %v624_v37, %v639_v9 }
 0x26a   : > { %v667_v11 = vmul.f32 1.442695, %v657_v10 }
 0x26b   : > { %v642_v12 = vpop.xlane.xlu0 %641  ;;  %v645_v13 = vpop.xlane.xlu1 %644 }
 0x26c   : > { %1328 = vpow2.f32 %v667_v11  ;;  %v658_v14 = vsub.f32 %v625_v40, %v642_v12  ;;  %v659_v15 = vsub.f32 %v626_v44, %v645_v13 }
 0x26e   : > { %v669_v16 = vmul.f32 1.442695, %v658_v14  ;;  %v671_v17 = vmul.f32 1.442695, %v659_v15 }
 0x26f   : > { %v651_v18 = vpop.xlane.xlu1 %650  ;;  %v648_v19 = vpop.xlane.xlu0 %647 }
 0x270   : > { %1330 = vpow2.f32 %v669_v16  ;;  %v661_v20 = vsub.f32 %v628_v52, %v651_v18  ;;  %v660_v21 = vsub.f32 %v627_v47, %v648_v19 }
 0x271   : > { %1332 = vpow2.f32 %v671_v17 }
 0x272   : > { %v675_v22 = vmul.f32 1.442695, %v661_v20  ;;  %v673_v23 = vmul.f32 1.442695, %v660_v21 }
 0x273   : > { %v654_v24 = vpop.xlane.xlu0 %653  ;;  %v350_v25 = vpop.permute.xlu1 %349 }
 0x274   : > { %1334 = vpow2.f32 %v675_v22  ;;  %v662_v26 = vsub.f32 %v629_v55, %v654_v24  ;;  %353 = vst.msk [vmem:[#allocation4 + $0x8] sm:$0xff] %vm298_vm1, %v350_v25 }
 0x275   : > { %1336 = vpow2.f32 %v673_v23 }
 0x276   : > { %v1329_v27 = vpop.eup %1328  ;;  %v677_v28 = vmul.f32 1.442695, %v662_v26 }
 0x277   : > { %v685_v29 = vsel %vm630_vm2, %v1329_v27, 0.0 }
 0x278   : > { %1338 = vpow2.f32 %v677_v28  ;;  %686 = vadd.xlane.f32.xlu1 %v685_v29 }
 0x27a   : > { %v1331_v30 = vpop.eup %1330 }
 0x27b   : > { %v1333_v31 = vpop.eup %1332  ;;  %v688_v32 = vsel %vm630_vm2, %v1331_v30, 0.0  ;;  %v724_v33 = vld [vmem:[#allocation4 + $0x8] sm:$0xff] }
 0x27c   : > { %v691_v34 = vsel %vm630_vm2, %v1333_v31, 0.0  ;;  %689 = vadd.xlane.f32.xlu0 %v688_v32  ;;  %1213 = vmatpush3.bf16.msra.mxu1 %v724_v33 }
 0x27d   : > { %692 = vadd.xlane.f32.xlu1 %v691_v34  ;;  %1224 = vmatprep.subr.bf16.mxu1 %v1542_v0 }
 0x27e   : > { %v1335_v35 = vpop.eup %1334 }
 0x27f   : > { %v1337_v36 = vpop.eup %1336  ;;  %v697_v37 = vsel %vm630_vm2, %v1335_v35, 0.0 }
 0x280   : > { %v694_v38 = vsel %vm630_vm2, %v1337_v36, 0.0 }
 0x281   : > { %698 = vadd.xlane.f32.xlu1 %v697_v37  ;;  %695 = vadd.xlane.f32.xlu0 %v694_v38 }
 0x282   : > { %v1339_v39 = vpop.eup %1338 }
 0x283   : > { %v700_v40 = vsel %vm630_vm2, %v1339_v39, 0.0 }
 0x285   : > { %701 = vadd.xlane.f32.xlu0 %v700_v40 }
 0x292   : > { %421 = vrot.lane.b32.xlu1 %v1322_v41, %s1546_s20 }
 0x295   : > { %v684_v43 = vpop.xlane.xlu0 %683 }
 0x296   : > { %1340 = vrcp.f32 %v684_v43 }
 0x29b   : > { %385 = vrot.lane.b32.xlu0 %v1323_v42, %s1545_s24 }
 0x2a0   : > { %v1341_v45 = vpop.eup %1340 }
 0x2a1   : > { %v712_v47 = vmul.f32 %v1341_v45, %v1855_v4 }
 0x2a4   : > { %v681_v44 = vpop.xlane.xlu1 %680 }
 0x2a5   : > { %1342 = vrcp.f32 %v681_v44 }
 0x2af   : > { %v1343_v46 = vpop.eup %1342 }
 0x2b0   : > { %v711_v48 = vmul.f32 %v1343_v46, %v1859_v6 }
 0x2b2   : > { %v719_v49 = vpack.c.bf16 %v712_v47, %v711_v48 }
 0x2b4   : > { %1209 = vmatmul.mubr.msk.bf16.vlgmr.msra.gmra.mrb[8].mxu0 %vm630_vm2, %v719_v49 }
 0x2b5   : > { %1220 = vmatprep.mubr.msk.bf16.mxu0 %vm1543_vm0, %v1542_v0 }
 0x305   : > { %v687_v50 = vpop.xlane.xlu1 %686 }
 0x306   : > { %1344 = vrcp.f32 %v687_v50 }
 0x309   : > { %v690_v51 = vpop.xlane.xlu0 %689 }
 0x30a   : > { %v693_v52 = vpop.xlane.xlu1 %692  ;;  %1346 = vrcp.f32 %v690_v51 }
 0x30b   : > { %1348 = vrcp.f32 %v693_v52 }
 0x30e   : > { %v699_v53 = vpop.xlane.xlu1 %698  ;;  %v696_v54 = vpop.xlane.xlu0 %695 }
 0x30f   : > { %1350 = vrcp.f32 %v696_v54 }
 0x310   : > { %1352 = vrcp.f32 %v699_v53  ;;  %v1345_v55 = vpop.eup %1344 }
 0x311   : > { %v713_v59 = vmul.f32 %v1345_v55, %v1329_v27 }
 0x312   : > { %v702_v56 = vpop.xlane.xlu0 %701  ;;  %v422_v57 = vpop.permute.xlu1 %421 }
 0x313   : > { %1354 = vrcp.f32 %v702_v56  ;;  %425 = vst.msk [vmem:[#allocation4 + $0x18] sm:$0xff] %vm298_vm1, %v422_v57 }
 0x314   : > { %v1347_v58 = vpop.eup %1346 }
 0x315   : > { %v714_v60 = vmul.f32 %v1347_v58, %v1331_v30  ;;  %v1349_v63 = vpop.eup %1348 }
 0x316   : > { %v386_v61 = vpop.permute.xlu0 %385  ;;  %v715_v6 = vmul.f32 %v1349_v63, %v1333_v31 }
 0x317   : > { %389 = vst.msk [vmem:[#allocation4 + $0x10] sm:$0xff] %vm298_vm1, %v386_v61  ;;  %v720_v62 = vpack.c.bf16 %v714_v60, %v713_v59 }
 0x319   : > { %1215 = vmatmul.mubr.msk.bf16.vlgmr.msra.gmra.mrb[8].mxu1 %vm630_vm2, %v720_v62  ;;  %v1351_v1 = vpop.eup %1350 }
 0x31a   : > { %v726_v2 = vld [vmem:[#allocation4 + $0x18] sm:$0xff]  ;;  %1226 = vmatprep.mubr.msk.bf16.mxu1 %vm1543_vm0, %v1542_v0  ;;  %v1353_v3 = vpop.eup %1352  ;;  %v716_v4 = vmul.f32 %v1351_v1, %v1337_v36 }
 0x31b   : > { %1225 = vmatpush3.bf16.msra.mxu1 %v726_v2  ;;  %v717_v7 = vmul.f32 %v1353_v3, %v1335_v35 }
 0x31c   : > { %v721_v10 = vpack.c.bf16 %v716_v4, %v715_v6 }
 0x31d   : > { %v1355_v5 = vpop.eup %1354 }
 0x31e   : > { %v718_v8 = vmul.f32 %v1355_v5, %v1339_v39  ;;  %v725_v9 = vld [vmem:[#allocation4 + $0x10] sm:$0xff] }
 0x31f   : > { %1219 = vmatpush3.bf16.msra.mxu0 %v725_v9 }
 0x320   : > { %v722_v11 = vpack.c.bf16 %v718_v8, %v717_v7 }
 0x322   : > { %1221 = vmatmul.mubr.msk.bf16.vlgmr.msra.gmra.mrb[12].mxu0 %vm630_vm2, %v721_v10  ;;  %1227 = vmatmul.mubr.msk.bf16.vlgmr.msra.gmra.mrb[12].mxu1 %vm630_vm2, %v722_v11 }
 0x387   : > { %v764_v12 = vpop.f32.mrb[8].mxu0 }
 0x388   : > { %v1157_v13 = vpack.c.bf16 %v764_v12, %v764_v12  ;;  %v1210_v0 = vpop.f32.mrb[9].mxu0 }
 0x389   : > { %v767_v14 = vpop.f32.mrb[10].mxu0 }
 0x38a   : > { %912 = vst.msk [vmem:[%s1889_s5] sm:$0xf] %vm911_vm3, %v1157_v13  ;;  %v1158_v15 = vpack.c.bf16 %v767_v14, %v767_v14  ;;  %v1211_v16 = vpop.f32.mrb[11].mxu0 }
 0x38c   : > { %913 = vst.msk [vmem:[%s1889_s5 + $0x4] sm:$0xf] %vm911_vm3, %v1158_v15 }
 0x3ec   : > { %v808_v17 = vpop.f32.mrb[8].mxu1 }
 0x3ed   : > { %v1159_v18 = vpack.c.bf16 %v808_v17, %v808_v17  ;;  %v1216_v19 = vpop.f32.mrb[9].mxu1 }
 0x3ee   : > { %v811_v20 = vpop.f32.mrb[10].mxu1 }
 0x3ef   : > { %v1160_v21 = vpack.c.bf16 %v811_v20, %v811_v20  ;;  %920 = vrot.lane.b32.xlu1 %v1159_v18, %s1546_s20  ;;  %v1217_v22 = vpop.f32.mrb[11].mxu1 }
 0x3f1   : > { %922 = vrot.lane.b32.xlu0 %v1160_v21, %s1546_s20 }
 0x3f5   : > { %v852_v23 = vpop.f32.mrb[12].mxu0  ;;  %v896_v24 = vpop.f32.mrb[12].mxu1 }
 0x3f6   : > { %v1161_v25 = vpack.c.bf16 %v852_v23, %v852_v23  ;;  %v1222_v26 = vpop.f32.mrb[13].mxu0  ;;  %v1228_v27 = vpop.f32.mrb[13].mxu1  ;;  %v1163_v33 = vpack.c.bf16 %v896_v24, %v896_v24 }
 0x3f7   : > { %v855_v28 = vpop.f32.mrb[14].mxu0  ;;  %v899_v29 = vpop.f32.mrb[14].mxu1 }
 0x3f8   : > { %v1162_v30 = vpack.c.bf16 %v855_v28, %v855_v28  ;;  %v1229_v31 = vpop.f32.mrb[15].mxu1  ;;  %935 = vrot.lane.b32.xlu1 %v1161_v25, %s1545_s24  ;;  %v1223_v32 = vpop.f32.mrb[15].mxu0  ;;  %v1164_v34 = vpack.c.bf16 %v899_v29, %v899_v29 }
 0x3fa   : > { %937 = vrot.lane.b32.xlu0 %v1162_v30, %s1545_s24 }
 0x3fc   : > { %950 = vrot.lane.b32.xlu1 %v1163_v33, %s1544_s18 }
 0x3fe   : > { %952 = vrot.lane.b32.xlu0 %v1164_v34, %s1544_s18 }
 0x461   : > { %v921_v35 = vpop.permute.xlu1 %920 }
 0x462   : > { %927 = vst.msk [vmem:[%s1889_s5] sm:$0xf] %vm926_vm4, %v921_v35 }
 0x463   : > { %v923_v36 = vpop.permute.xlu0 %922 }
 0x464   : > { %928 = vst.msk [vmem:[%s1889_s5 + $0x4] sm:$0xf] %vm926_vm4, %v923_v36 }
 0x46a   : > { %v936_v37 = vpop.permute.xlu1 %935 }
 0x46b   : > { %942 = vst.msk [vmem:[%s1889_s5] sm:$0xf] %vm941_vm5, %v936_v37 }
 0x46c   : > { %v938_v38 = vpop.permute.xlu0 %937 }
 0x46d   : > { %943 = vst.msk [vmem:[%s1889_s5 + $0x4] sm:$0xf] %vm941_vm5, %v938_v38 }
 0x46e   : > { %v951_v39 = vpop.permute.xlu1 %950 }
 0x46f   : > { %957 = vst.msk [vmem:[%s1889_s5] sm:$0xf] %vm956_vm6, %v951_v39 }
 0x470   : > { %v953_v40 = vpop.permute.xlu0 %952 }
 0x471   : > { %958 = vst.msk [vmem:[%s1889_s5 + $0x4] sm:$0xf] %vm956_vm6, %v953_v40 }
 0x472   : > { %1461 = shalt.err (!%p1458_p13)
}
 0x473   : > { %s1462_s0 = scalar_lea.hbm %s1908_s26, 128  ;;  %s1466_s8 = scalar_lea.hbm %s1966_s3, 256 }
 0x474   : > { %p1463_p11 = scmp.ne.s32.totalorder %s1908_s26, %s1462_s0  ;;  %p1467_p5 = scmp.lt.u32.totalorder %s1908_s26, %s1966_s3 }
 0x475   : > { %p1468_p2 = scmp.lt.u32.totalorder %s1466_s8, %s1462_s0  ;;  %p1470_p0 = scmp.lt.u32.totalorder %s1462_s0, %s1908_s26 }
 0x476   : > { %p1464_p7 = pnand %p1463_p11, %p1998_p6 }
 0x477   : > { %p1469_p1 = por %p1468_p2, %p1467_p5 }
 0x478   : > { %p1465_p3 = pneg %p1464_p7 }
 0x479   : > { %p1471_p8 = por %p1470_p0, %p1469_p1 }
 0x47b   : > { %p1472_p9 = pnand %p1471_p8, %p1465_p3 }
 0x47d   : > { %1475 = shalt.err (!%p1472_p9)
}
 0x47e   : > { %s1548_s16 = smov 4  }
 0x47f   : > { %1237 = dma.vmem_to_hbm [thread:$0]  (%p1998_p6), %s1911_s30, 128, %s1908_s26, %s960_s1, %s1545_s24, %s1545_s24, %s1548_s16  }
 0x480 PF: > { %s990_s18 = sand.u32 1, %s1514_s12   ;;  %p1999_p12 = scmp.ne.s32.totalorder %s1986_s27, 0 }
 0x481   : > { %p2000_p4 = scmp.ge.s32.totalorder %s1534_s17, 2  ;;  %s991_s20 = scalar_lea.sflag [#allocation7], %s990_s18 }
 0x483   : > { %p1250_p10 = pnand %p2000_p4, %p1999_p12 }
 0x485   : > { %1509 = dma.done.wait (!%p1250_p10), %s991_s20, 128  }
 0x486   : > { %1511 = vsyncadd (!%p1250_p10), %s991_s20, 4294967168  ;;  %s22_s17 = sadd.s32 1, %s1534_s17   ;;  %s2001_s25 = sld [smem:[#allocation17_spill]] }
 0x487   : > { %p19_p13 = scmp.ge.s32.totalorder %s22_s17, 4   ;;  %s2002_s15 = sld [smem:[#allocation15_spill]] }
 0x488   : > { %s2003_s16 = sld [smem:[#allocation16_spill]]  ;;  %s2004_s12 = smov %s1518_s13 }
 0x489   : > { %s2005_s13 = smov %s1522_s14  ;;  %21 = sbr.rel (!%p19_p13) target bundleno = 11 (0xb), region = 110 }
 0x48c   : > { %s2006_s14 = smov %s2001_s25 }
 0x490   :  { %996 = vsyncpa [#allocation6], 1 }
 0x491   :  { %998 = vsyncpa [#allocation6 + $0x1], 1 }
 0x492   :  { %999 = vsyncpa [#allocation9], 1 }
 0x493   :  { %1001 = vsyncpa [#allocation9 + $0x1], 1 }
 0x494   :  { %1002 = vsyncpa [#allocation7], 1 }
 0x495   :  { %1004 = vsyncpa [#allocation7 + $0x1], 1 }

// kernel: stage1_forward.67
= control target key start
LH: loop header
LB: loop body
LE: loop exit
PB: predicated region body
PF: predicated region fallthrough
CT: control target
= control target key end

     0   :  { %8 = vsyncpa [#allocation4], 0  ;;  %s1165_s0 = inlined_call_operand.hbm [shape: bf16[32,128], index: 0, kind: input, shape index: {}]   ;;  %s1166_s1 = inlined_call_operand.hbm [shape: bf16[128,512], index: 1, kind: input, shape index: {}]   ;;  %s1167_s2 = inlined_call_operand.hbm [shape: f32[1,512], index: 2, kind: input, shape index: {}]   ;;  %s1168_s3 = inlined_call_operand.hbm [shape: bf16[32,512], index: 3, kind: output, shape index: {}]  }
   0x1   :  { %9 = vsyncpa [#allocation7], 0 }
   0x2   :  { %10 = vsyncpa [#allocation5], 0  ;;  %s947_s12 = smov [#allocation6]   ;;  %s853_s16 = scalar_lea.hbm %s1166_s1, 4096 }
   0x3   :  { %s28_s13 = sshll.u32 %s947_s12, 4  ;;  %p854_p0 = scmp.ne.s32.totalorder %s1166_s1, %s853_s16  ;;  %s29_s13 = int_to_ptr.vmem [resolvable:$true] %s28_s13 }
   0x4   :  { %p857_p1 = scmp.lt.u32.totalorder %s853_s16, %s1166_s1 }
   0x6   :  { %p859_p2 = pnand %p857_p1, %p854_p0 }
   0x8   :  { %862 = shalt.err (!%p859_p2)
}
   0x9   :  { %s863_s21 = scalar_lea.vmem %s29_s13, 4096  ;;  %p868_p4 = scmp.lt.s32.totalorder %s29_s13, %s29_s13 }
   0xa   :  { %p864_p3 = scmp.ne.s32.totalorder %s29_s13, %s863_s21  ;;  %p869_p5 = scmp.lt.s32.totalorder %s863_s21, %s863_s21 }
   0xc   :  { %p870_p6 = por %p869_p5, %p868_p4 }
   0xe   :  { %p871_p7 = pnand %p870_p6, %p864_p3 }
  0x10   :  { %874 = shalt.err (!%p871_p7)
}
  0x11   :  { %s948_s22 = smov 256   ;;  %s949_s23 = smov 16  }
  0x12   :  { %34 = dma.hbm_to_vmem [thread:$0]  %s1166_s1, 4096, %s29_s13, [#allocation7], %s948_s22, %s948_s22, %s949_s23  }
  0x13   :  { %s950_s26 = smov [#allocation3]   ;;  %s875_s30 = scalar_lea.hbm %s1165_s0, 256 }
  0x14   :  { %s16_s27 = sshll.u32 %s950_s26, 4  ;;  %p876_p8 = scmp.ne.s32.totalorder %s1165_s0, %s875_s30  ;;  %s17_s27 = int_to_ptr.vmem [resolvable:$true] %s16_s27 }
  0x15   :  { %p879_p9 = scmp.lt.u32.totalorder %s875_s30, %s1165_s0 }
  0x17   :  { %p881_p10 = pnand %p879_p9, %p876_p8 }
  0x19   :  { %884 = shalt.err (!%p881_p10)
}
  0x1a   :  { %s885_s8 = scalar_lea.vmem %s17_s27, 256  ;;  %p890_p12 = scmp.lt.s32.totalorder %s17_s27, %s17_s27 }
  0x1b   :  { %p886_p11 = scmp.ne.s32.totalorder %s17_s27, %s885_s8  ;;  %p891_p13 = scmp.lt.s32.totalorder %s885_s8, %s885_s8 }
  0x1d   :  { %p892_p0 = por %p891_p13, %p890_p12 }
  0x1f   :  { %p893_p1 = pnand %p892_p0, %p886_p11 }
  0x21   :  { %896 = shalt.err (!%p893_p1)
}
  0x22   :  { %s951_s1 = smov 64   ;;  %s952_s9 = smov 4  }
  0x23   :  { %22 = dma.hbm_to_vmem [thread:$0]  %s1165_s0, 256, %s17_s27, [#allocation4], %s951_s1, %s951_s1, %s952_s9  }
  0x24   :  { %s953_s12 = smov [#allocation8]   ;;  %s897_s16 = scalar_lea.hbm %s1167_s2, 64 }
  0x25   :  { %s41_s13 = sshll.u32 %s953_s12, 4  ;;  %p898_p2 = scmp.ne.s32.totalorder %s1167_s2, %s897_s16  ;;  %s42_s13 = int_to_ptr.vmem [resolvable:$true] %s41_s13 }
  0x26   :  { %p901_p3 = scmp.lt.u32.totalorder %s897_s16, %s1167_s2 }
  0x28   :  { %p903_p4 = pnand %p901_p3, %p898_p2 }
  0x2a   :  { %906 = shalt.err (!%p903_p4)
}
  0x2b   :  { %s907_s21 = scalar_lea.vmem %s42_s13, 64  ;;  %p912_p6 = scmp.lt.s32.totalorder %s42_s13, %s42_s13 }
  0x2c   :  { %p908_p5 = scmp.ne.s32.totalorder %s42_s13, %s907_s21  ;;  %p913_p7 = scmp.lt.s32.totalorder %s907_s21, %s907_s21 }
  0x2e   :  { %p914_p8 = por %p913_p7, %p912_p6 }
  0x30   :  { %p915_p9 = pnand %p914_p8, %p908_p5 }
  0x32   :  { %918 = shalt.err (!%p915_p9)
}
  0x33   :  { %44 = dma.hbm_to_vmem [thread:$0]  %s1167_s2, 64, %s42_s13, [#allocation7]  }
  0x34   :  { %941 = dma.done.wait [#allocation4], 256  }
  0x35   :  { %942 = vsyncadd [#allocation4], 4294967040 }
  0x36   :  { %943 = dma.done.wait [#allocation7], 4160  }
  0x37   :  { %944 = vsyncadd [#allocation7], 4294963136  ;;  %v954_v0 = vmov 0   ;;  %v771_v1 = vld [vmem:[#allocation6 + $0x4] ss:$16 sps:$4 sm:$0xff]   ;;  %v820_v34 = vld [vmem:[#allocation3 + $0x8] sm:$0xff]   ;;  %v458_v35 = vlaneseq }
  0x38   :  { %331 = vmatprep.mubr.bf16.mxu0 %v954_v0  ;;  %384 = vmatprep.mubr.bf16.mxu1 %v954_v0  ;;  %v773_v2 = vld [vmem:[#allocation6 + $0xc] ss:$16 sps:$4 sm:$0xff]   ;;  %v775_v3 = vld [vmem:[#allocation6] ss:$16 sps:$4 sm:$0xff]   ;;  %v776_v4 = vld [vmem:[#allocation6 + $0x8] ss:$16 sps:$4 sm:$0xff]  }
  0x39   :  { %299 = vmatprep.subr.bf16.mxu0 %v771_v1  ;;  %352 = vmatprep.subr.bf16.mxu1 %v773_v2  ;;  %v777_v5 = vld [vmem:[#allocation6 + $0x24] ss:$16 sps:$4 sm:$0xff]   ;;  %v779_v6 = vld [vmem:[#allocation6 + $0x2c] ss:$16 sps:$4 sm:$0xff]   ;;  %v781_v7 = vld [vmem:[#allocation6 + $0x20] ss:$16 sps:$4 sm:$0xff]  }
  0x3a   :  { %300 = vmatpush1.bf16.msra.mxu0 %v775_v3  ;;  %353 = vmatpush1.bf16.msra.mxu1 %v776_v4  ;;  %v782_v8 = vld [vmem:[#allocation6 + $0x28] ss:$16 sps:$4 sm:$0xff]   ;;  %v783_v9 = vld [vmem:[#allocation6 + $0x44] ss:$16 sps:$4 sm:$0xff]   ;;  %v785_v10 = vld [vmem:[#allocation6 + $0x4c] ss:$16 sps:$4 sm:$0xff]  }
  0x3b   :  { %301 = vmatprep.subr.bf16.mxu0 %v777_v5  ;;  %354 = vmatprep.subr.bf16.mxu1 %v779_v6  ;;  %v787_v11 = vld [vmem:[#allocation6 + $0x40] ss:$16 sps:$4 sm:$0xff]   ;;  %v788_v12 = vld [vmem:[#allocation6 + $0x48] ss:$16 sps:$4 sm:$0xff]   ;;  %v789_v13 = vld [vmem:[#allocation6 + $0x64] ss:$16 sps:$4 sm:$0xff]  }
  0x3c   :  { %v791_v14 = vld [vmem:[#allocation6 + $0x6c] ss:$16 sps:$4 sm:$0xff]   ;;  %v793_v15 = vld [vmem:[#allocation6 + $0x60] ss:$16 sps:$4 sm:$0xff]   ;;  %v794_v16 = vld [vmem:[#allocation6 + $0x68] ss:$16 sps:$4 sm:$0xff]  }
  0x3d   :  { %v795_v17 = vld [vmem:[#allocation6 + $0x84] ss:$16 sps:$4 sm:$0xff]   ;;  %v797_v18 = vld [vmem:[#allocation6 + $0x8c] ss:$16 sps:$4 sm:$0xff]   ;;  %v799_v19 = vld [vmem:[#allocation6 + $0x80] ss:$16 sps:$4 sm:$0xff]  }
  0x3e   :  { %302 = vmatpush1.bf16.msra.mxu0 %v781_v7  ;;  %355 = vmatpush1.bf16.msra.mxu1 %v782_v8  ;;  %v800_v20 = vld [vmem:[#allocation6 + $0x88] ss:$16 sps:$4 sm:$0xff]   ;;  %v801_v21 = vld [vmem:[#allocation6 + $0xa4] ss:$16 sps:$4 sm:$0xff]   ;;  %v803_v22 = vld [vmem:[#allocation6 + $0xac] ss:$16 sps:$4 sm:$0xff]  }
  0x3f   :  { %303 = vmatprep.subr.bf16.mxu0 %v783_v9  ;;  %356 = vmatprep.subr.bf16.mxu1 %v785_v10  ;;  %v805_v23 = vld [vmem:[#allocation6 + $0xa0] ss:$16 sps:$4 sm:$0xff]   ;;  %v806_v24 = vld [vmem:[#allocation6 + $0xa8] ss:$16 sps:$4 sm:$0xff]   ;;  %v807_v25 = vld [vmem:[#allocation6 + $0xc4] ss:$16 sps:$4 sm:$0xff]  }
  0x40   :  { %v809_v26 = vld [vmem:[#allocation6 + $0xcc] ss:$16 sps:$4 sm:$0xff]   ;;  %v811_v27 = vld [vmem:[#allocation6 + $0xc0] ss:$16 sps:$4 sm:$0xff]   ;;  %v812_v28 = vld [vmem:[#allocation6 + $0xc8] ss:$16 sps:$4 sm:$0xff]  }
  0x41   :  { %v813_v29 = vld [vmem:[#allocation6 + $0xe4] ss:$16 sps:$4 sm:$0xff]   ;;  %v815_v30 = vld [vmem:[#allocation6 + $0xec] ss:$16 sps:$4 sm:$0xff]   ;;  %v817_v31 = vld [vmem:[#allocation6 + $0xe0] ss:$16 sps:$4 sm:$0xff]  }
  0x42   :  { %304 = vmatpush1.bf16.msra.mxu0 %v787_v11  ;;  %357 = vmatpush1.bf16.msra.mxu1 %v788_v12  ;;  %v818_v32 = vld [vmem:[#allocation6 + $0xe8] ss:$16 sps:$4 sm:$0xff]   ;;  %v819_v33 = vld [vmem:[#allocation3] sm:$0xff]   ;;  %v459_v36 = vshrl.u32 %v458_v35, 7  ;;  %v456_v39 = vld [vmem:[#allocation8] sm:$0xf] }
  0x43   :  { %305 = vmatprep.subr.bf16.mxu0 %v789_v13  ;;  %358 = vmatprep.subr.bf16.mxu1 %v791_v14  ;;  %s955_s2 = smov [#allocation9]  }
  0x44   :  { %v460_v37 = vsub.s32 0, %v459_v36  ;;  %v468_v38 = vsub.s32 2, %v459_v36  ;;  %v464_v40 = vsub.s32 1, %v459_v36  ;;  %v472_v41 = vsub.s32 3, %v459_v36  ;;  %s699_s25 = sshll.u32 %s955_s2, 4  ;;  %s700_s25 = int_to_ptr.vmem [resolvable:$true] %s699_s25 }
  0x45   :  { %s919_s26 = scalar_lea.vmem %s700_s25, 1024  ;;  %p924_p11 = scmp.lt.s32.totalorder %s700_s25, %s700_s25 }
  0x46   :  { %306 = vmatpush1.bf16.msra.mxu0 %v793_v15  ;;  %359 = vmatpush1.bf16.msra.mxu1 %v794_v16  ;;  %v1019_v42 = vrot.slane %v456_v39, %v460_v37  ;;  %v1021_v43 = vrot.slane %v456_v39, %v468_v38  ;;  %v1023_v44 = vrot.slane %v456_v39, %v464_v40  ;;  %p920_p10 = scmp.ne.s32.totalorder %s700_s25, %s919_s26  ;;  %p925_p12 = scmp.lt.s32.totalorder %s919_s26, %s919_s26 }
  0x47   :  { %307 = vmatprep.subr.bf16.mxu0 %v795_v17  ;;  %360 = vmatprep.subr.bf16.mxu1 %v797_v18  ;;  %v1025_v45 = vrot.slane %v456_v39, %v472_v41 }
  0x48   :  { %p926_p13 = por %p925_p12, %p924_p11 }
  0x4a   :  { %308 = vmatpush1.bf16.msra.mxu0 %v799_v19  ;;  %361 = vmatpush1.bf16.msra.mxu1 %v800_v20  ;;  %p927_p0 = pnand %p926_p13, %p920_p10 }
  0x4b   :  { %309 = vmatprep.subr.bf16.mxu0 %v801_v21  ;;  %362 = vmatprep.subr.bf16.mxu1 %v803_v22 }
  0x4e   :  { %310 = vmatpush1.bf16.msra.mxu0 %v805_v23  ;;  %363 = vmatpush1.bf16.msra.mxu1 %v806_v24 }
  0x4f   :  { %311 = vmatprep.subr.bf16.mxu0 %v807_v25  ;;  %364 = vmatprep.subr.bf16.mxu1 %v809_v26 }
  0x52   :  { %312 = vmatpush1.bf16.msra.mxu0 %v811_v27  ;;  %365 = vmatpush1.bf16.msra.mxu1 %v812_v28 }
  0x53   :  { %313 = vmatprep.subr.bf16.mxu0 %v813_v29  ;;  %366 = vmatprep.subr.bf16.mxu1 %v815_v30 }
  0x56   :  { %314 = vmatpush1.bf16.msra.mxu0 %v817_v31  ;;  %367 = vmatpush1.bf16.msra.mxu1 %v818_v32 }
  0x59   :  { %332 = vmatmul.mubr.bf16.vlgmr.msra.gmra.mrb[0].mxu0 %v819_v33  ;;  %385 = vmatmul.mubr.bf16.vlgmr.msra.gmra.mrb[0].mxu1 %v819_v33 }
  0x5a   :  { %341 = vmatprep.mubr.bf16.mxu0 %v954_v0  ;;  %394 = vmatprep.mubr.bf16.mxu1 %v954_v0 }
  0x61   :  { %342 = vmatmul.mubr.bf16.gmra.mrb[4].mxu0 %v820_v34  ;;  %395 = vmatmul.mubr.bf16.gmra.mrb[4].mxu1 %v820_v34 }
 0x12c   :  { %v333_v46 = vpop.f32.mrb[0].mxu0  ;;  %v386_v47 = vpop.f32.mrb[0].mxu1 }
 0x12d   :  { %v1028_v48 = vadd.f32 %v1019_v42, %v333_v46  ;;  %v1031_v49 = vadd.f32 %v1021_v43, %v386_v47  ;;  %v335_v50 = vpop.f32.mrb[1].mxu0  ;;  %v388_v51 = vpop.f32.mrb[1].mxu1 }
 0x12e   :  { %v1034_v52 = vadd.f32 %v1023_v44, %v335_v50  ;;  %v1037_v53 = vadd.f32 %v1025_v45, %v388_v51  ;;  %v337_v54 = vpop.f32.mrb[2].mxu0  ;;  %v390_v55 = vpop.f32.mrb[2].mxu1 }
 0x12f   :  { %v510_v56 = vmul.f32 0.044715, %v1028_v48  ;;  %v512_v57 = vmul.f32 0.044715, %v1031_v49  ;;  %v1046_v62 = vadd.f32 %v1019_v42, %v337_v54  ;;  %v1049_v63 = vadd.f32 %v1021_v43, %v390_v55  ;;  %v339_v0 = vpop.f32.mrb[3].mxu0  ;;  %v392_v1 = vpop.f32.mrb[3].mxu1 }
 0x130   :  { %v511_v58 = vmul.f32 0.044715, %v1034_v52  ;;  %v513_v59 = vmul.f32 0.044715, %v1037_v53  ;;  %v1054_v4 = vadd.f32 %v1023_v44, %v339_v0  ;;  %v1066_v16 = vadd.f32 %v1025_v45, %v392_v1 }
 0x131   :  { %v526_v60 = vmul.f32 %v510_v56, %v1028_v48  ;;  %v528_v61 = vmul.f32 %v512_v57, %v1031_v49  ;;  %v514_v7 = vmul.f32 0.044715, %v1046_v62  ;;  %v516_v10 = vmul.f32 0.044715, %v1049_v63 }
 0x132   :  { %v527_v2 = vmul.f32 %v511_v58, %v1034_v52  ;;  %v529_v3 = vmul.f32 %v513_v59, %v1037_v53  ;;  %v515_v22 = vmul.f32 0.044715, %v1054_v4  ;;  %v517_v35 = vmul.f32 0.044715, %v1066_v16 }
 0x133   :  { %v542_v5 = vmul.f32 %v526_v60, %v1028_v48  ;;  %v544_v6 = vmul.f32 %v528_v61, %v1031_v49  ;;  %v530_v15 = vmul.f32 %v514_v7, %v1046_v62  ;;  %v532_v21 = vmul.f32 %v516_v10, %v1049_v63 }
 0x134   :  { %v543_v8 = vmul.f32 %v527_v2, %v1034_v52  ;;  %v545_v9 = vmul.f32 %v529_v3, %v1037_v53  ;;  %v343_v11 = vpop.f32.mrb[4].mxu0  ;;  %v396_v12 = vpop.f32.mrb[4].mxu1  ;;  %v531_v32 = vmul.f32 %v515_v22, %v1054_v4  ;;  %v533_v41 = vmul.f32 %v517_v35, %v1066_v16 }
 0x135   :  { %v558_v13 = vadd.f32 %v542_v5, %v1028_v48  ;;  %v560_v14 = vadd.f32 %v544_v6, %v1031_v49  ;;  %v345_v17 = vpop.f32.mrb[5].mxu0  ;;  %v398_v18 = vpop.f32.mrb[5].mxu1  ;;  %v546_v27 = vmul.f32 %v530_v15, %v1046_v62  ;;  %v548_v31 = vmul.f32 %v532_v21, %v1049_v63 }
 0x136   :  { %v559_v19 = vadd.f32 %v543_v8, %v1034_v52  ;;  %v561_v20 = vadd.f32 %v545_v9, %v1037_v53  ;;  %v347_v23 = vpop.f32.mrb[6].mxu0  ;;  %v1072_v24 = vpop.f32.mrb[6].mxu1  ;;  %v1084_v36 = vadd.f32 %v1019_v42, %v343_v11  ;;  %v547_v38 = vmul.f32 %v531_v32, %v1054_v4 }
 0x137   :  { %v574_v25 = vmul.f32 0.7978846, %v558_v13  ;;  %v576_v26 = vmul.f32 0.7978846, %v560_v14  ;;  %v1075_v28 = vpop.f32.mrb[7].mxu0  ;;  %v1079_v33 = vpop.f32.mrb[7].mxu1  ;;  %v562_v34 = vadd.f32 %v546_v27, %v1046_v62  ;;  %v564_v37 = vadd.f32 %v548_v31, %v1049_v63 }
 0x138   :  { %v575_v29 = vmul.f32 0.7978846, %v559_v19  ;;  %v577_v30 = vmul.f32 0.7978846, %v561_v20  ;;  %v1089_v39 = vadd.f32 %v1021_v43, %v396_v12  ;;  %v563_v47 = vadd.f32 %v547_v38, %v1054_v4 }
 0x139   :  { %821 = vtanh.f32 %v574_v25  ;;  %v578_v40 = vmul.f32 0.7978846, %v562_v34  ;;  %v580_v46 = vmul.f32 0.7978846, %v564_v37  ;;  %v518_v50 = vmul.f32 0.044715, %v1084_v36 }
 0x13a   :  { %823 = vtanh.f32 %v576_v26  ;;  %v494_v51 = vmul.f32 0.5, %v1028_v48  ;;  %v549_v54 = vmul.f32 %v533_v41, %v1066_v16  ;;  %v520_v55 = vmul.f32 0.044715, %v1089_v39 }
 0x13b   :  { %825 = vtanh.f32 %v575_v29  ;;  %v579_v56 = vmul.f32 0.7978846, %v563_v47  ;;  %v534_v57 = vmul.f32 %v518_v50, %v1084_v36  ;;  %v1099_v58 = vadd.f32 %v1023_v44, %v345_v17 }
 0x13c   :  { %827 = vtanh.f32 %v577_v30  ;;  %v565_v59 = vadd.f32 %v549_v54, %v1066_v16  ;;  %v536_v60 = vmul.f32 %v520_v55, %v1089_v39  ;;  %v1104_v61 = vadd.f32 %v1025_v45, %v398_v18 }
 0x13d   :  { %829 = vtanh.f32 %v578_v40  ;;  %v1107_v48 = vadd.f32 %v1019_v42, %v347_v23  ;;  %v496_v0 = vmul.f32 0.5, %v1031_v49  ;;  %v550_v1 = vmul.f32 %v534_v57, %v1084_v36 }
 0x13e   :  { %831 = vtanh.f32 %v580_v46  ;;  %v519_v2 = vmul.f32 0.044715, %v1099_v58  ;;  %v495_v3 = vmul.f32 0.5, %v1034_v52  ;;  %v581_v5 = vmul.f32 0.7978846, %v565_v59 }
 0x13f   :  { %833 = vtanh.f32 %v579_v56  ;;  %v552_v6 = vmul.f32 %v536_v60, %v1089_v39  ;;  %v521_v7 = vmul.f32 0.044715, %v1104_v61  ;;  %v497_v8 = vmul.f32 0.5, %v1037_v53 }
 0x140   :  { %v566_v9 = vadd.f32 %v550_v1, %v1084_v36  ;;  %v535_v42 = vmul.f32 %v519_v2, %v1099_v58  ;;  %v522_v49 = vmul.f32 0.044715, %v1107_v48  ;;  %v498_v11 = vmul.f32 0.5, %v1046_v62 }
 0x141   :  { %835 = vtanh.f32 %v581_v5  ;;  %v568_v12 = vadd.f32 %v552_v6, %v1089_v39  ;;  %v537_v52 = vmul.f32 %v521_v7, %v1104_v61  ;;  %v1127_v62 = vadd.f32 %v1021_v43, %v1072_v24 }
 0x142   :  { %v582_v15 = vmul.f32 0.7978846, %v566_v9  ;;  %v551_v17 = vmul.f32 %v535_v42, %v1099_v58  ;;  %v538_v53 = vmul.f32 %v522_v49, %v1107_v48  ;;  %v499_v24 = vmul.f32 0.5, %v1054_v4 }
 0x143   :  { %v822_v10 = vpop.eup %821  ;;  %v584_v20 = vmul.f32 0.7978846, %v568_v12  ;;  %v553_v21 = vmul.f32 %v537_v52, %v1104_v61  ;;  %v524_v41 = vmul.f32 0.044715, %v1127_v62  ;;  %v500_v57 = vmul.f32 0.5, %v1049_v63 }
 0x144   :  { %v824_v13 = vpop.eup %823  ;;  %v606_v14 = vadd.f32 1.0, %v822_v10  ;;  %837 = vtanh.f32 %v582_v15  ;;  %v567_v26 = vadd.f32 %v551_v17, %v1099_v58  ;;  %v554_v38 = vmul.f32 %v538_v53, %v1107_v48 }
 0x145   :  { %v826_v18 = vpop.eup %825  ;;  %v608_v19 = vadd.f32 1.0, %v824_v13  ;;  %839 = vtanh.f32 %v584_v20  ;;  %v569_v31 = vadd.f32 %v553_v21, %v1104_v61  ;;  %v540_v59 = vmul.f32 %v524_v41, %v1127_v62 }
 0x146   :  { %v828_v22 = vpop.eup %827  ;;  %v622_v23 = vmul.f32 %v606_v14, %v494_v51  ;;  %v607_v25 = vadd.f32 1.0, %v826_v18  ;;  %v583_v37 = vmul.f32 0.7978846, %v567_v26  ;;  %v570_v56 = vadd.f32 %v554_v38, %v1107_v48 }
 0x147   :  { %v830_v27 = vpop.eup %829  ;;  %v624_v29 = vmul.f32 %v608_v19, %v496_v0  ;;  %v609_v30 = vadd.f32 1.0, %v828_v22  ;;  %v585_v40 = vmul.f32 0.7978846, %v569_v31  ;;  %v491_v4 = vadd.f32 %v1023_v44, %v1075_v28 }
 0x148   :  { %v832_v32 = vpop.eup %831  ;;  %v623_v34 = vmul.f32 %v607_v25, %v495_v3  ;;  %v610_v35 = vadd.f32 1.0, %v830_v27  ;;  %841 = vtanh.f32 %v583_v37  ;;  %v493_v60 = vadd.f32 %v1025_v45, %v1079_v33 }
 0x149   :  { %v625_v43 = vmul.f32 %v609_v30, %v497_v8  ;;  %v834_v46 = vpop.eup %833  ;;  %v612_v51 = vadd.f32 1.0, %v832_v32  ;;  %843 = vtanh.f32 %v585_v40  ;;  %v501_v3 = vmul.f32 0.5, %v1066_v16 }
 0x14a   :  { %v754_v47 = vpack.c.bf16 %v623_v34, %v622_v23  ;;  %v626_v50 = vmul.f32 %v610_v35, %v498_v11  ;;  %v611_v55 = vadd.f32 1.0, %v834_v46  ;;  %v556_v6 = vmul.f32 %v540_v59, %v1127_v62 }
 0x14b   :  { %v755_v54 = vpack.c.bf16 %v625_v43, %v624_v29  ;;  %v836_v0 = vpop.eup %835  ;;  %v628_v2 = vmul.f32 %v612_v51, %v500_v57  ;;  %v586_v8 = vmul.f32 0.7978846, %v570_v56  ;;  %v523_v63 = vmul.f32 0.044715, %v491_v4 }
 0x14c   :  { %686 = vst [vmem:[#allocation9] sm:$0xff] %v754_v47  ;;  %v627_v1 = vmul.f32 %v611_v55, %v499_v24  ;;  %v613_v5 = vadd.f32 1.0, %v836_v0  ;;  %v525_v9 = vmul.f32 0.044715, %v493_v60  ;;  %v572_v44 = vadd.f32 %v556_v6, %v1127_v62 }
 0x14d   :  { %687 = vst [vmem:[#allocation9 + $0x8] sm:$0xff] %v755_v54  ;;  %v539_v33 = vmul.f32 %v523_v63, %v491_v4  ;;  %v502_v16 = vmul.f32 0.5, %v1084_v36  ;;  %845 = vtanh.f32 %v586_v8  ;;  %v504_v17 = vmul.f32 0.5, %v1089_v39 }
 0x14e   :  { %v756_v7 = vpack.c.bf16 %v627_v1, %v626_v50  ;;  %v838_v42 = vpop.eup %837  ;;  %v629_v49 = vmul.f32 %v613_v5, %v501_v3  ;;  %v541_v10 = vmul.f32 %v525_v9, %v493_v60  ;;  %v588_v52 = vmul.f32 0.7978846, %v572_v44 }
 0x14f   :  { %v840_v28 = vpop.eup %839  ;;  %v614_v45 = vadd.f32 1.0, %v838_v42  ;;  %v555_v13 = vmul.f32 %v539_v33, %v491_v4  ;;  %v503_v53 = vmul.f32 0.5, %v1099_v58  ;;  %v505_v25 = vmul.f32 0.5, %v1104_v61 }
 0x150   :  { %688 = vst [vmem:[#allocation9 + $0x10] sm:$0xff] %v756_v7  ;;  %v757_v11 = vpack.c.bf16 %v629_v49, %v628_v2  ;;  %v616_v12 = vadd.f32 1.0, %v840_v28  ;;  %v557_v14 = vmul.f32 %v541_v10, %v493_v60  ;;  %847 = vtanh.f32 %v588_v52 }
 0x151   :  { %v630_v19 = vmul.f32 %v614_v45, %v502_v16  ;;  %v571_v21 = vadd.f32 %v555_v13, %v491_v4  ;;  %v506_v37 = vmul.f32 0.5, %v1107_v48  ;;  %v508_v61 = vmul.f32 0.5, %v1127_v62 }
 0x152   :  { %v842_v15 = vpop.eup %841  ;;  %689 = vst [vmem:[#allocation9 + $0x18] sm:$0xff] %v757_v11  ;;  %v573_v22 = vadd.f32 %v557_v14, %v493_v60  ;;  %v632_v23 = vmul.f32 %v616_v12, %v504_v17  ;;  %v507_v40 = vmul.f32 0.5, %v491_v4  ;;  %v509_v47 = vmul.f32 0.5, %v493_v60 }
 0x153   :  { %v844_v18 = vpop.eup %843  ;;  %v615_v20 = vadd.f32 1.0, %v842_v15  ;;  %v587_v27 = vmul.f32 0.7978846, %v571_v21 }
 0x154   :  { %v617_v26 = vadd.f32 1.0, %v844_v18  ;;  %v589_v29 = vmul.f32 0.7978846, %v573_v22 }
 0x155   :  { %v631_v36 = vmul.f32 %v615_v20, %v503_v53  ;;  %849 = vtanh.f32 %v587_v27 }
 0x156   :  { %v633_v30 = vmul.f32 %v617_v26, %v505_v25  ;;  %851 = vtanh.f32 %v589_v29 }
 0x157   :  { %v758_v31 = vpack.c.bf16 %v631_v36, %v630_v19  ;;  %v846_v39 = vpop.eup %845 }
 0x158   :  { %v759_v32 = vpack.c.bf16 %v633_v30, %v632_v23  ;;  %v618_v34 = vadd.f32 1.0, %v846_v39 }
 0x159   :  { %690 = vst [vmem:[#allocation9 + $0x20] sm:$0xff] %v758_v31 }
 0x15a   :  { %691 = vst [vmem:[#allocation9 + $0x28] sm:$0xff] %v759_v32  ;;  %v848_v58 = vpop.eup %847  ;;  %v634_v24 = vmul.f32 %v618_v34, %v506_v37 }
 0x15b   :  { %v620_v35 = vadd.f32 1.0, %v848_v58 }
 0x15d   :  { %v636_v46 = vmul.f32 %v620_v35, %v508_v61 }
 0x15f   :  { %v850_v38 = vpop.eup %849 }
 0x160   :  { %v852_v43 = vpop.eup %851  ;;  %v619_v41 = vadd.f32 1.0, %v850_v38 }
 0x161   :  { %v621_v50 = vadd.f32 1.0, %v852_v43 }
 0x162   :  { %v635_v51 = vmul.f32 %v619_v41, %v507_v40 }
 0x163   :  { %v637_v54 = vmul.f32 %v621_v50, %v509_v47 }
 0x164   :  { %v760_v55 = vpack.c.bf16 %v635_v51, %v634_v24 }
 0x165   :  { %v761_v56 = vpack.c.bf16 %v637_v54, %v636_v46 }
 0x166   :  { %692 = vst [vmem:[#allocation9 + $0x30] sm:$0xff] %v760_v55 }
 0x167   :  { %693 = vst [vmem:[#allocation9 + $0x38] sm:$0xff] %v761_v56 }
 0x168   :  { %930 = shalt.err (!%p927_p0)
}
 0x169   :  { %s931_s29 = scalar_lea.hbm %s1168_s3, 1024 }
 0x16a   :  { %p932_p1 = scmp.ne.s32.totalorder %s1168_s3, %s931_s29  ;;  %p935_p2 = scmp.lt.u32.totalorder %s931_s29, %s1168_s3 }
 0x16c   :  { %p937_p3 = pnand %p935_p2, %p932_p1 }
 0x16e   :  { %940 = shalt.err (!%p937_p3)
}
 0x16f   :  { %705 = dma.vmem_to_hbm [thread:$0]  %s700_s25, 1024, %s1168_s3, [#allocation5], %s948_s22, %s948_s22, %s949_s23  }
 0x170   :  { %945 = dma.done.wait [#allocation5], 1024  }
 0x171   :  { %946 = vsyncadd [#allocation5], 4294966272 }
 0x172   :  { %709 = vsyncpa [#allocation4], 1 }
 0x173   :  { %710 = vsyncpa [#allocation7], 1 }
 0x174   :  { %711 = vsyncpa [#allocation5], 1 }

// kernel: stage1_forward.124
= control target key start
LH: loop header
LB: loop body
LE: loop exit
PB: predicated region body
PF: predicated region fallthrough
CT: control target
= control target key end

     0   :  { %8 = vsyncpa [#allocation4], 0  ;;  %s423_s0 = inlined_call_operand.hbm [shape: bf16[2,128], index: 0, kind: input, shape index: {}]   ;;  %s424_s1 = inlined_call_operand.hbm [shape: bf16[128,128], index: 1, kind: input, shape index: {}]   ;;  %s425_s2 = inlined_call_operand.hbm [shape: f32[1,128], index: 2, kind: input, shape index: {}]   ;;  %s426_s3 = inlined_call_operand.hbm [shape: bf16[2,128], index: 3, kind: output, shape index: {}]  }
   0x1   :  { %9 = vsyncpa [#allocation7], 0 }
   0x2   :  { %10 = vsyncpa [#allocation5], 0  ;;  %s347_s12 = smov [#allocation6]   ;;  %s253_s16 = scalar_lea.hbm %s424_s1, 1024 }
   0x3   :  { %s26_s13 = sshll.u32 %s347_s12, 4  ;;  %p254_p0 = scmp.ne.s32.totalorder %s424_s1, %s253_s16  ;;  %s27_s13 = int_to_ptr.vmem [resolvable:$true] %s26_s13 }
   0x4   :  { %p257_p1 = scmp.lt.u32.totalorder %s253_s16, %s424_s1 }
   0x6   :  { %p259_p2 = pnand %p257_p1, %p254_p0 }
   0x8   :  { %262 = shalt.err (!%p259_p2)
}
   0x9   :  { %s263_s21 = scalar_lea.vmem %s27_s13, 1024  ;;  %p268_p4 = scmp.lt.s32.totalorder %s27_s13, %s27_s13 }
   0xa   :  { %p264_p3 = scmp.ne.s32.totalorder %s27_s13, %s263_s21  ;;  %p269_p5 = scmp.lt.s32.totalorder %s263_s21, %s263_s21 }
   0xc   :  { %p270_p6 = por %p269_p5, %p268_p4 }
   0xe   :  { %p271_p7 = pnand %p270_p6, %p264_p3 }
  0x10   :  { %274 = shalt.err (!%p271_p7)
}
  0x11   :  { %s348_s22 = smov 64   ;;  %s349_s23 = smov 4  }
  0x12   :  { %32 = dma.hbm_to_vmem [thread:$0]  %s424_s1, 1024, %s27_s13, [#allocation7], %s348_s22, %s348_s22, %s349_s23  }
  0x13   :  { %s350_s26 = smov [#allocation3]   ;;  %s351_s28 = smov [#allocation8]  }
  0x14   :  { %s17_s27 = sshll.u32 %s350_s26, 4  ;;  %s39_s29 = sshll.u32 %s351_s28, 4  ;;  %s18_s27 = int_to_ptr.vmem [resolvable:$true] %s17_s27  ;;  %s40_s29 = int_to_ptr.vmem [resolvable:$true] %s39_s29 }
  0x15   :  { %s275_s5 = scalar_lea.hbm %s423_s0, 16 }
  0x16   :  { %p276_p8 = scmp.ne.s32.totalorder %s423_s0, %s275_s5  ;;  %p279_p9 = scmp.lt.u32.totalorder %s275_s5, %s423_s0 }
  0x18   :  { %p281_p10 = pnand %p279_p9, %p276_p8 }
  0x1a   :  { %284 = shalt.err (!%p281_p10)
}
  0x1b   :  { %s285_s1 = scalar_lea.vmem %s18_s27, 16  ;;  %s289_s10 = scalar_lea.vmem %s18_s27, 32 }
  0x1c   :  { %p286_p11 = scmp.ne.s32.totalorder %s18_s27, %s285_s1  ;;  %p290_p12 = scmp.lt.s32.totalorder %s18_s27, %s18_s27 }
  0x1d   :  { %p291_p13 = scmp.lt.s32.totalorder %s289_s10, %s285_s1 }
  0x1f   :  { %p292_p0 = por %p291_p13, %p290_p12 }
  0x21   :  { %p293_p1 = pnand %p292_p0, %p286_p11 }
  0x23   :  { %296 = shalt.err (!%p293_p1)
}
  0x24   :  { %20 = dma.hbm_to_vmem [thread:$0]  %s423_s0, 16, %s18_s27, [#allocation4]  }
  0x25   :  { %s297_s15 = scalar_lea.hbm %s425_s2, 16 }
  0x26   :  { %p298_p2 = scmp.ne.s32.totalorder %s425_s2, %s297_s15  ;;  %p301_p3 = scmp.lt.u32.totalorder %s297_s15, %s425_s2 }
  0x28   :  { %p303_p4 = pnand %p301_p3, %p298_p2 }
  0x2a   :  { %306 = shalt.err (!%p303_p4)
}
  0x2b   :  { %s307_s20 = scalar_lea.vmem %s40_s29, 16  ;;  %s311_s21 = scalar_lea.vmem %s40_s29, 32 }
  0x2c   :  { %p308_p5 = scmp.ne.s32.totalorder %s40_s29, %s307_s20  ;;  %p312_p6 = scmp.lt.s32.totalorder %s40_s29, %s40_s29 }
  0x2d   :  { %p313_p7 = scmp.lt.s32.totalorder %s311_s21, %s307_s20 }
  0x2f   :  { %p314_p8 = por %p313_p7, %p312_p6 }
  0x31   :  { %p315_p9 = pnand %p314_p8, %p308_p5 }
  0x33   :  { %318 = shalt.err (!%p315_p9)
}
  0x34   :  { %42 = dma.hbm_to_vmem [thread:$0]  %s425_s2, 16, %s40_s29, [#allocation7]  }
  0x35   :  { %341 = dma.done.wait [#allocation4], 16  }
  0x36   :  { %342 = vsyncadd [#allocation4], 4294967280 }
  0x37   :  { %343 = dma.done.wait [#allocation7], 1040  }
  0x38   :  { %344 = vsyncadd [#allocation7], 4294966256  ;;  %v352_v0 = vmov 0.0   ;;  %vm353_vm0 = vmmov 0   ;;  %v243_v1 = vld [vmem:[#allocation6] sm:$0xff]   ;;  %v244_v2 = vld [vmem:[#allocation6 + $0x8] sm:$0xff]  }
  0x39   :  { %215 = vmatprep.subr.bf16.mxu0 %v352_v0  ;;  %57 = vst [vmem:[#allocation2] sm:$0x3] %v352_v0  ;;  %231 = vmatprep.mubr.msk.bf16.mxu0 %vm353_vm0, %v352_v0  ;;  %v245_v3 = vld [vmem:[#allocation6 + $0x10] sm:$0xff]   ;;  %v246_v4 = vld [vmem:[#allocation6 + $0x18] sm:$0xff]   ;;  %v247_v5 = vld [vmem:[#allocation6 + $0x20] sm:$0xff]   ;;  %s354_s2 = smov [#allocation9]  }
  0x3a   :  { %216 = vmatpush3.bf16.msra.mxu0 %v243_v1  ;;  %v248_v6 = vld [vmem:[#allocation6 + $0x28] sm:$0xff]   ;;  %v249_v7 = vld [vmem:[#allocation6 + $0x30] sm:$0xff]   ;;  %v250_v8 = vld [vmem:[#allocation6 + $0x38] sm:$0xff]   ;;  %s187_s23 = sshll.u32 %s354_s2, 4  ;;  %s188_s23 = int_to_ptr.vmem [resolvable:$true] %s187_s23 }
  0x3b   :  { %217 = vmatprep.subr.bf16.mxu0 %v352_v0  ;;  %v59_v9 = vld [vmem:[#allocation3] sm:$0x1]  ;;  %v205_v16 = vld [vmem:[#allocation8] ss:$0 sm:$0xff]  ;;  %s319_s24 = scalar_lea.vmem %s188_s23, 16  ;;  %s323_s25 = scalar_lea.vmem %s188_s23, 32 }
  0x3c   :  { %p320_p10 = scmp.ne.s32.totalorder %s188_s23, %s319_s24  ;;  %p324_p11 = scmp.lt.s32.totalorder %s188_s23, %s188_s23 }
  0x3d   :  { %p325_p12 = scmp.lt.s32.totalorder %s323_s25, %s319_s24 }
  0x3e   :  { %218 = vmatpush3.bf16.msra.mxu0 %v244_v2 }
  0x3f   :  { %219 = vmatprep.subr.bf16.mxu0 %v352_v0  ;;  %p326_p13 = por %p325_p12, %p324_p11 }
  0x40   :  { %v58_v10 = vld [vmem:[#allocation2] sm:$0x3] }
  0x41   :  { %p327_p0 = pnand %p326_p13, %p320_p10 }
  0x42   :  { %220 = vmatpush3.bf16.msra.mxu0 %v245_v3 }
  0x43   :  { %221 = vmatprep.subr.bf16.mxu0 %v352_v0 }
  0x46   :  { %222 = vmatpush3.bf16.msra.mxu0 %v246_v4 }
  0x47   :  { %223 = vmatprep.subr.bf16.mxu0 %v352_v0 }
  0x4a   :  { %224 = vmatpush3.bf16.msra.mxu0 %v247_v5 }
  0x4b   :  { %225 = vmatprep.subr.bf16.mxu0 %v352_v0 }
  0x4e   :  { %226 = vmatpush3.bf16.msra.mxu0 %v248_v6 }
  0x4f   :  { %227 = vmatprep.subr.bf16.mxu0 %v352_v0 }
  0x52   :  { %228 = vmatpush3.bf16.msra.mxu0 %v249_v7 }
  0x53   :  { %229 = vmatprep.subr.bf16.mxu0 %v352_v0 }
  0x56   :  { %230 = vmatpush3.bf16.msra.mxu0 %v250_v8 }
  0x59   :  { %232 = vmatmul.mubr.bf16.vlgmr.msra.gmra.mrb[0].mxu0 %v59_v9 }
 0x12c   :  { %v158_v11 = vpop.f32.mrb[0].mxu0 }
 0x12d   :  { %v164_v12 = vadd.f32 %v158_v11, %v58_v10  ;;  %v233_v13 = vpop.f32.mrb[1].mxu0 }
 0x12e   :  { %v161_v14 = vpop.f32.mrb[2].mxu0 }
 0x12f   :  { %165 = vst [vmem:[#allocation2] sm:$0x3] %v164_v12  ;;  %v234_v15 = vpop.f32.mrb[3].mxu0 }
 0x136   :  { %v169_v17 = vld [vmem:[#allocation2] sm:$0x3] }
 0x137   :  { %v177_v18 = vadd.f32 %v205_v16, %v169_v17 }
 0x139   :  { %251 = vtanh.f32 %v177_v18 }
 0x143   :  { %v252_v19 = vpop.eup %251 }
 0x144   :  { %v179_v20 = vpack.c.bf16 %v252_v19, %v252_v19 }
 0x146   :  { %180 = vst [vmem:[#allocation9] sm:$0x1] %v179_v20 }
 0x147   :  { %330 = shalt.err (!%p327_p0)
}
 0x148   :  { %s331_s28 = scalar_lea.hbm %s426_s3, 16 }
 0x149   :  { %p332_p1 = scmp.ne.s32.totalorder %s426_s3, %s331_s28  ;;  %p335_p2 = scmp.lt.u32.totalorder %s331_s28, %s426_s3 }
 0x14b   :  { %p337_p3 = pnand %p335_p2, %p332_p1 }
 0x14d   :  { %340 = shalt.err (!%p337_p3)
}
 0x14e   :  { %190 = dma.vmem_to_hbm [thread:$0]  %s188_s23, 16, %s426_s3, [#allocation5]  }
 0x14f   :  { %345 = dma.done.wait [#allocation5], 16  }
 0x150   :  { %346 = vsyncadd [#allocation5], 4294967280 }
 0x151   :  { %194 = vsyncpa [#allocation4], 1 }
 0x152   :  { %195 = vsyncpa [#allocation7], 1 }
 0x153   :  { %196 = vsyncpa [#allocation5], 1 }

// kernel: stage1_forward.125
= control target key start
LH: loop header
LB: loop body
LE: loop exit
PB: predicated region body
PF: predicated region fallthrough
CT: control target
= control target key end

     0   :  { %10 = vsyncpa [#allocation4], 0  ;;  %s756_s0 = inlined_call_operand.hbm [shape: bf16[32,128], index: 0, kind: input, shape index: {}]   ;;  %s757_s1 = inlined_call_operand.hbm [shape: bf16[128,128], index: 1, kind: input, shape index: {}]   ;;  %s758_s2 = inlined_call_operand.hbm [shape: f32[1,128], index: 2, kind: input, shape index: {}]   ;;  %s759_s3 = inlined_call_operand.hbm [shape: f32[1,128], index: 3, kind: input, shape index: {}]   ;;  %s760_s4 = inlined_call_operand.hbm [shape: f32[1,128], index: 4, kind: input, shape index: {}]   ;;  %s761_s5 = inlined_call_operand.hbm [shape: bf16[32,128], index: 5, kind: output, shape index: {}]  }
   0x1   :  { %11 = vsyncpa [#allocation7], 0 }
   0x2   :  { %12 = vsyncpa [#allocation10], 0 }
   0x3   :  { %13 = vsyncpa [#allocation5], 0  ;;  %s629_s18 = smov [#allocation6]   ;;  %s630_s20 = smov [#allocation9]  }
   0x4   :  { %s31_s19 = sshll.u32 %s629_s18, 4  ;;  %s54_s21 = sshll.u32 %s630_s20, 4  ;;  %s32_s19 = int_to_ptr.vmem [resolvable:$true] %s31_s19  ;;  %s667_s21 = int_to_ptr.vmem [resolvable:$true] %s54_s21 }
   0x5   :  { %s489_s24 = scalar_lea.hbm %s757_s1, 1024 }
   0x6   :  { %p490_p0 = scmp.ne.s32.totalorder %s757_s1, %s489_s24  ;;  %p493_p1 = scmp.lt.u32.totalorder %s489_s24, %s757_s1 }
   0x8   :  { %p495_p2 = pnand %p493_p1, %p490_p0 }
   0xa   :  { %498 = shalt.err (!%p495_p2)
}
   0xb   :  { %s499_s29 = scalar_lea.vmem %s32_s19, 1024  ;;  %p504_p4 = scmp.lt.s32.totalorder %s32_s19, %s32_s19 }
   0xc   :  { %p500_p3 = scmp.ne.s32.totalorder %s32_s19, %s499_s29  ;;  %p505_p5 = scmp.lt.s32.totalorder %s499_s29, %s499_s29 }
   0xe   :  { %p506_p6 = por %p505_p5, %p504_p4 }
  0x10   :  { %p507_p7 = pnand %p506_p6, %p500_p3 }
  0x12   :  { %510 = shalt.err (!%p507_p7)
}
  0x13   :  { %s631_s30 = smov 64   ;;  %s632_s6 = smov 4  }
  0x14   :  { %37 = dma.hbm_to_vmem [thread:$0]  %s757_s1, 1024, %s32_s19, [#allocation7], %s631_s30, %s631_s30, %s632_s6  }
  0x15   :  { %s511_s11 = scalar_lea.hbm %s759_s3, 16 }
  0x16   :  { %p512_p8 = scmp.ne.s32.totalorder %s759_s3, %s511_s11  ;;  %p515_p9 = scmp.lt.u32.totalorder %s511_s11, %s759_s3 }
  0x18   :  { %p517_p10 = pnand %p515_p9, %p512_p8 }
  0x1a   :  { %520 = shalt.err (!%p517_p10)
}
  0x1b   :  { %s521_s16 = scalar_lea.vmem %s667_s21, 16  ;;  %s525_s1 = scalar_lea.vmem %s667_s21, 32 }
  0x1c   :  { %p522_p11 = scmp.ne.s32.totalorder %s667_s21, %s521_s16  ;;  %p526_p12 = scmp.lt.s32.totalorder %s667_s21, %s667_s21 }
  0x1d   :  { %p527_p13 = scmp.lt.s32.totalorder %s525_s1, %s521_s16 }
  0x1f   :  { %p528_p0 = por %p527_p13, %p526_p12 }
  0x21   :  { %p529_p1 = pnand %p528_p0, %p522_p11 }
  0x23   :  { %532 = shalt.err (!%p529_p1)
}
  0x24   :  { %57 = dma.hbm_to_vmem [thread:$0]  %s759_s3, 16, %s667_s21, [#allocation10]  }
  0x25   :  { %s633_s19 = smov [#allocation3]   ;;  %s634_s22 = smov [#allocation8]  }
  0x26   :  { %s19_s20 = sshll.u32 %s633_s19, 4  ;;  %s44_s23 = sshll.u32 %s634_s22, 4  ;;  %s20_s20 = int_to_ptr.vmem [resolvable:$true] %s19_s20  ;;  %s45_s23 = int_to_ptr.vmem [resolvable:$true] %s44_s23 }
  0x27   :  { %s533_s26 = scalar_lea.hbm %s756_s0, 256 }
  0x28   :  { %p534_p2 = scmp.ne.s32.totalorder %s756_s0, %s533_s26  ;;  %p537_p3 = scmp.lt.u32.totalorder %s533_s26, %s756_s0 }
  0x2a   :  { %p539_p4 = pnand %p537_p3, %p534_p2 }
  0x2c   :  { %542 = shalt.err (!%p539_p4)
}
  0x2d   :  { %s543_s3 = scalar_lea.vmem %s20_s20, 256  ;;  %p548_p6 = scmp.lt.s32.totalorder %s20_s20, %s20_s20 }
  0x2e   :  { %p544_p5 = scmp.ne.s32.totalorder %s20_s20, %s543_s3  ;;  %p549_p7 = scmp.lt.s32.totalorder %s543_s3, %s543_s3 }
  0x30   :  { %p550_p8 = por %p549_p7, %p548_p6 }
  0x32   :  { %p551_p9 = pnand %p550_p8, %p544_p5 }
  0x34   :  { %554 = shalt.err (!%p551_p9)
}
  0x35   :  { %25 = dma.hbm_to_vmem [thread:$0]  %s756_s0, 256, %s20_s20, [#allocation4], %s631_s30, %s631_s30, %s632_s6  }
  0x36   :  { %s555_s11 = scalar_lea.hbm %s758_s2, 16 }
  0x37   :  { %p556_p10 = scmp.ne.s32.totalorder %s758_s2, %s555_s11  ;;  %p559_p11 = scmp.lt.u32.totalorder %s555_s11, %s758_s2 }
  0x39   :  { %p561_p12 = pnand %p559_p11, %p556_p10 }
  0x3b   :  { %564 = shalt.err (!%p561_p12)
}
  0x3c   :  { %s565_s16 = scalar_lea.vmem %s45_s23, 16  ;;  %s569_s1 = scalar_lea.vmem %s45_s23, 32 }
  0x3d   :  { %p566_p13 = scmp.ne.s32.totalorder %s45_s23, %s565_s16  ;;  %p570_p0 = scmp.lt.s32.totalorder %s45_s23, %s45_s23 }
  0x3e   :  { %p571_p1 = scmp.lt.s32.totalorder %s569_s1, %s565_s16 }
  0x40   :  { %p572_p2 = por %p571_p1, %p570_p0 }
  0x42   :  { %p573_p3 = pnand %p572_p2, %p566_p13 }
  0x44   :  { %576 = shalt.err (!%p573_p3)
}
  0x45   :  { %47 = dma.hbm_to_vmem [thread:$0]  %s758_s2, 16, %s45_s23, [#allocation7]  }
  0x46   :  { %s635_s18 = smov [#allocation11]   ;;  %s577_s24 = scalar_lea.hbm %s760_s4, 16 }
  0x47   :  { %s64_s19 = sshll.u32 %s635_s18, 4  ;;  %p578_p4 = scmp.ne.s32.totalorder %s760_s4, %s577_s24  ;;  %s65_s19 = int_to_ptr.vmem [resolvable:$true] %s64_s19 }
  0x48   :  { %p581_p5 = scmp.lt.u32.totalorder %s577_s24, %s760_s4 }
  0x4a   :  { %p583_p6 = pnand %p581_p5, %p578_p4 }
  0x4c   :  { %586 = shalt.err (!%p583_p6)
}
  0x4d   :  { %s587_s29 = scalar_lea.vmem %s65_s19, 16  ;;  %s591_s2 = scalar_lea.vmem %s65_s19, 32 }
  0x4e   :  { %p588_p7 = scmp.ne.s32.totalorder %s65_s19, %s587_s29  ;;  %p592_p8 = scmp.lt.s32.totalorder %s65_s19, %s65_s19 }
  0x4f   :  { %p593_p9 = scmp.lt.s32.totalorder %s591_s2, %s587_s29 }
  0x51   :  { %p594_p10 = por %p593_p9, %p592_p8 }
  0x53   :  { %p595_p11 = pnand %p594_p10, %p588_p7 }
  0x55   :  { %598 = shalt.err (!%p595_p11)
}
  0x56   :  { %67 = dma.hbm_to_vmem [thread:$0]  %s760_s4, 16, %s65_s19, [#allocation10]  }
  0x57   :  { %621 = dma.done.wait [#allocation4], 256  }
  0x58   :  { %622 = vsyncadd [#allocation4], 4294967040 }
  0x59   :  { %623 = dma.done.wait [#allocation7], 1040  }
  0x5a   :  { %624 = vsyncadd [#allocation7], 4294966256 }
  0x5b   :  { %625 = dma.done.wait [#allocation10], 32  }
  0x5c   :  { %626 = vsyncadd [#allocation10], 4294967264  ;;  %v463_v0 = vld [vmem:[#allocation6] sm:$0xff]   ;;  %v464_v1 = vld [vmem:[#allocation6 + $0x8] sm:$0xff]   ;;  %s636_s4 = smov [#allocation12]  }
  0x5d   :  { %435 = vmatprep.subr.bf16.mxu0 %v463_v0  ;;  %v465_v2 = vld [vmem:[#allocation6 + $0x10] sm:$0xff]   ;;  %v466_v3 = vld [vmem:[#allocation6 + $0x18] sm:$0xff]   ;;  %v467_v5 = vld [vmem:[#allocation6 + $0x20] sm:$0xff]   ;;  %s379_s3 = sshll.u32 %s636_s4, 4  ;;  %s380_s3 = int_to_ptr.vmem [resolvable:$true] %s379_s3 }
  0x5e   :  { %436 = vmatpush3.bf16.msra.mxu0 %v463_v0  ;;  %v471_v4 = vld [vmem:[#allocation3] sm:$0xff]   ;;  %v468_v6 = vld [vmem:[#allocation6 + $0x28] sm:$0xff]   ;;  %v470_v8 = vld [vmem:[#allocation6 + $0x38] sm:$0xff]   ;;  %s599_s21 = scalar_lea.vmem %s380_s3, 256  ;;  %p604_p13 = scmp.lt.s32.totalorder %s380_s3, %s380_s3 }
  0x5f   :  { %437 = vmatprep.subr.bf16.mxu0 %v464_v1  ;;  %451 = vmatprep.mubr.bf16.mxu0 %v471_v4  ;;  %v469_v7 = vld [vmem:[#allocation6 + $0x30] sm:$0xff]   ;;  %v472_v9 = vld [vmem:[#allocation3 + $0x8] sm:$0xff]   ;;  %v403_v10 = vld [vmem:[#allocation8] ss:$0 sm:$0xff]  ;;  %p600_p12 = scmp.ne.s32.totalorder %s380_s3, %s599_s21  ;;  %p605_p0 = scmp.lt.s32.totalorder %s599_s21, %s599_s21 }
  0x61   :  { %p606_p1 = por %p605_p0, %p604_p13 }
  0x62   :  { %438 = vmatpush3.bf16.msra.mxu0 %v464_v1 }
  0x63   :  { %439 = vmatprep.subr.bf16.mxu0 %v465_v2  ;;  %p607_p2 = pnand %p606_p1, %p600_p12 }
  0x66   :  { %440 = vmatpush3.bf16.msra.mxu0 %v465_v2 }
  0x67   :  { %441 = vmatprep.subr.bf16.mxu0 %v466_v3 }
  0x6a   :  { %442 = vmatpush3.bf16.msra.mxu0 %v466_v3 }
  0x6b   :  { %443 = vmatprep.subr.bf16.mxu0 %v467_v5 }
  0x6e   :  { %444 = vmatpush3.bf16.msra.mxu0 %v467_v5 }
  0x6f   :  { %445 = vmatprep.subr.bf16.mxu0 %v468_v6 }
  0x72   :  { %446 = vmatpush3.bf16.msra.mxu0 %v468_v6 }
  0x73   :  { %447 = vmatprep.subr.bf16.mxu0 %v469_v7 }
  0x76   :  { %448 = vmatpush3.bf16.msra.mxu0 %v469_v7 }
  0x77   :  { %449 = vmatprep.subr.bf16.mxu0 %v470_v8 }
  0x7a   :  { %450 = vmatpush3.bf16.msra.mxu0 %v470_v8 }
  0x7d   :  { %452 = vmatmul.mubr.bf16.vlgmr.msra.gmra.mrb[0].mxu0 %v472_v9 }
 0x150   :  { %v453_v11 = vpop.f32.mrb[0].mxu0 }
 0x151   :  { %v249_v12 = vadd.f32 %v453_v11, %v403_v10  ;;  %v210_v13 = vpop.f32.mrb[1].mxu0 }
 0x152   :  { %v247_v14 = vadd.f32 %v403_v10, %v210_v13  ;;  %v454_v15 = vpop.f32.mrb[2].mxu0 }
 0x153   :  { %v257_v16 = vmul.f32 0.044715, %v249_v12  ;;  %v250_v17 = vadd.f32 %v454_v15, %v403_v10  ;;  %v213_v18 = vpop.f32.mrb[3].mxu0  ;;  %v253_v41 = vmul.f32 0.5, %v249_v12 }
 0x154   :  { %v255_v19 = vmul.f32 0.044715, %v247_v14  ;;  %v248_v20 = vadd.f32 %v403_v10, %v213_v18  ;;  %v251_v44 = vmul.f32 0.5, %v247_v14 }
 0x155   :  { %v258_v21 = vmul.f32 0.044715, %v250_v17  ;;  %v261_v22 = vmul.f32 %v257_v16, %v249_v12  ;;  %v254_v51 = vmul.f32 0.5, %v250_v17 }
 0x156   :  { %v256_v23 = vmul.f32 0.044715, %v248_v20  ;;  %v259_v24 = vmul.f32 %v255_v19, %v247_v14  ;;  %v252_v52 = vmul.f32 0.5, %v248_v20 }
 0x157   :  { %v265_v25 = vmul.f32 %v261_v22, %v249_v12  ;;  %v262_v26 = vmul.f32 %v258_v21, %v250_v17  ;;  %v404_v21 = vld [vmem:[#allocation9] ss:$0 sm:$0xff] }
 0x158   :  { %v263_v27 = vmul.f32 %v259_v24, %v247_v14  ;;  %v260_v28 = vmul.f32 %v256_v23, %v248_v20 }
 0x159   :  { %v269_v29 = vadd.f32 %v265_v25, %v249_v12  ;;  %v266_v30 = vmul.f32 %v262_v26, %v250_v17 }
 0x15a   :  { %v267_v31 = vadd.f32 %v263_v27, %v247_v14  ;;  %v264_v32 = vmul.f32 %v260_v28, %v248_v20  ;;  %v405_v27 = vld [vmem:[#allocation11] ss:$0 sm:$0xff] }
 0x15b   :  { %v273_v33 = vmul.f32 0.7978846, %v269_v29  ;;  %v270_v34 = vadd.f32 %v266_v30, %v250_v17 }
 0x15c   :  { %v271_v35 = vmul.f32 0.7978846, %v267_v31  ;;  %v268_v36 = vadd.f32 %v264_v32, %v248_v20 }
 0x15d   :  { %473 = vtanh.f32 %v273_v33  ;;  %v274_v37 = vmul.f32 0.7978846, %v270_v34 }
 0x15e   :  { %475 = vtanh.f32 %v271_v35  ;;  %v272_v38 = vmul.f32 0.7978846, %v268_v36 }
 0x15f   :  { %477 = vtanh.f32 %v274_v37 }
 0x160   :  { %479 = vtanh.f32 %v272_v38 }
 0x167   :  { %v474_v39 = vpop.eup %473 }
 0x168   :  { %v476_v40 = vpop.eup %475  ;;  %v281_v42 = vadd.f32 1.0, %v474_v39 }
 0x169   :  { %v478_v43 = vpop.eup %477  ;;  %v279_v45 = vadd.f32 1.0, %v476_v40 }
 0x16a   :  { %v480_v46 = vpop.eup %479  ;;  %v285_v47 = vmul.f32 %v281_v42, %v253_v41  ;;  %v282_v48 = vadd.f32 1.0, %v478_v43 }
 0x16b   :  { %v283_v49 = vmul.f32 %v279_v45, %v251_v44  ;;  %v280_v50 = vadd.f32 1.0, %v480_v46 }
 0x16c   :  { %291 = vadd.xlane.f32.xlu1 %v285_v47  ;;  %v286_v53 = vmul.f32 %v282_v48, %v254_v51 }
 0x16d   :  { %287 = vadd.xlane.f32.xlu0 %v283_v49  ;;  %v284_v54 = vmul.f32 %v280_v50, %v252_v52 }
 0x170   :  { %293 = vadd.xlane.f32.xlu1 %v286_v53 }
 0x171   :  { %289 = vadd.xlane.f32.xlu0 %v284_v54 }
 0x1f9   :  { %v292_v55 = vpop.xlane.xlu1 %291 }
 0x1fa   :  { %v288_v56 = vpop.xlane.xlu0 %287  ;;  %v298_v57 = vmul.f32 0.0078125, %v292_v55 }
 0x1fb   :  { %v296_v58 = vmul.f32 0.0078125, %v288_v56 }
 0x1fc   :  { %v302_v62 = vsub.f32 %v285_v47, %v298_v57 }
 0x1fd   :  { %v300_v59 = vsub.f32 %v283_v49, %v296_v58  ;;  %v294_v60 = vpop.xlane.xlu1 %293 }
 0x1fe   :  { %v290_v61 = vpop.xlane.xlu0 %289  ;;  %v299_v63 = vmul.f32 0.0078125, %v294_v60  ;;  %v306_v4 = vmul.f32 %v302_v62, %v302_v62 }
 0x1ff   :  { %v297_v0 = vmul.f32 0.0078125, %v290_v61  ;;  %v304_v1 = vmul.f32 %v300_v59, %v300_v59 }
 0x200   :  { %v303_v3 = vsub.f32 %v286_v53, %v299_v63 }
 0x201   :  { %v301_v2 = vsub.f32 %v284_v54, %v297_v0  ;;  %308 = vadd.xlane.f32.xlu0 %v304_v1 }
 0x202   :  { %v307_v6 = vmul.f32 %v303_v3, %v303_v3 }
 0x203   :  { %v305_v5 = vmul.f32 %v301_v2, %v301_v2 }
 0x205   :  { %312 = vadd.xlane.f32.xlu0 %v306_v4  ;;  %310 = vadd.xlane.f32.xlu1 %v305_v5 }
 0x209   :  { %314 = vadd.xlane.f32.xlu1 %v307_v6 }
 0x28e   :  { %v309_v7 = vpop.xlane.xlu0 %308 }
 0x28f   :  { %v316_v8 = vmul.f32 0.0078125, %v309_v7 }
 0x291   :  { %v320_v9 = vadd.f32 1e-12, %v316_v8 }
 0x292   :  { %v311_v10 = vpop.xlane.xlu1 %310  ;;  %v313_v11 = vpop.xlane.xlu0 %312 }
 0x293   :  { %481 = vrsqrt.f32 %v320_v9  ;;  %v317_v12 = vmul.f32 0.0078125, %v311_v10  ;;  %v318_v13 = vmul.f32 0.0078125, %v313_v11 }
 0x295   :  { %v321_v14 = vadd.f32 1e-12, %v317_v12  ;;  %v322_v15 = vadd.f32 1e-12, %v318_v13 }
 0x296   :  { %v315_v16 = vpop.xlane.xlu1 %314 }
 0x297   :  { %483 = vrsqrt.f32 %v321_v14  ;;  %v319_v17 = vmul.f32 0.0078125, %v315_v16 }
 0x298   :  { %485 = vrsqrt.f32 %v322_v15 }
 0x299   :  { %v323_v18 = vadd.f32 1e-12, %v319_v17 }
 0x29b   :  { %487 = vrsqrt.f32 %v323_v18 }
 0x29d   :  { %v482_v19 = vpop.eup %481 }
 0x29e   :  { %v328_v20 = vmul.f32 %v482_v19, %v300_v59 }
 0x2a0   :  { %v339_v25 = vmul.f32 %v404_v21, %v328_v20 }
 0x2a1   :  { %v484_v22 = vpop.eup %483 }
 0x2a2   :  { %v486_v23 = vpop.eup %485  ;;  %v329_v24 = vmul.f32 %v484_v22, %v301_v2  ;;  %v350_v32 = vadd.f32 %v405_v27, %v339_v25 }
 0x2a3   :  { %v330_v26 = vmul.f32 %v486_v23, %v302_v62 }
 0x2a4   :  { %v340_v28 = vmul.f32 %v404_v21, %v329_v24 }
 0x2a5   :  { %v488_v29 = vpop.eup %487  ;;  %v341_v31 = vmul.f32 %v404_v21, %v330_v26 }
 0x2a6   :  { %v331_v30 = vmul.f32 %v488_v29, %v303_v3  ;;  %v351_v33 = vadd.f32 %v405_v27, %v340_v28 }
 0x2a7   :  { %v352_v36 = vadd.f32 %v405_v27, %v341_v31 }
 0x2a8   :  { %v342_v34 = vmul.f32 %v404_v21, %v331_v30  ;;  %v417_v35 = vpack.c.bf16 %v351_v33, %v350_v32 }
 0x2aa   :  { %v353_v37 = vadd.f32 %v405_v27, %v342_v34  ;;  %418 = vst [vmem:[#allocation12] sm:$0xff] %v417_v35  }
 0x2ac   :  { %v422_v38 = vpack.c.bf16 %v353_v37, %v352_v36 }
 0x2ae   :  { %424 = vst [vmem:[#allocation12 + $0x8] sm:$0xff] %v422_v38  }
 0x2af   :  { %610 = shalt.err (!%p607_p2)
}
 0x2b0   :  { %s611_s10 = scalar_lea.hbm %s761_s5, 256 }
 0x2b1   :  { %p612_p3 = scmp.ne.s32.totalorder %s761_s5, %s611_s10  ;;  %p615_p4 = scmp.lt.u32.totalorder %s611_s10, %s761_s5 }
 0x2b3   :  { %p617_p5 = pnand %p615_p4, %p612_p3 }
 0x2b5   :  { %620 = shalt.err (!%p617_p5)
}
 0x2b6   :  { %385 = dma.vmem_to_hbm [thread:$0]  %s380_s3, 256, %s761_s5, [#allocation5], %s631_s30, %s631_s30, %s632_s6  }
 0x2b7   :  { %627 = dma.done.wait [#allocation5], 256  }
 0x2b8   :  { %628 = vsyncadd [#allocation5], 4294967040 }
 0x2b9   :  { %389 = vsyncpa [#allocation4], 1 }
 0x2ba   :  { %390 = vsyncpa [#allocation7], 1 }
 0x2bb   :  { %391 = vsyncpa [#allocation10], 1 }
 0x2bc   :  { %392 = vsyncpa [#allocation5], 1 }

// kernel: stage1_forward.127
= control target key start
LH: loop header
LB: loop body
LE: loop exit
PB: predicated region body
PF: predicated region fallthrough
CT: control target
= control target key end

     0   :  { %8 = vsyncpa [#allocation4], 0  ;;  %s424_s0 = inlined_call_operand.hbm [shape: bf16[2,128], index: 0, kind: input, shape index: {}]   ;;  %s425_s1 = inlined_call_operand.hbm [shape: bf16[128,2], index: 1, kind: input, shape index: {}]   ;;  %s426_s2 = inlined_call_operand.hbm [shape: f32[1,2], index: 2, kind: input, shape index: {}]   ;;  %s427_s3 = inlined_call_operand.hbm [shape: f32[2,2], index: 3, kind: output, shape index: {}]  }
   0x1   :  { %9 = vsyncpa [#allocation7], 0 }
   0x2   :  { %10 = vsyncpa [#allocation5], 0  ;;  %s345_s12 = smov [#allocation6]   ;;  %s251_s16 = scalar_lea.hbm %s425_s1, 1024 }
   0x3   :  { %s26_s13 = sshll.u32 %s345_s12, 4  ;;  %p252_p0 = scmp.ne.s32.totalorder %s425_s1, %s251_s16  ;;  %s27_s13 = int_to_ptr.vmem [resolvable:$true] %s26_s13 }
   0x4   :  { %p255_p1 = scmp.lt.u32.totalorder %s251_s16, %s425_s1 }
   0x6   :  { %p257_p2 = pnand %p255_p1, %p252_p0 }
   0x8   :  { %260 = shalt.err (!%p257_p2)
}
   0x9   :  { %s261_s21 = scalar_lea.vmem %s27_s13, 1024  ;;  %p266_p4 = scmp.lt.s32.totalorder %s27_s13, %s27_s13 }
   0xa   :  { %p262_p3 = scmp.ne.s32.totalorder %s27_s13, %s261_s21  ;;  %p267_p5 = scmp.lt.s32.totalorder %s261_s21, %s261_s21 }
   0xc   :  { %p268_p6 = por %p267_p5, %p266_p4 }
   0xe   :  { %p269_p7 = pnand %p268_p6, %p262_p3 }
  0x10   :  { %272 = shalt.err (!%p269_p7)
}
  0x11   :  { %s346_s22 = smov 64   ;;  %s347_s23 = smov 4  }
  0x12   :  { %32 = dma.hbm_to_vmem [thread:$0]  %s425_s1, 1024, %s27_s13, [#allocation7], %s346_s22, %s346_s22, %s347_s23  }
  0x13   :  { %s348_s26 = smov [#allocation3]   ;;  %s349_s28 = smov [#allocation8]  }
  0x14   :  { %s17_s27 = sshll.u32 %s348_s26, 4  ;;  %s39_s29 = sshll.u32 %s349_s28, 4  ;;  %s18_s27 = int_to_ptr.vmem [resolvable:$true] %s17_s27  ;;  %s40_s29 = int_to_ptr.vmem [resolvable:$true] %s39_s29 }
  0x15   :  { %s273_s5 = scalar_lea.hbm %s424_s0, 16 }
  0x16   :  { %p274_p8 = scmp.ne.s32.totalorder %s424_s0, %s273_s5  ;;  %p277_p9 = scmp.lt.u32.totalorder %s273_s5, %s424_s0 }
  0x18   :  { %p279_p10 = pnand %p277_p9, %p274_p8 }
  0x1a   :  { %282 = shalt.err (!%p279_p10)
}
  0x1b   :  { %s283_s1 = scalar_lea.vmem %s18_s27, 16  ;;  %s287_s10 = scalar_lea.vmem %s18_s27, 32 }
  0x1c   :  { %p284_p11 = scmp.ne.s32.totalorder %s18_s27, %s283_s1  ;;  %p288_p12 = scmp.lt.s32.totalorder %s18_s27, %s18_s27 }
  0x1d   :  { %p289_p13 = scmp.lt.s32.totalorder %s287_s10, %s283_s1 }
  0x1f   :  { %p290_p0 = por %p289_p13, %p288_p12 }
  0x21   :  { %p291_p1 = pnand %p290_p0, %p284_p11 }
  0x23   :  { %294 = shalt.err (!%p291_p1)
}
  0x24   :  { %20 = dma.hbm_to_vmem [thread:$0]  %s424_s0, 16, %s18_s27, [#allocation4]  }
  0x25   :  { %s295_s15 = scalar_lea.hbm %s426_s2, 16 }
  0x26   :  { %p296_p2 = scmp.ne.s32.totalorder %s426_s2, %s295_s15  ;;  %p299_p3 = scmp.lt.u32.totalorder %s295_s15, %s426_s2 }
  0x28   :  { %p301_p4 = pnand %p299_p3, %p296_p2 }
  0x2a   :  { %304 = shalt.err (!%p301_p4)
}
  0x2b   :  { %s305_s20 = scalar_lea.vmem %s40_s29, 16  ;;  %s309_s21 = scalar_lea.vmem %s40_s29, 32 }
  0x2c   :  { %p306_p5 = scmp.ne.s32.totalorder %s40_s29, %s305_s20  ;;  %p310_p6 = scmp.lt.s32.totalorder %s40_s29, %s40_s29 }
  0x2d   :  { %p311_p7 = scmp.lt.s32.totalorder %s309_s21, %s305_s20 }
  0x2f   :  { %p312_p8 = por %p311_p7, %p310_p6 }
  0x31   :  { %p313_p9 = pnand %p312_p8, %p306_p5 }
  0x33   :  { %316 = shalt.err (!%p313_p9)
}
  0x34   :  { %42 = dma.hbm_to_vmem [thread:$0]  %s426_s2, 16, %s40_s29, [#allocation7]  }
  0x35   :  { %339 = dma.done.wait [#allocation4], 16  }
  0x36   :  { %340 = vsyncadd [#allocation4], 4294967280 }
  0x37   :  { %341 = dma.done.wait [#allocation7], 1040  }
  0x38   :  { %342 = vsyncadd [#allocation7], 4294966256  ;;  %vm57_vm0 = vcmask 9216   ;;  %v350_v0 = vmov 0.0   ;;  %vm351_vm1 = vmmov 0   ;;  %v243_v1 = vld [vmem:[#allocation6] sm:$0xff]  }
  0x39   :  { %215 = vmatprep.subr.bf16.mxu0 %v350_v0  ;;  %231 = vmatprep.mubr.msk.bf16.mxu0 %vm351_vm1, %v350_v0  ;;  %58 = vst.msk [vmem:[#allocation2] sm:$0x3] %vm57_vm0, %v350_v0  ;;  %v244_v2 = vld [vmem:[#allocation6 + $0x8] sm:$0xff]   ;;  %v245_v3 = vld [vmem:[#allocation6 + $0x10] sm:$0xff]   ;;  %v246_v4 = vld [vmem:[#allocation6 + $0x18] sm:$0xff]   ;;  %s352_s2 = smov [#allocation9]  }
  0x3a   :  { %216 = vmatpush3.bf16.msra.mxu0 %v243_v1  ;;  %v247_v5 = vld [vmem:[#allocation6 + $0x20] sm:$0xff]   ;;  %v248_v6 = vld [vmem:[#allocation6 + $0x28] sm:$0xff]   ;;  %v249_v7 = vld [vmem:[#allocation6 + $0x30] sm:$0xff]   ;;  %s187_s23 = sshll.u32 %s352_s2, 4  ;;  %s188_s23 = int_to_ptr.vmem [resolvable:$true] %s187_s23 }
  0x3b   :  { %217 = vmatprep.subr.bf16.mxu0 %v350_v0  ;;  %v250_v8 = vld [vmem:[#allocation6 + $0x38] sm:$0xff]   ;;  %v205_v16 = vld [vmem:[#allocation8] ss:$0 sm:$0xff]  ;;  %s317_s24 = scalar_lea.vmem %s188_s23, 32  ;;  %p322_p11 = scmp.lt.s32.totalorder %s188_s23, %s188_s23 }
  0x3c   :  { %v60_v9 = vld [vmem:[#allocation3] sm:$0x1]  ;;  %p318_p10 = scmp.ne.s32.totalorder %s188_s23, %s317_s24  ;;  %p323_p12 = scmp.lt.s32.totalorder %s317_s24, %s317_s24 }
  0x3e   :  { %218 = vmatpush3.bf16.msra.mxu0 %v244_v2  ;;  %p324_p13 = por %p323_p12, %p322_p11 }
  0x3f   :  { %219 = vmatprep.subr.bf16.mxu0 %v350_v0 }
  0x40   :  { %v59_v10 = vld [vmem:[#allocation2] sm:$0x3]  ;;  %p325_p0 = pnand %p324_p13, %p318_p10 }
  0x42   :  { %220 = vmatpush3.bf16.msra.mxu0 %v245_v3 }
  0x43   :  { %221 = vmatprep.subr.bf16.mxu0 %v350_v0 }
  0x46   :  { %222 = vmatpush3.bf16.msra.mxu0 %v246_v4 }
  0x47   :  { %223 = vmatprep.subr.bf16.mxu0 %v350_v0 }
  0x4a   :  { %224 = vmatpush3.bf16.msra.mxu0 %v247_v5 }
  0x4b   :  { %225 = vmatprep.subr.bf16.mxu0 %v350_v0 }
  0x4e   :  { %226 = vmatpush3.bf16.msra.mxu0 %v248_v6 }
  0x4f   :  { %227 = vmatprep.subr.bf16.mxu0 %v350_v0 }
  0x52   :  { %228 = vmatpush3.bf16.msra.mxu0 %v249_v7 }
  0x53   :  { %229 = vmatprep.subr.bf16.mxu0 %v350_v0 }
  0x56   :  { %230 = vmatpush3.bf16.msra.mxu0 %v250_v8 }
  0x59   :  { %232 = vmatmul.mubr.bf16.vlgmr.msra.gmra.mrb[0].mxu0 %v60_v9 }
 0x12c   :  { %v159_v11 = vpop.f32.mrb[0].mxu0 }
 0x12d   :  { %v165_v12 = vadd.f32 %v159_v11, %v59_v10  ;;  %v233_v13 = vpop.f32.mrb[1].mxu0 }
 0x12e   :  { %v162_v14 = vpop.f32.mrb[2].mxu0 }
 0x12f   :  { %167 = vst.msk [vmem:[#allocation2] sm:$0x3] %vm57_vm0, %v165_v12  ;;  %v234_v15 = vpop.f32.mrb[3].mxu0 }
 0x136   :  { %v171_v17 = vld [vmem:[#allocation2] sm:$0x3] }
 0x137   :  { %v179_v18 = vadd.f32 %v205_v16, %v171_v17 }
 0x139   :  { %180 = vst.msk [vmem:[#allocation9] sm:$0x3] %vm57_vm0, %v179_v18 }
 0x13a   :  { %328 = shalt.err (!%p325_p0)
}
 0x13b   :  { %s329_s27 = scalar_lea.hbm %s427_s3, 32 }
 0x13c   :  { %p330_p1 = scmp.ne.s32.totalorder %s427_s3, %s329_s27  ;;  %p333_p2 = scmp.lt.u32.totalorder %s329_s27, %s427_s3 }
 0x13e   :  { %p335_p3 = pnand %p333_p2, %p330_p1 }
 0x140   :  { %338 = shalt.err (!%p335_p3)
}
 0x141   :  { %190 = dma.vmem_to_hbm [thread:$0]  %s188_s23, 32, %s427_s3, [#allocation5]  }
 0x142   :  { %343 = dma.done.wait [#allocation5], 32  }
 0x143   :  { %344 = vsyncadd [#allocation5], 4294967264 }
 0x144   :  { %194 = vsyncpa [#allocation4], 1 }
 0x145   :  { %195 = vsyncpa [#allocation7], 1 }
 0x146   :  { %196 = vsyncpa [#allocation5], 1 }

// kernel: stage1_forward.68
= control target key start
LH: loop header
LB: loop body
LE: loop exit
PB: predicated region body
PF: predicated region fallthrough
CT: control target
= control target key end

     0   :  { %11 = vsyncpa [#allocation4], 0  ;;  %s1153_s0 = inlined_call_operand.hbm [shape: bf16[32,512], index: 0, kind: input, shape index: {}]   ;;  %s1154_s1 = inlined_call_operand.hbm [shape: bf16[512,128], index: 1, kind: input, shape index: {}]   ;;  %s1155_s2 = inlined_call_operand.hbm [shape: f32[1,128], index: 2, kind: input, shape index: {}]   ;;  %s1156_s3 = inlined_call_operand.hbm [shape: bf16[32,128], index: 3, kind: input, shape index: {}]   ;;  %s1157_s4 = inlined_call_operand.hbm [shape: f32[1,128], index: 4, kind: input, shape index: {}]   ;;  %s1158_s5 = inlined_call_operand.hbm [shape: f32[1,128], index: 5, kind: input, shape index: {}]   ;;  %s1159_s6 = inlined_call_operand.hbm [shape: bf16[32,128], index: 6, kind: output, shape index: {}]  }
   0x1   :  { %12 = vsyncpa [#allocation7], 0 }
   0x2   :  { %13 = vsyncpa [#allocation10], 0 }
   0x3   :  { %14 = vsyncpa [#allocation13], 0 }
   0x4   :  { %15 = vsyncpa [#allocation5], 0  ;;  %s1014_s21 = smov [#allocation6]   ;;  %s850_s25 = scalar_lea.hbm %s1154_s1, 4096 }
   0x5   :  { %s33_s22 = sshll.u32 %s1014_s21, 4  ;;  %p851_p0 = scmp.ne.s32.totalorder %s1154_s1, %s850_s25  ;;  %s34_s22 = int_to_ptr.vmem [resolvable:$true] %s33_s22 }
   0x6   :  { %p854_p1 = scmp.lt.u32.totalorder %s850_s25, %s1154_s1 }
   0x8   :  { %p856_p2 = pnand %p854_p1, %p851_p0 }
   0xa   :  { %859 = shalt.err (!%p856_p2)
}
   0xb   :  { %s860_s30 = scalar_lea.vmem %s34_s22, 4096  ;;  %p865_p4 = scmp.lt.s32.totalorder %s34_s22, %s34_s22 }
   0xc   :  { %p861_p3 = scmp.ne.s32.totalorder %s34_s22, %s860_s30  ;;  %p866_p5 = scmp.lt.s32.totalorder %s860_s30, %s860_s30 }
   0xe   :  { %p867_p6 = por %p866_p5, %p865_p4 }
  0x10   :  { %p868_p7 = pnand %p867_p6, %p861_p3 }
  0x12   :  { %871 = shalt.err (!%p868_p7)
}
  0x13   :  { %s1015_s7 = smov 64   ;;  %s1016_s8 = smov 4  }
  0x14   :  { %39 = dma.hbm_to_vmem [thread:$0]  %s1154_s1, 4096, %s34_s22, [#allocation7], %s1015_s7, %s1015_s7, %s1016_s8  }
  0x15   :  { %s1017_s11 = smov [#allocation9]   ;;  %s1018_s13 = smov [#allocation3]  }
  0x16   :  { %s55_s12 = sshll.u32 %s1017_s11, 4  ;;  %s21_s14 = sshll.u32 %s1018_s13, 4  ;;  %s56_s12 = int_to_ptr.vmem [resolvable:$true] %s55_s12  ;;  %s22_s14 = int_to_ptr.vmem [resolvable:$true] %s21_s14 }
  0x17   :  { %s872_s17 = scalar_lea.hbm %s1156_s3, 256 }
  0x18   :  { %p873_p8 = scmp.ne.s32.totalorder %s1156_s3, %s872_s17  ;;  %p876_p9 = scmp.lt.u32.totalorder %s872_s17, %s1156_s3 }
  0x1a   :  { %p878_p10 = pnand %p876_p9, %p873_p8 }
  0x1c   :  { %881 = shalt.err (!%p878_p10)
}
  0x1d   :  { %s882_s1 = scalar_lea.vmem %s56_s12, 256  ;;  %p887_p12 = scmp.lt.s32.totalorder %s56_s12, %s56_s12 }
  0x1e   :  { %p883_p11 = scmp.ne.s32.totalorder %s56_s12, %s882_s1  ;;  %p888_p13 = scmp.lt.s32.totalorder %s882_s1, %s882_s1 }
  0x20   :  { %p889_p0 = por %p888_p13, %p887_p12 }
  0x22   :  { %p890_p1 = pnand %p889_p0, %p883_p11 }
  0x24   :  { %893 = shalt.err (!%p890_p1)
}
  0x25   :  { %61 = dma.hbm_to_vmem [thread:$0]  %s1156_s3, 256, %s56_s12, [#allocation10], %s1015_s7, %s1015_s7, %s1016_s8  }
  0x26   :  { %s894_s26 = scalar_lea.hbm %s1153_s0, 1024 }
  0x27   :  { %p895_p2 = scmp.ne.s32.totalorder %s1153_s0, %s894_s26  ;;  %p898_p3 = scmp.lt.u32.totalorder %s894_s26, %s1153_s0 }
  0x29   :  { %p900_p4 = pnand %p898_p3, %p895_p2 }
  0x2b   :  { %903 = shalt.err (!%p900_p4)
}
  0x2c   :  { %s904_s9 = scalar_lea.vmem %s22_s14, 1024  ;;  %p909_p6 = scmp.lt.s32.totalorder %s22_s14, %s22_s14 }
  0x2d   :  { %p905_p5 = scmp.ne.s32.totalorder %s22_s14, %s904_s9  ;;  %p910_p7 = scmp.lt.s32.totalorder %s904_s9, %s904_s9 }
  0x2f   :  { %p911_p8 = por %p910_p7, %p909_p6 }
  0x31   :  { %p912_p9 = pnand %p911_p8, %p905_p5 }
  0x33   :  { %915 = shalt.err (!%p912_p9)
}
  0x34   :  { %s1019_s3 = smov 256   ;;  %s1020_s10 = smov 16  }
  0x35   :  { %27 = dma.hbm_to_vmem [thread:$0]  %s1153_s0, 1024, %s22_s14, [#allocation4], %s1019_s3, %s1019_s3, %s1020_s10  }
  0x36   :  { %s1021_s13 = smov [#allocation8]   ;;  %s1022_s16 = smov [#allocation11]  }
  0x37   :  { %s46_s15 = sshll.u32 %s1021_s13, 4  ;;  %s68_s17 = sshll.u32 %s1022_s16, 4  ;;  %s47_s15 = int_to_ptr.vmem [resolvable:$true] %s46_s15  ;;  %s69_s17 = int_to_ptr.vmem [resolvable:$true] %s68_s17 }
  0x38   :  { %s916_s20 = scalar_lea.hbm %s1155_s2, 16 }
  0x39   :  { %p917_p10 = scmp.ne.s32.totalorder %s1155_s2, %s916_s20  ;;  %p920_p11 = scmp.lt.u32.totalorder %s916_s20, %s1155_s2 }
  0x3b   :  { %p922_p12 = pnand %p920_p11, %p917_p10 }
  0x3d   :  { %925 = shalt.err (!%p922_p12)
}
  0x3e   :  { %s926_s0 = scalar_lea.vmem %s47_s15, 16  ;;  %s930_s14 = scalar_lea.vmem %s47_s15, 32 }
  0x3f   :  { %p927_p13 = scmp.ne.s32.totalorder %s47_s15, %s926_s0  ;;  %p931_p0 = scmp.lt.s32.totalorder %s47_s15, %s47_s15 }
  0x40   :  { %p932_p1 = scmp.lt.s32.totalorder %s930_s14, %s926_s0 }
  0x42   :  { %p933_p2 = por %p932_p1, %p931_p0 }
  0x44   :  { %p934_p3 = pnand %p933_p2, %p927_p13 }
  0x46   :  { %937 = shalt.err (!%p934_p3)
}
  0x47   :  { %49 = dma.hbm_to_vmem [thread:$0]  %s1155_s2, 16, %s47_s15, [#allocation7]  }
  0x48   :  { %s938_s28 = scalar_lea.hbm %s1157_s4, 16 }
  0x49   :  { %p939_p4 = scmp.ne.s32.totalorder %s1157_s4, %s938_s28  ;;  %p942_p5 = scmp.lt.u32.totalorder %s938_s28, %s1157_s4 }
  0x4b   :  { %p944_p6 = pnand %p942_p5, %p939_p4 }
  0x4d   :  { %947 = shalt.err (!%p944_p6)
}
  0x4e   :  { %s948_s10 = scalar_lea.vmem %s69_s17, 16  ;;  %s952_s11 = scalar_lea.vmem %s69_s17, 32 }
  0x4f   :  { %p949_p7 = scmp.ne.s32.totalorder %s69_s17, %s948_s10  ;;  %p953_p8 = scmp.lt.s32.totalorder %s69_s17, %s69_s17 }
  0x50   :  { %p954_p9 = scmp.lt.s32.totalorder %s952_s11, %s948_s10 }
  0x52   :  { %p955_p10 = por %p954_p9, %p953_p8 }
  0x54   :  { %p956_p11 = pnand %p955_p10, %p949_p7 }
  0x56   :  { %959 = shalt.err (!%p956_p11)
}
  0x57   :  { %71 = dma.hbm_to_vmem [thread:$0]  %s1157_s4, 16, %s69_s17, [#allocation10]  }
  0x58   :  { %s1023_s13 = smov [#allocation12]   ;;  %s960_s19 = scalar_lea.hbm %s1158_s5, 16 }
  0x59   :  { %s78_s15 = sshll.u32 %s1023_s13, 4  ;;  %p961_p12 = scmp.ne.s32.totalorder %s1158_s5, %s960_s19  ;;  %s79_s15 = int_to_ptr.vmem [resolvable:$true] %s78_s15 }
  0x5a   :  { %p964_p13 = scmp.lt.u32.totalorder %s960_s19, %s1158_s5 }
  0x5c   :  { %p966_p0 = pnand %p964_p13, %p961_p12 }
  0x5e   :  { %969 = shalt.err (!%p966_p0)
}
  0x5f   :  { %s970_s23 = scalar_lea.vmem %s79_s15, 16  ;;  %s974_s4 = scalar_lea.vmem %s79_s15, 32 }
  0x60   :  { %p971_p1 = scmp.ne.s32.totalorder %s79_s15, %s970_s23  ;;  %p975_p2 = scmp.lt.s32.totalorder %s79_s15, %s79_s15 }
  0x61   :  { %p976_p3 = scmp.lt.s32.totalorder %s974_s4, %s970_s23 }
  0x63   :  { %p977_p4 = por %p976_p3, %p975_p2 }
  0x65   :  { %p978_p5 = pnand %p977_p4, %p971_p1 }
  0x67   :  { %981 = shalt.err (!%p978_p5)
}
  0x68   :  { %81 = dma.hbm_to_vmem [thread:$0]  %s1158_s5, 16, %s79_s15, [#allocation13]  }
  0x69   :  { %1004 = dma.done.wait [#allocation4], 1024  }
  0x6a   :  { %1005 = vsyncadd [#allocation4], 4294966272 }
  0x6b   :  { %1006 = dma.done.wait [#allocation7], 4112  }
  0x6c   :  { %1007 = vsyncadd [#allocation7], 4294963184 }
  0x6d   :  { %1008 = dma.done.wait [#allocation10], 272  }
  0x6e   :  { %1009 = vsyncadd [#allocation10], 4294967024 }
  0x6f   :  { %1010 = dma.done.wait [#allocation13], 16  }
  0x70   :  { %1011 = vsyncadd [#allocation13], 4294967280  ;;  %v798_v0 = vld [vmem:[#allocation6 + $0x40] sm:$0xff]   ;;  %v802_v4 = vld [vmem:[#allocation6 + $0x48] sm:$0xff]   ;;  %s1024_s5 = smov [#allocation14]  }
  0x71   :  { %v799_v1 = vld [vmem:[#allocation6 + $0xc0] sm:$0xff]   ;;  %731 = vmatprep.subr.bf16.mxu0 %v798_v0  ;;  %v803_v5 = vld [vmem:[#allocation6 + $0xc8] sm:$0xff]   ;;  %v806_v8 = vld [vmem:[#allocation6 + $0x50] sm:$0xff]   ;;  %s645_s14 = sshll.u32 %s1024_s5, 4  ;;  %s646_s14 = int_to_ptr.vmem [resolvable:$true] %s645_s14 }
  0x72   :  { %v800_v2 = vld [vmem:[#allocation6] sm:$0xff]   ;;  %759 = vmatprep.subr.bf16.mxu1 %v799_v1  ;;  %v804_v6 = vld [vmem:[#allocation6 + $0x8] sm:$0xff]   ;;  %v807_v9 = vld [vmem:[#allocation6 + $0xd0] sm:$0xff]   ;;  %s982_s24 = scalar_lea.vmem %s646_s14, 256  ;;  %p987_p7 = scmp.lt.s32.totalorder %s646_s14, %s646_s14 }
  0x73   :  { %v801_v3 = vld [vmem:[#allocation6 + $0x80] sm:$0xff]   ;;  %732 = vmatpush3.bf16.msra.mxu0 %v800_v2  ;;  %v805_v7 = vld [vmem:[#allocation6 + $0x88] sm:$0xff]   ;;  %v808_v10 = vld [vmem:[#allocation6 + $0x10] sm:$0xff]   ;;  %p983_p6 = scmp.ne.s32.totalorder %s646_s14, %s982_s24  ;;  %p988_p8 = scmp.lt.s32.totalorder %s982_s24, %s982_s24 }
  0x74   :  { %760 = vmatpush3.bf16.msra.mxu1 %v801_v3  ;;  %733 = vmatprep.subr.bf16.mxu0 %v802_v4  ;;  %v809_v11 = vld [vmem:[#allocation6 + $0x90] sm:$0xff]   ;;  %v810_v12 = vld [vmem:[#allocation6 + $0x58] sm:$0xff]   ;;  %v814_v16 = vld [vmem:[#allocation6 + $0x60] sm:$0xff]  }
  0x75   :  { %761 = vmatprep.subr.bf16.mxu1 %v803_v5  ;;  %v811_v13 = vld [vmem:[#allocation6 + $0xd8] sm:$0xff]   ;;  %v815_v17 = vld [vmem:[#allocation6 + $0xe0] sm:$0xff]   ;;  %v818_v20 = vld [vmem:[#allocation6 + $0x68] sm:$0xff]   ;;  %p989_p9 = por %p988_p8, %p987_p7 }
  0x76   :  { %v812_v14 = vld [vmem:[#allocation6 + $0x18] sm:$0xff]   ;;  %v816_v18 = vld [vmem:[#allocation6 + $0x20] sm:$0xff]   ;;  %v819_v21 = vld [vmem:[#allocation6 + $0xe8] sm:$0xff]  }
  0x77   :  { %734 = vmatpush3.bf16.msra.mxu0 %v804_v6  ;;  %v813_v15 = vld [vmem:[#allocation6 + $0x98] sm:$0xff]   ;;  %v817_v19 = vld [vmem:[#allocation6 + $0xa0] sm:$0xff]   ;;  %v820_v22 = vld [vmem:[#allocation6 + $0x28] sm:$0xff]   ;;  %p990_p10 = pnand %p989_p9, %p983_p6 }
  0x78   :  { %762 = vmatpush3.bf16.msra.mxu1 %v805_v7  ;;  %735 = vmatprep.subr.bf16.mxu0 %v806_v8  ;;  %v821_v23 = vld [vmem:[#allocation6 + $0xa8] sm:$0xff]   ;;  %v822_v24 = vld [vmem:[#allocation6 + $0x70] sm:$0xff]   ;;  %v826_v28 = vld [vmem:[#allocation6 + $0x78] sm:$0xff]  }
  0x79   :  { %763 = vmatprep.subr.bf16.mxu1 %v807_v9  ;;  %v823_v25 = vld [vmem:[#allocation6 + $0xf0] sm:$0xff]   ;;  %v827_v29 = vld [vmem:[#allocation6 + $0xf8] sm:$0xff]   ;;  %v712_v46 = vld [vmem:[#allocation9] sm:$0xff]  }
  0x7a   :  { %v824_v26 = vld [vmem:[#allocation6 + $0x30] sm:$0xff]   ;;  %v828_v30 = vld [vmem:[#allocation6 + $0x38] sm:$0xff]   ;;  %v700_v52 = vld [vmem:[#allocation8] ss:$0 sm:$0xff]  ;;  %v713_v55 = vunpack.c.l.bf16 %v712_v46  ;;  %v714_v63 = vunpack.c.h.bf16 %v712_v46 }
  0x7b   :  { %736 = vmatpush3.bf16.msra.mxu0 %v808_v10  ;;  %v825_v27 = vld [vmem:[#allocation6 + $0xb0] sm:$0xff]   ;;  %v829_v31 = vld [vmem:[#allocation6 + $0xb8] sm:$0xff]  }
  0x7c   :  { %764 = vmatpush3.bf16.msra.mxu1 %v809_v11  ;;  %737 = vmatprep.subr.bf16.mxu0 %v810_v12  ;;  %v830_v32 = vld [vmem:[#allocation3] ss:$16 sps:$4 sm:$0xff]   ;;  %v832_v33 = vld [vmem:[#allocation3 + $0x4] ss:$16 sps:$4 sm:$0xff]   ;;  %v833_v34 = vld [vmem:[#allocation3 + $0x8] ss:$16 sps:$4 sm:$0xff]  }
  0x7d   :  { %765 = vmatprep.subr.bf16.mxu1 %v811_v13  ;;  %v835_v35 = vld [vmem:[#allocation3 + $0xc] ss:$16 sps:$4 sm:$0xff]   ;;  %449 = vmatprep.mubr.bf16.mxu0 %v832_v33  ;;  %v836_v36 = vld [vmem:[#allocation3 + $0x24] ss:$16 sps:$4 sm:$0xff]   ;;  %v840_v38 = vld [vmem:[#allocation3 + $0x20] ss:$16 sps:$4 sm:$0xff]  }
  0x7e   :  { %498 = vmatprep.mubr.bf16.mxu1 %v835_v35  ;;  %v838_v37 = vld [vmem:[#allocation3 + $0x2c] ss:$16 sps:$4 sm:$0xff]   ;;  %v841_v39 = vld [vmem:[#allocation3 + $0x28] ss:$16 sps:$4 sm:$0xff]  }
  0x7f   :  { %738 = vmatpush3.bf16.msra.mxu0 %v812_v14  ;;  %v729_v3 = vld [vmem:[#allocation9 + $0x8] sm:$0xff]  }
  0x80   :  { %766 = vmatpush3.bf16.msra.mxu1 %v813_v15  ;;  %739 = vmatprep.subr.bf16.mxu0 %v814_v16  ;;  %v717_v12 = vunpack.c.l.bf16 %v729_v3 }
  0x81   :  { %767 = vmatprep.subr.bf16.mxu1 %v815_v17  ;;  %v718_v17 = vunpack.c.h.bf16 %v729_v3 }
  0x83   :  { %740 = vmatpush3.bf16.msra.mxu0 %v816_v18 }
  0x84   :  { %768 = vmatpush3.bf16.msra.mxu1 %v817_v19  ;;  %741 = vmatprep.subr.bf16.mxu0 %v818_v20 }
  0x85   :  { %769 = vmatprep.subr.bf16.mxu1 %v819_v21 }
  0x87   :  { %742 = vmatpush3.bf16.msra.mxu0 %v820_v22 }
  0x88   :  { %770 = vmatpush3.bf16.msra.mxu1 %v821_v23  ;;  %743 = vmatprep.subr.bf16.mxu0 %v822_v24 }
  0x89   :  { %771 = vmatprep.subr.bf16.mxu1 %v823_v25 }
  0x8b   :  { %744 = vmatpush3.bf16.msra.mxu0 %v824_v26 }
  0x8c   :  { %772 = vmatpush3.bf16.msra.mxu1 %v825_v27  ;;  %745 = vmatprep.subr.bf16.mxu0 %v826_v28 }
  0x8d   :  { %773 = vmatprep.subr.bf16.mxu1 %v827_v29 }
  0x8f   :  { %746 = vmatpush3.bf16.msra.mxu0 %v828_v30 }
  0x90   :  { %774 = vmatpush3.bf16.msra.mxu1 %v829_v31 }
  0x92   :  { %450 = vmatmul.mubr.bf16.vlgmr.msra.gmra.mrb[0].mxu0 %v830_v32 }
  0x93   :  { %499 = vmatmul.mubr.bf16.vlgmr.msra.gmra.mrb[0].mxu1 %v833_v34  ;;  %457 = vmatprep.mubr.bf16.mxu0 %v836_v36 }
  0x94   :  { %506 = vmatprep.mubr.bf16.mxu1 %v838_v37 }
  0x9a   :  { %458 = vmatmul.mubr.bf16.gmra.mrb[4].mxu0 %v840_v38 }
  0x9b   :  { %507 = vmatmul.mubr.bf16.gmra.mrb[4].mxu1 %v841_v39 }
 0x165   :  { %v747_v40 = vpop.f32.mrb[0].mxu0 }
 0x166   :  { %v775_v41 = vpop.f32.mrb[0].mxu1  ;;  %v748_v42 = vpop.f32.mrb[1].mxu0 }
 0x167   :  { %v749_v43 = vadd.f32 %v748_v42, %v747_v40  ;;  %v776_v44 = vpop.f32.mrb[1].mxu1  ;;  %v750_v45 = vpop.f32.mrb[2].mxu0 }
 0x168   :  { %v777_v47 = vadd.f32 %v776_v44, %v775_v41  ;;  %v778_v48 = vpop.f32.mrb[2].mxu1  ;;  %v751_v49 = vpop.f32.mrb[3].mxu0 }
 0x169   :  { %v752_v50 = vadd.f32 %v751_v49, %v750_v45  ;;  %v779_v51 = vpop.f32.mrb[3].mxu1  ;;  %v701_v49 = vld [vmem:[#allocation11] ss:$0 sm:$0xff] }
 0x16a   :  { %v501_v53 = vadd.f32 %v777_v47, %v749_v43  ;;  %v780_v54 = vadd.f32 %v779_v51, %v778_v48 }
 0x16c   :  { %v504_v56 = vadd.f32 %v780_v54, %v752_v50  ;;  %v537_v57 = vadd.f32 %v700_v52, %v501_v53  ;;  %v702_v53 = vld [vmem:[#allocation12] ss:$0 sm:$0xff] }
 0x16d   :  { %v753_v58 = vpop.f32.mrb[4].mxu0 }
 0x16e   :  { %v781_v59 = vpop.f32.mrb[4].mxu1  ;;  %v754_v60 = vpop.f32.mrb[5].mxu0  ;;  %v549_v61 = vadd.f32 %v713_v55, %v537_v57  ;;  %v538_v62 = vadd.f32 %v700_v52, %v504_v56 }
 0x16f   :  { %v755_v0 = vadd.f32 %v754_v60, %v753_v58  ;;  %v782_v1 = vpop.f32.mrb[5].mxu1  ;;  %v756_v2 = vpop.f32.mrb[6].mxu0 }
 0x170   :  { %v783_v4 = vadd.f32 %v782_v1, %v781_v59  ;;  %v784_v5 = vpop.f32.mrb[6].mxu1  ;;  %553 = vadd.xlane.f32.xlu0 %v549_v61  ;;  %v757_v6 = vpop.f32.mrb[7].mxu0  ;;  %v550_v11 = vadd.f32 %v714_v63, %v538_v62 }
 0x171   :  { %v758_v7 = vadd.f32 %v757_v6, %v756_v2  ;;  %v785_v8 = vpop.f32.mrb[7].mxu1 }
 0x172   :  { %v509_v9 = vadd.f32 %v783_v4, %v755_v0  ;;  %v786_v10 = vadd.f32 %v785_v8, %v784_v5 }
 0x174   :  { %v512_v13 = vadd.f32 %v786_v10, %v758_v7  ;;  %555 = vadd.xlane.f32.xlu0 %v550_v11  ;;  %v539_v14 = vadd.f32 %v700_v52, %v509_v9 }
 0x176   :  { %v551_v15 = vadd.f32 %v717_v12, %v539_v14  ;;  %v540_v16 = vadd.f32 %v700_v52, %v512_v13 }
 0x178   :  { %557 = vadd.xlane.f32.xlu1 %v551_v15  ;;  %v552_v18 = vadd.f32 %v718_v17, %v540_v16 }
 0x17c   :  { %559 = vadd.xlane.f32.xlu1 %v552_v18 }
 0x1fd   :  { %v554_v19 = vpop.xlane.xlu0 %553 }
 0x1fe   :  { %v562_v20 = vmul.f32 0.0078125, %v554_v19 }
 0x200   :  { %v566_v21 = vsub.f32 %v549_v61, %v562_v20 }
 0x201   :  { %v556_v22 = vpop.xlane.xlu0 %555 }
 0x202   :  { %v563_v23 = vmul.f32 0.0078125, %v556_v22  ;;  %v570_v24 = vmul.f32 %v566_v21, %v566_v21 }
 0x204   :  { %v567_v25 = vsub.f32 %v550_v11, %v563_v23  ;;  %574 = vadd.xlane.f32.xlu0 %v570_v24 }
 0x205   :  { %v558_v26 = vpop.xlane.xlu1 %557 }
 0x206   :  { %v564_v27 = vmul.f32 0.0078125, %v558_v26  ;;  %v571_v28 = vmul.f32 %v567_v25, %v567_v25 }
 0x208   :  { %v568_v29 = vsub.f32 %v551_v15, %v564_v27  ;;  %576 = vadd.xlane.f32.xlu1 %v571_v28 }
 0x209   :  { %v560_v30 = vpop.xlane.xlu1 %559 }
 0x20a   :  { %v565_v31 = vmul.f32 0.0078125, %v560_v30  ;;  %v572_v32 = vmul.f32 %v568_v29, %v568_v29 }
 0x20c   :  { %v569_v33 = vsub.f32 %v552_v18, %v565_v31  ;;  %578 = vadd.xlane.f32.xlu0 %v572_v32 }
 0x20e   :  { %v573_v34 = vmul.f32 %v569_v33, %v569_v33 }
 0x210   :  { %580 = vadd.xlane.f32.xlu1 %v573_v34 }
 0x291   :  { %v575_v35 = vpop.xlane.xlu0 %574 }
 0x292   :  { %v582_v36 = vmul.f32 0.0078125, %v575_v35 }
 0x294   :  { %v586_v37 = vadd.f32 1e-12, %v582_v36 }
 0x295   :  { %v577_v38 = vpop.xlane.xlu1 %576 }
 0x296   :  { %842 = vrsqrt.f32 %v586_v37  ;;  %v583_v39 = vmul.f32 0.0078125, %v577_v38 }
 0x298   :  { %v587_v40 = vadd.f32 1e-12, %v583_v39 }
 0x299   :  { %v579_v41 = vpop.xlane.xlu0 %578 }
 0x29a   :  { %844 = vrsqrt.f32 %v587_v40  ;;  %v584_v42 = vmul.f32 0.0078125, %v579_v41 }
 0x29c   :  { %v588_v43 = vadd.f32 1e-12, %v584_v42 }
 0x29d   :  { %v581_v44 = vpop.xlane.xlu1 %580 }
 0x29e   :  { %846 = vrsqrt.f32 %v588_v43  ;;  %v585_v45 = vmul.f32 0.0078125, %v581_v44 }
 0x2a0   :  { %v843_v46 = vpop.eup %842  ;;  %v589_v47 = vadd.f32 1e-12, %v585_v45 }
 0x2a1   :  { %v594_v48 = vmul.f32 %v843_v46, %v566_v21 }
 0x2a2   :  { %848 = vrsqrt.f32 %v589_v47 }
 0x2a3   :  { %v605_v52 = vmul.f32 %v701_v49, %v594_v48 }
 0x2a4   :  { %v845_v50 = vpop.eup %844 }
 0x2a5   :  { %v595_v51 = vmul.f32 %v845_v50, %v567_v25  ;;  %v616_v57 = vadd.f32 %v702_v53, %v605_v52 }
 0x2a7   :  { %v606_v54 = vmul.f32 %v701_v49, %v595_v51 }
 0x2a8   :  { %v847_v55 = vpop.eup %846 }
 0x2a9   :  { %v596_v56 = vmul.f32 %v847_v55, %v568_v29  ;;  %v617_v58 = vadd.f32 %v702_v53, %v606_v54 }
 0x2ab   :  { %v722_v59 = vpack.c.bf16 %v617_v58, %v616_v57  ;;  %v607_v62 = vmul.f32 %v701_v49, %v596_v56 }
 0x2ac   :  { %v849_v60 = vpop.eup %848 }
 0x2ad   :  { %v597_v61 = vmul.f32 %v849_v60, %v569_v33  ;;  %723 = vst [vmem:[#allocation14] sm:$0xff] %v722_v59   ;;  %v618_v0 = vadd.f32 %v702_v53, %v607_v62 }
 0x2af   :  { %v608_v63 = vmul.f32 %v701_v49, %v597_v61 }
 0x2b1   :  { %v619_v1 = vadd.f32 %v702_v53, %v608_v63 }
 0x2b3   :  { %v727_v2 = vpack.c.bf16 %v619_v1, %v618_v0 }
 0x2b5   :  { %730 = vst [vmem:[#allocation14 + $0x8] sm:$0xff] %v727_v2  }
 0x2b6   :  { %993 = shalt.err (!%p990_p10)
}
 0x2b7   :  { %s994_s27 = scalar_lea.hbm %s1159_s6, 256 }
 0x2b8   :  { %p995_p11 = scmp.ne.s32.totalorder %s1159_s6, %s994_s27  ;;  %p998_p12 = scmp.lt.u32.totalorder %s994_s27, %s1159_s6 }
 0x2ba   :  { %p1000_p13 = pnand %p998_p12, %p995_p11 }
 0x2bc   :  { %1003 = shalt.err (!%p1000_p13)
}
 0x2bd   :  { %651 = dma.vmem_to_hbm [thread:$0]  %s646_s14, 256, %s1159_s6, [#allocation5], %s1015_s7, %s1015_s7, %s1016_s8  }
 0x2be   :  { %1012 = dma.done.wait [#allocation5], 256  }
 0x2bf   :  { %1013 = vsyncadd [#allocation5], 4294967040 }
 0x2c0   :  { %655 = vsyncpa [#allocation4], 1 }
 0x2c1   :  { %656 = vsyncpa [#allocation7], 1 }
 0x2c2   :  { %657 = vsyncpa [#allocation10], 1 }
 0x2c3   :  { %658 = vsyncpa [#allocation13], 1 }
 0x2c4   :  { %659 = vsyncpa [#allocation5], 1 }

// kernel: stage1_forward.126
= control target key start
LH: loop header
LB: loop body
LE: loop exit
PB: predicated region body
PF: predicated region fallthrough
CT: control target
= control target key end

     0   :  { %8 = vsyncpa [#allocation4], 0  ;;  %s800_s0 = inlined_call_operand.hbm [shape: bf16[32,128], index: 0, kind: input, shape index: {}]   ;;  %s801_s1 = inlined_call_operand.hbm [shape: bf16[128,512], index: 1, kind: input, shape index: {}]   ;;  %s802_s2 = inlined_call_operand.hbm [shape: f32[1,512], index: 2, kind: input, shape index: {}]   ;;  %s803_s3 = inlined_call_operand.hbm [shape: f32[32,512], index: 3, kind: output, shape index: {}]  }
   0x1   :  { %9 = vsyncpa [#allocation7], 0 }
   0x2   :  { %10 = vsyncpa [#allocation5], 0  ;;  %s717_s12 = smov [#allocation6]   ;;  %s623_s16 = scalar_lea.hbm %s801_s1, 4096 }
   0x3   :  { %s28_s13 = sshll.u32 %s717_s12, 4  ;;  %p624_p0 = scmp.ne.s32.totalorder %s801_s1, %s623_s16  ;;  %s29_s13 = int_to_ptr.vmem [resolvable:$true] %s28_s13 }
   0x4   :  { %p627_p1 = scmp.lt.u32.totalorder %s623_s16, %s801_s1 }
   0x6   :  { %p629_p2 = pnand %p627_p1, %p624_p0 }
   0x8   :  { %632 = shalt.err (!%p629_p2)
}
   0x9   :  { %s633_s21 = scalar_lea.vmem %s29_s13, 4096  ;;  %p638_p4 = scmp.lt.s32.totalorder %s29_s13, %s29_s13 }
   0xa   :  { %p634_p3 = scmp.ne.s32.totalorder %s29_s13, %s633_s21  ;;  %p639_p5 = scmp.lt.s32.totalorder %s633_s21, %s633_s21 }
   0xc   :  { %p640_p6 = por %p639_p5, %p638_p4 }
   0xe   :  { %p641_p7 = pnand %p640_p6, %p634_p3 }
  0x10   :  { %644 = shalt.err (!%p641_p7)
}
  0x11   :  { %s718_s22 = smov 256   ;;  %s719_s23 = smov 16  }
  0x12   :  { %34 = dma.hbm_to_vmem [thread:$0]  %s801_s1, 4096, %s29_s13, [#allocation7], %s718_s22, %s718_s22, %s719_s23  }
  0x13   :  { %s720_s26 = smov [#allocation3]   ;;  %s645_s30 = scalar_lea.hbm %s800_s0, 256 }
  0x14   :  { %s16_s27 = sshll.u32 %s720_s26, 4  ;;  %p646_p8 = scmp.ne.s32.totalorder %s800_s0, %s645_s30  ;;  %s17_s27 = int_to_ptr.vmem [resolvable:$true] %s16_s27 }
  0x15   :  { %p649_p9 = scmp.lt.u32.totalorder %s645_s30, %s800_s0 }
  0x17   :  { %p651_p10 = pnand %p649_p9, %p646_p8 }
  0x19   :  { %654 = shalt.err (!%p651_p10)
}
  0x1a   :  { %s655_s8 = scalar_lea.vmem %s17_s27, 256  ;;  %p660_p12 = scmp.lt.s32.totalorder %s17_s27, %s17_s27 }
  0x1b   :  { %p656_p11 = scmp.ne.s32.totalorder %s17_s27, %s655_s8  ;;  %p661_p13 = scmp.lt.s32.totalorder %s655_s8, %s655_s8 }
  0x1d   :  { %p662_p0 = por %p661_p13, %p660_p12 }
  0x1f   :  { %p663_p1 = pnand %p662_p0, %p656_p11 }
  0x21   :  { %666 = shalt.err (!%p663_p1)
}
  0x22   :  { %s721_s1 = smov 64   ;;  %s722_s9 = smov 4  }
  0x23   :  { %22 = dma.hbm_to_vmem [thread:$0]  %s800_s0, 256, %s17_s27, [#allocation4], %s721_s1, %s721_s1, %s722_s9  }
  0x24   :  { %s723_s12 = smov [#allocation8]   ;;  %s667_s16 = scalar_lea.hbm %s802_s2, 64 }
  0x25   :  { %s41_s13 = sshll.u32 %s723_s12, 4  ;;  %p668_p2 = scmp.ne.s32.totalorder %s802_s2, %s667_s16  ;;  %s42_s13 = int_to_ptr.vmem [resolvable:$true] %s41_s13 }
  0x26   :  { %p671_p3 = scmp.lt.u32.totalorder %s667_s16, %s802_s2 }
  0x28   :  { %p673_p4 = pnand %p671_p3, %p668_p2 }
  0x2a   :  { %676 = shalt.err (!%p673_p4)
}
  0x2b   :  { %s677_s21 = scalar_lea.vmem %s42_s13, 64  ;;  %p682_p6 = scmp.lt.s32.totalorder %s42_s13, %s42_s13 }
  0x2c   :  { %p678_p5 = scmp.ne.s32.totalorder %s42_s13, %s677_s21  ;;  %p683_p7 = scmp.lt.s32.totalorder %s677_s21, %s677_s21 }
  0x2e   :  { %p684_p8 = por %p683_p7, %p682_p6 }
  0x30   :  { %p685_p9 = pnand %p684_p8, %p678_p5 }
  0x32   :  { %688 = shalt.err (!%p685_p9)
}
  0x33   :  { %44 = dma.hbm_to_vmem [thread:$0]  %s802_s2, 64, %s42_s13, [#allocation7]  }
  0x34   :  { %711 = dma.done.wait [#allocation4], 256  }
  0x35   :  { %712 = vsyncadd [#allocation4], 4294967040 }
  0x36   :  { %713 = dma.done.wait [#allocation7], 4160  }
  0x37   :  { %714 = vsyncadd [#allocation7], 4294963136  ;;  %v724_v0 = vmov 0   ;;  %v573_v1 = vld [vmem:[#allocation6 + $0x4] ss:$16 sps:$4 sm:$0xff]   ;;  %v622_v34 = vld [vmem:[#allocation3 + $0x8] sm:$0xff]   ;;  %v458_v35 = vlaneseq }
  0x38   :  { %331 = vmatprep.mubr.bf16.mxu0 %v724_v0  ;;  %384 = vmatprep.mubr.bf16.mxu1 %v724_v0  ;;  %v575_v2 = vld [vmem:[#allocation6 + $0xc] ss:$16 sps:$4 sm:$0xff]   ;;  %v577_v3 = vld [vmem:[#allocation6] ss:$16 sps:$4 sm:$0xff]   ;;  %v578_v4 = vld [vmem:[#allocation6 + $0x8] ss:$16 sps:$4 sm:$0xff]  }
  0x39   :  { %299 = vmatprep.subr.bf16.mxu0 %v573_v1  ;;  %352 = vmatprep.subr.bf16.mxu1 %v575_v2  ;;  %v579_v5 = vld [vmem:[#allocation6 + $0x24] ss:$16 sps:$4 sm:$0xff]   ;;  %v581_v6 = vld [vmem:[#allocation6 + $0x2c] ss:$16 sps:$4 sm:$0xff]   ;;  %v583_v7 = vld [vmem:[#allocation6 + $0x20] ss:$16 sps:$4 sm:$0xff]  }
  0x3a   :  { %300 = vmatpush1.bf16.msra.mxu0 %v577_v3  ;;  %353 = vmatpush1.bf16.msra.mxu1 %v578_v4  ;;  %v584_v8 = vld [vmem:[#allocation6 + $0x28] ss:$16 sps:$4 sm:$0xff]   ;;  %v585_v9 = vld [vmem:[#allocation6 + $0x44] ss:$16 sps:$4 sm:$0xff]   ;;  %v587_v10 = vld [vmem:[#allocation6 + $0x4c] ss:$16 sps:$4 sm:$0xff]  }
  0x3b   :  { %301 = vmatprep.subr.bf16.mxu0 %v579_v5  ;;  %354 = vmatprep.subr.bf16.mxu1 %v581_v6  ;;  %v589_v11 = vld [vmem:[#allocation6 + $0x40] ss:$16 sps:$4 sm:$0xff]   ;;  %v590_v12 = vld [vmem:[#allocation6 + $0x48] ss:$16 sps:$4 sm:$0xff]   ;;  %v591_v13 = vld [vmem:[#allocation6 + $0x64] ss:$16 sps:$4 sm:$0xff]  }
  0x3c   :  { %v593_v14 = vld [vmem:[#allocation6 + $0x6c] ss:$16 sps:$4 sm:$0xff]   ;;  %v595_v15 = vld [vmem:[#allocation6 + $0x60] ss:$16 sps:$4 sm:$0xff]   ;;  %v596_v16 = vld [vmem:[#allocation6 + $0x68] ss:$16 sps:$4 sm:$0xff]  }
  0x3d   :  { %v597_v17 = vld [vmem:[#allocation6 + $0x84] ss:$16 sps:$4 sm:$0xff]   ;;  %v599_v18 = vld [vmem:[#allocation6 + $0x8c] ss:$16 sps:$4 sm:$0xff]   ;;  %v601_v19 = vld [vmem:[#allocation6 + $0x80] ss:$16 sps:$4 sm:$0xff]  }
  0x3e   :  { %302 = vmatpush1.bf16.msra.mxu0 %v583_v7  ;;  %355 = vmatpush1.bf16.msra.mxu1 %v584_v8  ;;  %v602_v20 = vld [vmem:[#allocation6 + $0x88] ss:$16 sps:$4 sm:$0xff]   ;;  %v603_v21 = vld [vmem:[#allocation6 + $0xa4] ss:$16 sps:$4 sm:$0xff]   ;;  %v605_v22 = vld [vmem:[#allocation6 + $0xac] ss:$16 sps:$4 sm:$0xff]  }
  0x3f   :  { %303 = vmatprep.subr.bf16.mxu0 %v585_v9  ;;  %356 = vmatprep.subr.bf16.mxu1 %v587_v10  ;;  %v607_v23 = vld [vmem:[#allocation6 + $0xa0] ss:$16 sps:$4 sm:$0xff]   ;;  %v608_v24 = vld [vmem:[#allocation6 + $0xa8] ss:$16 sps:$4 sm:$0xff]   ;;  %v609_v25 = vld [vmem:[#allocation6 + $0xc4] ss:$16 sps:$4 sm:$0xff]  }
  0x40   :  { %v611_v26 = vld [vmem:[#allocation6 + $0xcc] ss:$16 sps:$4 sm:$0xff]   ;;  %v613_v27 = vld [vmem:[#allocation6 + $0xc0] ss:$16 sps:$4 sm:$0xff]   ;;  %v614_v28 = vld [vmem:[#allocation6 + $0xc8] ss:$16 sps:$4 sm:$0xff]  }
  0x41   :  { %v615_v29 = vld [vmem:[#allocation6 + $0xe4] ss:$16 sps:$4 sm:$0xff]   ;;  %v617_v30 = vld [vmem:[#allocation6 + $0xec] ss:$16 sps:$4 sm:$0xff]   ;;  %v619_v31 = vld [vmem:[#allocation6 + $0xe0] ss:$16 sps:$4 sm:$0xff]  }
  0x42   :  { %304 = vmatpush1.bf16.msra.mxu0 %v589_v11  ;;  %357 = vmatpush1.bf16.msra.mxu1 %v590_v12  ;;  %v620_v32 = vld [vmem:[#allocation6 + $0xe8] ss:$16 sps:$4 sm:$0xff]   ;;  %v621_v33 = vld [vmem:[#allocation3] sm:$0xff]   ;;  %v459_v36 = vshrl.u32 %v458_v35, 7  ;;  %v456_v39 = vld [vmem:[#allocation8] sm:$0xf] }
  0x43   :  { %305 = vmatprep.subr.bf16.mxu0 %v591_v13  ;;  %358 = vmatprep.subr.bf16.mxu1 %v593_v14  ;;  %s725_s2 = smov [#allocation9]  }
  0x44   :  { %v460_v37 = vsub.s32 0, %v459_v36  ;;  %v468_v38 = vsub.s32 2, %v459_v36  ;;  %v464_v40 = vsub.s32 1, %v459_v36  ;;  %v472_v41 = vsub.s32 3, %v459_v36  ;;  %s515_s23 = sshll.u32 %s725_s2, 4  ;;  %s516_s23 = int_to_ptr.vmem [resolvable:$true] %s515_s23 }
  0x45   :  { %s689_s24 = scalar_lea.vmem %s516_s23, 2048  ;;  %p694_p11 = scmp.lt.s32.totalorder %s516_s23, %s516_s23 }
  0x46   :  { %306 = vmatpush1.bf16.msra.mxu0 %v595_v15  ;;  %359 = vmatpush1.bf16.msra.mxu1 %v596_v16  ;;  %v461_v42 = vrot.slane %v456_v39, %v460_v37  ;;  %v469_v43 = vrot.slane %v456_v39, %v468_v38  ;;  %v465_v44 = vrot.slane %v456_v39, %v464_v40  ;;  %p690_p10 = scmp.ne.s32.totalorder %s516_s23, %s689_s24  ;;  %p695_p12 = scmp.lt.s32.totalorder %s689_s24, %s689_s24 }
  0x47   :  { %307 = vmatprep.subr.bf16.mxu0 %v597_v17  ;;  %360 = vmatprep.subr.bf16.mxu1 %v599_v18  ;;  %v473_v45 = vrot.slane %v456_v39, %v472_v41 }
  0x48   :  { %p696_p13 = por %p695_p12, %p694_p11 }
  0x4a   :  { %308 = vmatpush1.bf16.msra.mxu0 %v601_v19  ;;  %361 = vmatpush1.bf16.msra.mxu1 %v602_v20  ;;  %p697_p0 = pnand %p696_p13, %p690_p10 }
  0x4b   :  { %309 = vmatprep.subr.bf16.mxu0 %v603_v21  ;;  %362 = vmatprep.subr.bf16.mxu1 %v605_v22 }
  0x4e   :  { %310 = vmatpush1.bf16.msra.mxu0 %v607_v23  ;;  %363 = vmatpush1.bf16.msra.mxu1 %v608_v24 }
  0x4f   :  { %311 = vmatprep.subr.bf16.mxu0 %v609_v25  ;;  %364 = vmatprep.subr.bf16.mxu1 %v611_v26 }
  0x52   :  { %312 = vmatpush1.bf16.msra.mxu0 %v613_v27  ;;  %365 = vmatpush1.bf16.msra.mxu1 %v614_v28 }
  0x53   :  { %313 = vmatprep.subr.bf16.mxu0 %v615_v29  ;;  %366 = vmatprep.subr.bf16.mxu1 %v617_v30 }
  0x56   :  { %314 = vmatpush1.bf16.msra.mxu0 %v619_v31  ;;  %367 = vmatpush1.bf16.msra.mxu1 %v620_v32 }
  0x59   :  { %332 = vmatmul.mubr.bf16.vlgmr.msra.gmra.mrb[0].mxu0 %v621_v33  ;;  %385 = vmatmul.mubr.bf16.vlgmr.msra.gmra.mrb[0].mxu1 %v621_v33 }
  0x5a   :  { %341 = vmatprep.mubr.bf16.mxu0 %v724_v0  ;;  %394 = vmatprep.mubr.bf16.mxu1 %v724_v0 }
  0x61   :  { %342 = vmatmul.mubr.bf16.gmra.mrb[4].mxu0 %v622_v34  ;;  %395 = vmatmul.mubr.bf16.gmra.mrb[4].mxu1 %v622_v34 }
 0x12c   :  { %v333_v46 = vpop.f32.mrb[0].mxu0  ;;  %v386_v47 = vpop.f32.mrb[0].mxu1 }
 0x12d   :  { %v478_v48 = vadd.f32 %v461_v42, %v333_v46  ;;  %v480_v49 = vadd.f32 %v469_v43, %v386_v47  ;;  %v335_v50 = vpop.f32.mrb[1].mxu0  ;;  %v388_v51 = vpop.f32.mrb[1].mxu1 }
 0x12e   :  { %v479_v52 = vadd.f32 %v465_v44, %v335_v50  ;;  %v481_v53 = vadd.f32 %v473_v45, %v388_v51  ;;  %v337_v54 = vpop.f32.mrb[2].mxu0  ;;  %v390_v55 = vpop.f32.mrb[2].mxu1 }
 0x12f   :  { %494 = vst [vmem:[#allocation9] sm:$0xff] %v478_v48  ;;  %496 = vst [vmem:[#allocation9 + $0x10] sm:$0xff] %v480_v49  ;;  %v482_v56 = vadd.f32 %v461_v42, %v337_v54  ;;  %v484_v57 = vadd.f32 %v469_v43, %v390_v55  ;;  %v339_v58 = vpop.f32.mrb[3].mxu0  ;;  %v392_v59 = vpop.f32.mrb[3].mxu1 }
 0x130   :  { %495 = vst [vmem:[#allocation9 + $0x8] sm:$0xff] %v479_v52  ;;  %497 = vst [vmem:[#allocation9 + $0x18] sm:$0xff] %v481_v53  ;;  %v483_v60 = vadd.f32 %v465_v44, %v339_v58  ;;  %v485_v61 = vadd.f32 %v473_v45, %v392_v59 }
 0x131   :  { %498 = vst [vmem:[#allocation9 + $0x20] sm:$0xff] %v482_v56  ;;  %500 = vst [vmem:[#allocation9 + $0x30] sm:$0xff] %v484_v57 }
 0x132   :  { %499 = vst [vmem:[#allocation9 + $0x28] sm:$0xff] %v483_v60  ;;  %501 = vst [vmem:[#allocation9 + $0x38] sm:$0xff] %v485_v61 }
 0x134   :  { %v343_v62 = vpop.f32.mrb[4].mxu0  ;;  %v396_v63 = vpop.f32.mrb[4].mxu1 }
 0x135   :  { %v486_v0 = vadd.f32 %v461_v42, %v343_v62  ;;  %v488_v1 = vadd.f32 %v469_v43, %v396_v63  ;;  %v345_v2 = vpop.f32.mrb[5].mxu0  ;;  %v398_v3 = vpop.f32.mrb[5].mxu1 }
 0x136   :  { %v487_v4 = vadd.f32 %v465_v44, %v345_v2  ;;  %v489_v5 = vadd.f32 %v473_v45, %v398_v3  ;;  %v347_v6 = vpop.f32.mrb[6].mxu0  ;;  %v400_v7 = vpop.f32.mrb[6].mxu1 }
 0x137   :  { %502 = vst [vmem:[#allocation9 + $0x40] sm:$0xff] %v486_v0  ;;  %504 = vst [vmem:[#allocation9 + $0x50] sm:$0xff] %v488_v1  ;;  %v490_v8 = vadd.f32 %v461_v42, %v347_v6  ;;  %v492_v9 = vadd.f32 %v469_v43, %v400_v7  ;;  %v349_v10 = vpop.f32.mrb[7].mxu0  ;;  %v402_v11 = vpop.f32.mrb[7].mxu1 }
 0x138   :  { %503 = vst [vmem:[#allocation9 + $0x48] sm:$0xff] %v487_v4  ;;  %505 = vst [vmem:[#allocation9 + $0x58] sm:$0xff] %v489_v5  ;;  %v491_v12 = vadd.f32 %v465_v44, %v349_v10  ;;  %v493_v13 = vadd.f32 %v473_v45, %v402_v11 }
 0x139   :  { %506 = vst [vmem:[#allocation9 + $0x60] sm:$0xff] %v490_v8  ;;  %508 = vst [vmem:[#allocation9 + $0x70] sm:$0xff] %v492_v9 }
 0x13a   :  { %507 = vst [vmem:[#allocation9 + $0x68] sm:$0xff] %v491_v12  ;;  %509 = vst [vmem:[#allocation9 + $0x78] sm:$0xff] %v493_v13 }
 0x13b   :  { %700 = shalt.err (!%p697_p0)
}
 0x13c   :  { %s701_s27 = scalar_lea.hbm %s803_s3, 2048 }
 0x13d   :  { %p702_p1 = scmp.ne.s32.totalorder %s803_s3, %s701_s27  ;;  %p705_p2 = scmp.lt.u32.totalorder %s701_s27, %s803_s3 }
 0x13f   :  { %p707_p3 = pnand %p705_p2, %p702_p1 }
 0x141   :  { %710 = shalt.err (!%p707_p3)
}
 0x142   :  { %s726_s5 = smov 512   ;;  %s727_s6 = smov 32  }
 0x143   :  { %521 = dma.vmem_to_hbm [thread:$0]  %s516_s23, 2048, %s803_s3, [#allocation5], %s726_s5, %s726_s5, %s727_s6  }
 0x144   :  { %715 = dma.done.wait [#allocation5], 2048  }
 0x145   :  { %716 = vsyncadd [#allocation5], 4294965248 }
 0x146   :  { %525 = vsyncpa [#allocation4], 1 }
 0x147   :  { %526 = vsyncpa [#allocation7], 1 }
 0x148   :  { %527 = vsyncpa [#allocation5], 1 }

</bundles_post_ra>
